<compile_context>
chip_gen: v7x
topology: tpu7x:2x2x1
jax: 0.10.0
libtpu: 0.0.40
codegen_flags: <defaults>
</compile_context>

<pallas_src>
import functools

import jax
import jax.numpy as jnp
from jax import lax
from jax.experimental import pallas as pl
from jax.experimental.pallas import tpu as pltpu


def _round_up(x, m):
    return ((x + m - 1) // m) * m


# ----------------------------- fused kernel ------------------------------- #
def _fused_kernel(x_ref, cw9_ref, cb_ref, fw_ref, fb_ref, hw_ref, hb_ref,
                  o_ref, *, wp):
    """One batch tile: conv3x3(pad=1)+ReLU -> flatten -> fc+ReLU -> head.

    x_ref  : (BT, Cin, L)      f32   spatially zero-padded, row-stride = wp
    cw9_ref: (9, Cout, Cin)    f32   conv taps, k = kh*3 + kw
    cb_ref : (Cout, 1)         f32
    fw_ref : (Cout, Q, hidden) bf16  Q = H*wp, garbage columns zeroed
    fb_ref : (1, hidden)       f32
    hw_ref : (hidden, 128)     bf16  classes zero-padded to 128 lanes
    hb_ref : (1, 128)          f32
    o_ref  : (BT, 128)         f32
    """
    bt = x_ref.shape[0]
    cout, cin = cw9_ref.shape[1], cw9_ref.shape[2]
    q_len = fw_ref.shape[1]
    hidden = fw_ref.shape[2]

    xb = x_ref[...]                                         # (bt, Cin, L) f32

    # ---- conv: 9 shifted-window batched matmuls (in-kernel im2col) ------- #
    # Window for tap (kh, kw) is a static lane-offset slice; since the input
    # carries a zero halo and we keep the padded row stride wp in the output
    # grid, no boundary masks are required.
    conv = None
    for k in range(9):
        kh, kw = divmod(k, 3)
        s = kh * wp + kw
        win = xb[:, :, s:s + q_len]                         # (bt, Cin, Q)
        wk = jnp.broadcast_to(cw9_ref[k], (bt, cout, cin))  # (bt, Cout, Cin)
        part = lax.dot_general(
            wk, win,
            dimension_numbers=(((2,), (1,)), ((0,), (0,))),
            preferred_element_type=jnp.float32)             # (bt, Cout, Q)
        conv = part if conv is None else conv + part
    conv = jnp.maximum(conv + cb_ref[...], 0.0)             # f32 epilogue
    conv_bf = conv.astype(jnp.bfloat16)

    # ---- fc: rep[b] = sum_c conv[b, c, :] @ fw[c], f32 accumulator -------- #
    rep = jnp.broadcast_to(fb_ref[...], (bt, hidden))       # (bt, hidden) f32
    for c in range(cout):
        rep = rep + jnp.dot(conv_bf[:, c, :], fw_ref[c],
                            preferred_element_type=jnp.float32)
    rep = jnp.maximum(rep, 0.0)

    # ---- head: lane-dense (bt, 128) store --------------------------------- #
    out = jnp.dot(rep.astype(jnp.bfloat16), hw_ref[...],
                  preferred_element_type=jnp.float32) + hb_ref[...]
    o_ref[...] = out.astype(o_ref.dtype)


# --------------------------- parameter init -------------------------------- #
def init_params(key, cin=4, cout=8, hw=16, hidden=32, num_classes=10):
    k1, k2, k3, k4, k5, k6 = jax.random.split(key, 6)
    scale = 0.05
    return {
        "conv_w": scale * jax.random.normal(k1, (cout, cin, 3, 3), jnp.float32),
        "conv_b": scale * jax.random.normal(k2, (cout,), jnp.float32),
        "fc_w":   scale * jax.random.normal(k3, (cout * hw * hw, hidden), jnp.float32),
        "fc_b":   scale * jax.random.normal(k4, (hidden,), jnp.float32),
        "head_w": scale * jax.random.normal(k5, (hidden, num_classes), jnp.float32),
        "head_b": scale * jax.random.normal(k6, (num_classes,), jnp.float32),
    }


# --------------------------- forward wrapper -------------------------------- #
def base_head_split_forward(params, x, *, block_b=128):
    """x: [B, C, H, W] NCHW float32 -> logits [B, num_classes]."""
    B, C, H, W = x.shape
    cout = params["conv_w"].shape[0]
    hidden = params["fc_w"].shape[1]
    ncls = params["head_w"].shape[1]

    hp, wp = H + 2, W + 2            # spatial halo of 1
    q_len = H * wp                   # conv output kept on the padded row stride
    lane_len = _round_up(hp * wp + 2, 128)
    ncls_p = _round_up(ncls, 128)    # lane-dense output (slice outside)

    # Batch tile: multiple of 8 sublanes, capped at 128 (v5e 16 MiB scoped
    # VMEM); on v6e/v7x block_b can be raised (256+) if desired.
    bt = min(block_b, _round_up(B, 8))
    b_pad = _round_up(B, bt)

    # ---- input prep: pad batch + spatial halo, flatten (no HBM im2col) ---- #
    x_ext = jnp.pad(x, ((0, b_pad - B), (0, 0), (1, 1), (1, 1)))
    x_ext = x_ext.reshape(b_pad, C, hp * wp)
    x_ext = jnp.pad(x_ext, ((0, 0), (0, 0), (0, lane_len - hp * wp)))

    # ---- trace-time weight prep ------------------------------------------- #
    cw9 = jnp.transpose(params["conv_w"].reshape(cout, C, 9), (2, 0, 1))  # (9,Cout,Cin)
    cb = params["conv_b"].reshape(cout, 1)
    # fc weights re-indexed onto the padded (H, W+2) grid; the two extra
    # columns per row get zero weight so garbage conv lanes contribute nothing.
    fw_p = params["fc_w"].reshape(cout, H, W, hidden)
    fw_p = jnp.pad(fw_p, ((0, 0), (0, 0), (0, 2), (0, 0)))
    fw_p = fw_p.reshape(cout, q_len, hidden).astype(jnp.bfloat16)
    fb = params["fc_b"].reshape(1, hidden)
    hw_p = jnp.pad(params["head_w"], ((0, 0), (0, ncls_p - ncls))).astype(jnp.bfloat16)
    hb_p = jnp.pad(params["head_b"], (0, ncls_p - ncls)).reshape(1, ncls_p)

    kernel = functools.partial(_fused_kernel, wp=wp)

    out = pl.pallas_call(
        kernel,
        out_shape=jax.ShapeDtypeStruct((b_pad, ncls_p), jnp.float32),
        grid=(b_pad // bt,),
        in_specs=[
            pl.BlockSpec((bt, C, lane_len), lambda i: (i, 0, 0)),       # x (per tile)
            pl.BlockSpec((9, cout, C), lambda i: (0, 0, 0)),            # conv taps
            pl.BlockSpec((cout, 1), lambda i: (0, 0)),                  # conv bias
            pl.BlockSpec((cout, q_len, hidden), lambda i: (0, 0, 0)),   # fc weights
            pl.BlockSpec((1, hidden), lambda i: (0, 0)),                # fc bias
            pl.BlockSpec((hidden, ncls_p), lambda i: (0, 0)),           # head weights
            pl.BlockSpec((1, ncls_p), lambda i: (0, 0)),                # head bias
        ],
        out_specs=pl.BlockSpec((bt, ncls_p), lambda i: (i, 0)),
        compiler_params=pltpu.CompilerParams(
            dimension_semantics=("parallel",)),
    )(x_ext, cw9, cb, fw_p, fb, hw_p, hb_p)

    return out[:B, :ncls]


# ------------------------------ reference ---------------------------------- #
def reference_forward(params, x):
    conv = lax.conv_general_dilated(
        x, params["conv_w"], window_strides=(1, 1), padding=((1, 1), (1, 1)),
        dimension_numbers=("NCHW", "OIHW", "NCHW"),
    ) + params["conv_b"][None, :, None, None]
    conv = jnp.maximum(conv, 0.0)
    B = x.shape[0]
    feat = conv.reshape(B, -1)
    rep = jnp.maximum(feat @ params["fc_w"] + params["fc_b"], 0.0)
    return rep @ params["head_w"] + params["head_b"]


# --------------------------------- main ------------------------------------- #
if __name__ == "__main__":
    key = jax.random.PRNGKey(0)
    kp, kx = jax.random.split(key)

    B, C, H, W = 2, 4, 16, 16
    params = init_params(kp, cin=C, cout=8, hw=H, hidden=32, num_classes=10)
    x = jax.random.normal(kx, (B, C, H, W), jnp.float32)

    out = base_head_split_forward(params, x)
    out = jax.block_until_ready(out)

    ref = reference_forward(params, x)
    assert out.shape == (B, 10), out.shape
    # fc/head use bf16 MXU operands -> loosened tolerance vs pure-f32 reference.
    assert jnp.allclose(out, ref, atol=2e-2, rtol=2e-2), \
        f"max abs err {jnp.max(jnp.abs(out - ref))}"

    print("KERNEL_OK")
</pallas_src>

<mosaic_0001>
module attributes {stable_mosaic.version = 11 : i64} {
  func.func @_fused_kernel(%arg0: i32, %arg1: memref<8x4x384xf32, #tpu.memory_space<vmem>>, %arg2: memref<9x8x4xf32, #tpu.memory_space<vmem>>, %arg3: memref<8x1xf32, #tpu.memory_space<vmem>>, %arg4: memref<8x288x32xbf16, #tpu.memory_space<vmem>>, %arg5: memref<1x32xf32, #tpu.memory_space<vmem>>, %arg6: memref<32x128xbf16, #tpu.memory_space<vmem>>, %arg7: memref<1x128xf32, #tpu.memory_space<vmem>>, %arg8: memref<8x128xf32, #tpu.memory_space<vmem>>) attributes {dimension_semantics = [#tpu.dimension_semantics<parallel>], iteration_bounds = array<i64: 1>, scalar_prefetch = 0 : i64, scratch_operands = 0 : i64, tpu.core_type = #tpu.core_type<tc>, window_params = [{transform_indices = @transform_0, window_bounds = array<i64: 8, 4, 384>}, {pipeline_mode = #tpu.pipeline_mode<synchronous>, transform_indices = @transform_1, window_bounds = array<i64: 9, 8, 4>}, {pipeline_mode = #tpu.pipeline_mode<synchronous>, transform_indices = @transform_2, window_bounds = array<i64: 8, 1>}, {pipeline_mode = #tpu.pipeline_mode<synchronous>, transform_indices = @transform_3, window_bounds = array<i64: 8, 288, 32>}, {pipeline_mode = #tpu.pipeline_mode<synchronous>, transform_indices = @transform_4, window_bounds = array<i64: 1, 32>}, {pipeline_mode = #tpu.pipeline_mode<synchronous>, transform_indices = @transform_5, window_bounds = array<i64: 32, 128>}, {pipeline_mode = #tpu.pipeline_mode<synchronous>, transform_indices = @transform_6, window_bounds = array<i64: 1, 128>}, {transform_indices = @transform_7, window_bounds = array<i64: 8, 128>}]} {
    %c0 = arith.constant 0 : index
    %c0_0 = arith.constant 0 : index
    %c0_1 = arith.constant 0 : index
    %0 = vector.load %arg1[%c0, %c0_0, %c0_1] : memref<8x4x384xf32, #tpu.memory_space<vmem>>, vector<8x4x384xf32>
    %1 = vector.extract_strided_slice %0 {offsets = [0, 0, 0], sizes = [8, 4, 288], strides = [1, 1, 1]} : vector<8x4x384xf32> to vector<8x4x288xf32>
    %c0_2 = arith.constant 0 : index
    %c0_3 = arith.constant 0 : index
    %c0_4 = arith.constant 0 : index
    %2 = vector.load %arg2[%c0_2, %c0_3, %c0_4] : memref<9x8x4xf32, #tpu.memory_space<vmem>>, vector<1x8x4xf32>
    %3 = vector.shape_cast %2 : vector<1x8x4xf32> to vector<8x4xf32>
    %4 = vector.shape_cast %3 : vector<8x4xf32> to vector<1x8x4xf32>
    %5 = vector.broadcast %4 : vector<1x8x4xf32> to vector<8x8x4xf32>
    %cst = arith.constant dense<0.000000e+00> : vector<8x8x288xf32>
    %6 = tpu.matmul %5, %1, %cst {dimension_numbers = #tpu.dot_dimension_numbers<[2], [1], [1], [2], [0, 0, 0, 1, 1, 2], [0], [0]>} : vector<8x8x4xf32>, vector<8x4x288xf32>, vector<8x8x288xf32> -> vector<8x8x288xf32>
    %7 = vector.extract_strided_slice %0 {offsets = [0, 0, 1], sizes = [8, 4, 288], strides = [1, 1, 1]} : vector<8x4x384xf32> to vector<8x4x288xf32>
    %c1 = arith.constant 1 : index
    %c0_5 = arith.constant 0 : index
    %c0_6 = arith.constant 0 : index
    %8 = vector.load %arg2[%c1, %c0_5, %c0_6] : memref<9x8x4xf32, #tpu.memory_space<vmem>>, vector<1x8x4xf32>
    %9 = vector.shape_cast %8 : vector<1x8x4xf32> to vector<8x4xf32>
    %10 = vector.shape_cast %9 : vector<8x4xf32> to vector<1x8x4xf32>
    %11 = vector.broadcast %10 : vector<1x8x4xf32> to vector<8x8x4xf32>
    %cst_7 = arith.constant dense<0.000000e+00> : vector<8x8x288xf32>
    %12 = tpu.matmul %11, %7, %cst_7 {dimension_numbers = #tpu.dot_dimension_numbers<[2], [1], [1], [2], [0, 0, 0, 1, 1, 2], [0], [0]>} : vector<8x8x4xf32>, vector<8x4x288xf32>, vector<8x8x288xf32> -> vector<8x8x288xf32>
    %13 = arith.addf %6, %12 : vector<8x8x288xf32>
    %14 = vector.extract_strided_slice %0 {offsets = [0, 0, 2], sizes = [8, 4, 288], strides = [1, 1, 1]} : vector<8x4x384xf32> to vector<8x4x288xf32>
    %c2 = arith.constant 2 : index
    %c0_8 = arith.constant 0 : index
    %c0_9 = arith.constant 0 : index
    %15 = vector.load %arg2[%c2, %c0_8, %c0_9] : memref<9x8x4xf32, #tpu.memory_space<vmem>>, vector<1x8x4xf32>
    %16 = vector.shape_cast %15 : vector<1x8x4xf32> to vector<8x4xf32>
    %17 = vector.shape_cast %16 : vector<8x4xf32> to vector<1x8x4xf32>
    %18 = vector.broadcast %17 : vector<1x8x4xf32> to vector<8x8x4xf32>
    %cst_10 = arith.constant dense<0.000000e+00> : vector<8x8x288xf32>
    %19 = tpu.matmul %18, %14, %cst_10 {dimension_numbers = #tpu.dot_dimension_numbers<[2], [1], [1], [2], [0, 0, 0, 1, 1, 2], [0], [0]>} : vector<8x8x4xf32>, vector<8x4x288xf32>, vector<8x8x288xf32> -> vector<8x8x288xf32>
    %20 = arith.addf %13, %19 : vector<8x8x288xf32>
    %21 = vector.extract_strided_slice %0 {offsets = [0, 0, 18], sizes = [8, 4, 288], strides = [1, 1, 1]} : vector<8x4x384xf32> to vector<8x4x288xf32>
    %c3 = arith.constant 3 : index
    %c0_11 = arith.constant 0 : index
    %c0_12 = arith.constant 0 : index
    %22 = vector.load %arg2[%c3, %c0_11, %c0_12] : memref<9x8x4xf32, #tpu.memory_space<vmem>>, vector<1x8x4xf32>
    %23 = vector.shape_cast %22 : vector<1x8x4xf32> to vector<8x4xf32>
    %24 = vector.shape_cast %23 : vector<8x4xf32> to vector<1x8x4xf32>
    %25 = vector.broadcast %24 : vector<1x8x4xf32> to vector<8x8x4xf32>
    %cst_13 = arith.constant dense<0.000000e+00> : vector<8x8x288xf32>
    %26 = tpu.matmul %25, %21, %cst_13 {dimension_numbers = #tpu.dot_dimension_numbers<[2], [1], [1], [2], [0, 0, 0, 1, 1, 2], [0], [0]>} : vector<8x8x4xf32>, vector<8x4x288xf32>, vector<8x8x288xf32> -> vector<8x8x288xf32>
    %27 = arith.addf %20, %26 : vector<8x8x288xf32>
    %28 = vector.extract_strided_slice %0 {offsets = [0, 0, 19], sizes = [8, 4, 288], strides = [1, 1, 1]} : vector<8x4x384xf32> to vector<8x4x288xf32>
    %c4 = arith.constant 4 : index
    %c0_14 = arith.constant 0 : index
    %c0_15 = arith.constant 0 : index
    %29 = vector.load %arg2[%c4, %c0_14, %c0_15] : memref<9x8x4xf32, #tpu.memory_space<vmem>>, vector<1x8x4xf32>
    %30 = vector.shape_cast %29 : vector<1x8x4xf32> to vector<8x4xf32>
    %31 = vector.shape_cast %30 : vector<8x4xf32> to vector<1x8x4xf32>
    %32 = vector.broadcast %31 : vector<1x8x4xf32> to vector<8x8x4xf32>
    %cst_16 = arith.constant dense<0.000000e+00> : vector<8x8x288xf32>
    %33 = tpu.matmul %32, %28, %cst_16 {dimension_numbers = #tpu.dot_dimension_numbers<[2], [1], [1], [2], [0, 0, 0, 1, 1, 2], [0], [0]>} : vector<8x8x4xf32>, vector<8x4x288xf32>, vector<8x8x288xf32> -> vector<8x8x288xf32>
    %34 = arith.addf %27, %33 : vector<8x8x288xf32>
    %35 = vector.extract_strided_slice %0 {offsets = [0, 0, 20], sizes = [8, 4, 288], strides = [1, 1, 1]} : vector<8x4x384xf32> to vector<8x4x288xf32>
    %c5 = arith.constant 5 : index
    %c0_17 = arith.constant 0 : index
    %c0_18 = arith.constant 0 : index
    %36 = vector.load %arg2[%c5, %c0_17, %c0_18] : memref<9x8x4xf32, #tpu.memory_space<vmem>>, vector<1x8x4xf32>
    %37 = vector.shape_cast %36 : vector<1x8x4xf32> to vector<8x4xf32>
    %38 = vector.shape_cast %37 : vector<8x4xf32> to vector<1x8x4xf32>
    %39 = vector.broadcast %38 : vector<1x8x4xf32> to vector<8x8x4xf32>
    %cst_19 = arith.constant dense<0.000000e+00> : vector<8x8x288xf32>
    %40 = tpu.matmul %39, %35, %cst_19 {dimension_numbers = #tpu.dot_dimension_numbers<[2], [1], [1], [2], [0, 0, 0, 1, 1, 2], [0], [0]>} : vector<8x8x4xf32>, vector<8x4x288xf32>, vector<8x8x288xf32> -> vector<8x8x288xf32>
    %41 = arith.addf %34, %40 : vector<8x8x288xf32>
    %42 = vector.extract_strided_slice %0 {offsets = [0, 0, 36], sizes = [8, 4, 288], strides = [1, 1, 1]} : vector<8x4x384xf32> to vector<8x4x288xf32>
    %c6 = arith.constant 6 : index
    %c0_20 = arith.constant 0 : index
    %c0_21 = arith.constant 0 : index
    %43 = vector.load %arg2[%c6, %c0_20, %c0_21] : memref<9x8x4xf32, #tpu.memory_space<vmem>>, vector<1x8x4xf32>
    %44 = vector.shape_cast %43 : vector<1x8x4xf32> to vector<8x4xf32>
    %45 = vector.shape_cast %44 : vector<8x4xf32> to vector<1x8x4xf32>
    %46 = vector.broadcast %45 : vector<1x8x4xf32> to vector<8x8x4xf32>
    %cst_22 = arith.constant dense<0.000000e+00> : vector<8x8x288xf32>
    %47 = tpu.matmul %46, %42, %cst_22 {dimension_numbers = #tpu.dot_dimension_numbers<[2], [1], [1], [2], [0, 0, 0, 1, 1, 2], [0], [0]>} : vector<8x8x4xf32>, vector<8x4x288xf32>, vector<8x8x288xf32> -> vector<8x8x288xf32>
    %48 = arith.addf %41, %47 : vector<8x8x288xf32>
    %49 = vector.extract_strided_slice %0 {offsets = [0, 0, 37], sizes = [8, 4, 288], strides = [1, 1, 1]} : vector<8x4x384xf32> to vector<8x4x288xf32>
    %c7 = arith.constant 7 : index
    %c0_23 = arith.constant 0 : index
    %c0_24 = arith.constant 0 : index
    %50 = vector.load %arg2[%c7, %c0_23, %c0_24] : memref<9x8x4xf32, #tpu.memory_space<vmem>>, vector<1x8x4xf32>
    %51 = vector.shape_cast %50 : vector<1x8x4xf32> to vector<8x4xf32>
    %52 = vector.shape_cast %51 : vector<8x4xf32> to vector<1x8x4xf32>
    %53 = vector.broadcast %52 : vector<1x8x4xf32> to vector<8x8x4xf32>
    %cst_25 = arith.constant dense<0.000000e+00> : vector<8x8x288xf32>
    %54 = tpu.matmul %53, %49, %cst_25 {dimension_numbers = #tpu.dot_dimension_numbers<[2], [1], [1], [2], [0, 0, 0, 1, 1, 2], [0], [0]>} : vector<8x8x4xf32>, vector<8x4x288xf32>, vector<8x8x288xf32> -> vector<8x8x288xf32>
    %55 = arith.addf %48, %54 : vector<8x8x288xf32>
    %56 = vector.extract_strided_slice %0 {offsets = [0, 0, 38], sizes = [8, 4, 288], strides = [1, 1, 1]} : vector<8x4x384xf32> to vector<8x4x288xf32>
    %c8 = arith.constant 8 : index
    %c0_26 = arith.constant 0 : index
    %c0_27 = arith.constant 0 : index
    %57 = vector.load %arg2[%c8, %c0_26, %c0_27] : memref<9x8x4xf32, #tpu.memory_space<vmem>>, vector<1x8x4xf32>
    %58 = vector.shape_cast %57 : vector<1x8x4xf32> to vector<8x4xf32>
    %59 = vector.shape_cast %58 : vector<8x4xf32> to vector<1x8x4xf32>
    %60 = vector.broadcast %59 : vector<1x8x4xf32> to vector<8x8x4xf32>
    %cst_28 = arith.constant dense<0.000000e+00> : vector<8x8x288xf32>
    %61 = tpu.matmul %60, %56, %cst_28 {dimension_numbers = #tpu.dot_dimension_numbers<[2], [1], [1], [2], [0, 0, 0, 1, 1, 2], [0], [0]>} : vector<8x8x4xf32>, vector<8x4x288xf32>, vector<8x8x288xf32> -> vector<8x8x288xf32>
    %62 = arith.addf %55, %61 : vector<8x8x288xf32>
    %c0_29 = arith.constant 0 : index
    %c0_30 = arith.constant 0 : index
    %63 = vector.load %arg3[%c0_29, %c0_30] : memref<8x1xf32, #tpu.memory_space<vmem>>, vector<8x1xf32>
    %64 = vector.shape_cast %63 : vector<8x1xf32> to vector<1x8x1xf32>
    %65 = vector.broadcast %64 : vector<1x8x1xf32> to vector<8x8x288xf32>
    %66 = arith.addf %62, %65 : vector<8x8x288xf32>
    %cst_31 = arith.constant 0.000000e+00 : f32
    %67 = vector.broadcast %cst_31 : f32 to vector<8x8x288xf32>
    %68 = arith.maximumf %66, %67 : vector<8x8x288xf32>
    %69 = arith.truncf %68 : vector<8x8x288xf32> to vector<8x8x288xbf16>
    %c0_32 = arith.constant 0 : index
    %c0_33 = arith.constant 0 : index
    %70 = vector.load %arg5[%c0_32, %c0_33] : memref<1x32xf32, #tpu.memory_space<vmem>>, vector<1x32xf32>
    %71 = vector.shape_cast %70 : vector<1x32xf32> to vector<1x32xf32>
    %72 = vector.broadcast %71 : vector<1x32xf32> to vector<8x32xf32>
    %73 = vector.extract_strided_slice %69 {offsets = [0, 0, 0], sizes = [8, 1, 288], strides = [1, 1, 1]} : vector<8x8x288xbf16> to vector<8x1x288xbf16>
    %74 = vector.shape_cast %73 : vector<8x1x288xbf16> to vector<8x288xbf16>
    %c0_34 = arith.constant 0 : index
    %c0_35 = arith.constant 0 : index
    %c0_36 = arith.constant 0 : index
    %75 = vector.load %arg4[%c0_34, %c0_35, %c0_36] : memref<8x288x32xbf16, #tpu.memory_space<vmem>>, vector<1x288x32xbf16>
    %76 = vector.shape_cast %75 : vector<1x288x32xbf16> to vector<288x32xbf16>
    %cst_37 = arith.constant dense<0.000000e+00> : vector<8x32xf32>
    %77 = tpu.matmul %74, %76, %cst_37 {dimension_numbers = #tpu.dot_dimension_numbers<[1], [0], [0], [1], [0, 0, 1, 1], [], []>} : vector<8x288xbf16>, vector<288x32xbf16>, vector<8x32xf32> -> vector<8x32xf32>
    %78 = arith.addf %72, %77 : vector<8x32xf32>
    %79 = vector.extract_strided_slice %69 {offsets = [0, 1, 0], sizes = [8, 1, 288], strides = [1, 1, 1]} : vector<8x8x288xbf16> to vector<8x1x288xbf16>
    %80 = vector.shape_cast %79 : vector<8x1x288xbf16> to vector<8x288xbf16>
    %c1_38 = arith.constant 1 : index
    %c0_39 = arith.constant 0 : index
    %c0_40 = arith.constant 0 : index
    %81 = vector.load %arg4[%c1_38, %c0_39, %c0_40] : memref<8x288x32xbf16, #tpu.memory_space<vmem>>, vector<1x288x32xbf16>
    %82 = vector.shape_cast %81 : vector<1x288x32xbf16> to vector<288x32xbf16>
    %cst_41 = arith.constant dense<0.000000e+00> : vector<8x32xf32>
    %83 = tpu.matmul %80, %82, %cst_41 {dimension_numbers = #tpu.dot_dimension_numbers<[1], [0], [0], [1], [0, 0, 1, 1], [], []>} : vector<8x288xbf16>, vector<288x32xbf16>, vector<8x32xf32> -> vector<8x32xf32>
    %84 = arith.addf %78, %83 : vector<8x32xf32>
    %85 = vector.extract_strided_slice %69 {offsets = [0, 2, 0], sizes = [8, 1, 288], strides = [1, 1, 1]} : vector<8x8x288xbf16> to vector<8x1x288xbf16>
    %86 = vector.shape_cast %85 : vector<8x1x288xbf16> to vector<8x288xbf16>
    %c2_42 = arith.constant 2 : index
    %c0_43 = arith.constant 0 : index
    %c0_44 = arith.constant 0 : index
    %87 = vector.load %arg4[%c2_42, %c0_43, %c0_44] : memref<8x288x32xbf16, #tpu.memory_space<vmem>>, vector<1x288x32xbf16>
    %88 = vector.shape_cast %87 : vector<1x288x32xbf16> to vector<288x32xbf16>
    %cst_45 = arith.constant dense<0.000000e+00> : vector<8x32xf32>
    %89 = tpu.matmul %86, %88, %cst_45 {dimension_numbers = #tpu.dot_dimension_numbers<[1], [0], [0], [1], [0, 0, 1, 1], [], []>} : vector<8x288xbf16>, vector<288x32xbf16>, vector<8x32xf32> -> vector<8x32xf32>
    %90 = arith.addf %84, %89 : vector<8x32xf32>
    %91 = vector.extract_strided_slice %69 {offsets = [0, 3, 0], sizes = [8, 1, 288], strides = [1, 1, 1]} : vector<8x8x288xbf16> to vector<8x1x288xbf16>
    %92 = vector.shape_cast %91 : vector<8x1x288xbf16> to vector<8x288xbf16>
    %c3_46 = arith.constant 3 : index
    %c0_47 = arith.constant 0 : index
    %c0_48 = arith.constant 0 : index
    %93 = vector.load %arg4[%c3_46, %c0_47, %c0_48] : memref<8x288x32xbf16, #tpu.memory_space<vmem>>, vector<1x288x32xbf16>
    %94 = vector.shape_cast %93 : vector<1x288x32xbf16> to vector<288x32xbf16>
    %cst_49 = arith.constant dense<0.000000e+00> : vector<8x32xf32>
    %95 = tpu.matmul %92, %94, %cst_49 {dimension_numbers = #tpu.dot_dimension_numbers<[1], [0], [0], [1], [0, 0, 1, 1], [], []>} : vector<8x288xbf16>, vector<288x32xbf16>, vector<8x32xf32> -> vector<8x32xf32>
    %96 = arith.addf %90, %95 : vector<8x32xf32>
    %97 = vector.extract_strided_slice %69 {offsets = [0, 4, 0], sizes = [8, 1, 288], strides = [1, 1, 1]} : vector<8x8x288xbf16> to vector<8x1x288xbf16>
    %98 = vector.shape_cast %97 : vector<8x1x288xbf16> to vector<8x288xbf16>
    %c4_50 = arith.constant 4 : index
    %c0_51 = arith.constant 0 : index
    %c0_52 = arith.constant 0 : index
    %99 = vector.load %arg4[%c4_50, %c0_51, %c0_52] : memref<8x288x32xbf16, #tpu.memory_space<vmem>>, vector<1x288x32xbf16>
    %100 = vector.shape_cast %99 : vector<1x288x32xbf16> to vector<288x32xbf16>
    %cst_53 = arith.constant dense<0.000000e+00> : vector<8x32xf32>
    %101 = tpu.matmul %98, %100, %cst_53 {dimension_numbers = #tpu.dot_dimension_numbers<[1], [0], [0], [1], [0, 0, 1, 1], [], []>} : vector<8x288xbf16>, vector<288x32xbf16>, vector<8x32xf32> -> vector<8x32xf32>
    %102 = arith.addf %96, %101 : vector<8x32xf32>
    %103 = vector.extract_strided_slice %69 {offsets = [0, 5, 0], sizes = [8, 1, 288], strides = [1, 1, 1]} : vector<8x8x288xbf16> to vector<8x1x288xbf16>
    %104 = vector.shape_cast %103 : vector<8x1x288xbf16> to vector<8x288xbf16>
    %c5_54 = arith.constant 5 : index
    %c0_55 = arith.constant 0 : index
    %c0_56 = arith.constant 0 : index
    %105 = vector.load %arg4[%c5_54, %c0_55, %c0_56] : memref<8x288x32xbf16, #tpu.memory_space<vmem>>, vector<1x288x32xbf16>
    %106 = vector.shape_cast %105 : vector<1x288x32xbf16> to vector<288x32xbf16>
    %cst_57 = arith.constant dense<0.000000e+00> : vector<8x32xf32>
    %107 = tpu.matmul %104, %106, %cst_57 {dimension_numbers = #tpu.dot_dimension_numbers<[1], [0], [0], [1], [0, 0, 1, 1], [], []>} : vector<8x288xbf16>, vector<288x32xbf16>, vector<8x32xf32> -> vector<8x32xf32>
    %108 = arith.addf %102, %107 : vector<8x32xf32>
    %109 = vector.extract_strided_slice %69 {offsets = [0, 6, 0], sizes = [8, 1, 288], strides = [1, 1, 1]} : vector<8x8x288xbf16> to vector<8x1x288xbf16>
    %110 = vector.shape_cast %109 : vector<8x1x288xbf16> to vector<8x288xbf16>
    %c6_58 = arith.constant 6 : index
    %c0_59 = arith.constant 0 : index
    %c0_60 = arith.constant 0 : index
    %111 = vector.load %arg4[%c6_58, %c0_59, %c0_60] : memref<8x288x32xbf16, #tpu.memory_space<vmem>>, vector<1x288x32xbf16>
    %112 = vector.shape_cast %111 : vector<1x288x32xbf16> to vector<288x32xbf16>
    %cst_61 = arith.constant dense<0.000000e+00> : vector<8x32xf32>
    %113 = tpu.matmul %110, %112, %cst_61 {dimension_numbers = #tpu.dot_dimension_numbers<[1], [0], [0], [1], [0, 0, 1, 1], [], []>} : vector<8x288xbf16>, vector<288x32xbf16>, vector<8x32xf32> -> vector<8x32xf32>
    %114 = arith.addf %108, %113 : vector<8x32xf32>
    %115 = vector.extract_strided_slice %69 {offsets = [0, 7, 0], sizes = [8, 1, 288], strides = [1, 1, 1]} : vector<8x8x288xbf16> to vector<8x1x288xbf16>
    %116 = vector.shape_cast %115 : vector<8x1x288xbf16> to vector<8x288xbf16>
    %c7_62 = arith.constant 7 : index
    %c0_63 = arith.constant 0 : index
    %c0_64 = arith.constant 0 : index
    %117 = vector.load %arg4[%c7_62, %c0_63, %c0_64] : memref<8x288x32xbf16, #tpu.memory_space<vmem>>, vector<1x288x32xbf16>
    %118 = vector.shape_cast %117 : vector<1x288x32xbf16> to vector<288x32xbf16>
    %cst_65 = arith.constant dense<0.000000e+00> : vector<8x32xf32>
    %119 = tpu.matmul %116, %118, %cst_65 {dimension_numbers = #tpu.dot_dimension_numbers<[1], [0], [0], [1], [0, 0, 1, 1], [], []>} : vector<8x288xbf16>, vector<288x32xbf16>, vector<8x32xf32> -> vector<8x32xf32>
    %120 = arith.addf %114, %119 : vector<8x32xf32>
    %cst_66 = arith.constant 0.000000e+00 : f32
    %121 = vector.broadcast %cst_66 : f32 to vector<8x32xf32>
    %122 = arith.maximumf %120, %121 : vector<8x32xf32>
    %123 = arith.truncf %122 : vector<8x32xf32> to vector<8x32xbf16>
    %c0_67 = arith.constant 0 : index
    %c0_68 = arith.constant 0 : index
    %124 = vector.load %arg6[%c0_67, %c0_68] : memref<32x128xbf16, #tpu.memory_space<vmem>>, vector<32x128xbf16>
    %cst_69 = arith.constant dense<0.000000e+00> : vector<8x128xf32>
    %125 = tpu.matmul %123, %124, %cst_69 {dimension_numbers = #tpu.dot_dimension_numbers<[1], [0], [0], [1], [0, 0, 1, 1], [], []>} : vector<8x32xbf16>, vector<32x128xbf16>, vector<8x128xf32> -> vector<8x128xf32>
    %c0_70 = arith.constant 0 : index
    %c0_71 = arith.constant 0 : index
    %126 = vector.load %arg7[%c0_70, %c0_71] : memref<1x128xf32, #tpu.memory_space<vmem>>, vector<1x128xf32>
    %127 = vector.broadcast %126 : vector<1x128xf32> to vector<8x128xf32>
    %128 = arith.addf %125, %127 : vector<8x128xf32>
    %c0_72 = arith.constant 0 : index
    %c0_73 = arith.constant 0 : index
    %129 = vector.load %arg8[%c0_72, %c0_73] : memref<8x128xf32, #tpu.memory_space<vmem>>, vector<8x128xf32>
    tpu.vector_store %arg8[%c0_72, %c0_73], %128 {strides = array<i32>} : memref<8x128xf32, #tpu.memory_space<vmem>>, vector<8x128xf32>,
    return
  }
  func.func @transform_0(%arg0: i32) -> (i32, i32, i32) {
    %c0_i32 = arith.constant 0 : i32
    %c0_i32_0 = arith.constant 0 : i32
    %c0_i32_1 = arith.constant 0 : i32
    return %arg0, %c0_i32, %c0_i32_0 : i32, i32, i32
  }
  func.func @transform_1(%arg0: i32) -> (i32, i32, i32) {
    %c0_i32 = arith.constant 0 : i32
    %c0_i32_0 = arith.constant 0 : i32
    %c0_i32_1 = arith.constant 0 : i32
    %c0_i32_2 = arith.constant 0 : i32
    return %c0_i32, %c0_i32_0, %c0_i32_1 : i32, i32, i32
  }
  func.func @transform_2(%arg0: i32) -> (i32, i32) {
    %c0_i32 = arith.constant 0 : i32
    %c0_i32_0 = arith.constant 0 : i32
    %c0_i32_1 = arith.constant 0 : i32
    return %c0_i32, %c0_i32_0 : i32, i32
  }
  func.func @transform_3(%arg0: i32) -> (i32, i32, i32) {
    %c0_i32 = arith.constant 0 : i32
    %c0_i32_0 = arith.constant 0 : i32
    %c0_i32_1 = arith.constant 0 : i32
    %c0_i32_2 = arith.constant 0 : i32
    return %c0_i32, %c0_i32_0, %c0_i32_1 : i32, i32, i32
  }
  func.func @transform_4(%arg0: i32) -> (i32, i32) {
    %c0_i32 = arith.constant 0 : i32
    %c0_i32_0 = arith.constant 0 : i32
    %c0_i32_1 = arith.constant 0 : i32
    return %c0_i32, %c0_i32_0 : i32, i32
  }
  func.func @transform_5(%arg0: i32) -> (i32, i32) {
    %c0_i32 = arith.constant 0 : i32
    %c0_i32_0 = arith.constant 0 : i32
    %c0_i32_1 = arith.constant 0 : i32
    return %c0_i32, %c0_i32_0 : i32, i32
  }
  func.func @transform_6(%arg0: i32) -> (i32, i32) {
    %c0_i32 = arith.constant 0 : i32
    %c0_i32_0 = arith.constant 0 : i32
    %c0_i32_1 = arith.constant 0 : i32
    return %c0_i32, %c0_i32_0 : i32, i32
  }
  func.func @transform_7(%arg0: i32) -> (i32, i32) {
    %c0_i32 = arith.constant 0 : i32
    %c0_i32_0 = arith.constant 0 : i32
    return %arg0, %c0_i32 : i32, i32
  }
}

</mosaic_0001>

<bundles_post_ra>
// kernel: tpu_custom_call.1
= control target key start
LH: loop header
LB: loop body
LE: loop exit
PB: predicated region body
PF: predicated region fallthrough
CT: control target
= control target key end

     0   :  { %s15750_s26 = smov 127   ;;  %v15751_v6 = vmov 0.0   ;;  %s15752_s12 = smov 126   ;;  %s18819_s0 = inlined_call_operand.vmem [shape: f32[8,4,384], index: 0, kind: input, shape index: {}]   ;;  %s18820_s1 = inlined_call_operand.vmem [shape: f32[9,8,4], index: 1, kind: input, shape index: {}]   ;;  %s18821_s2 = inlined_call_operand.vmem [shape: f32[8,1], index: 2, kind: input, shape index: {}]   ;;  %s18822_s3 = inlined_call_operand.vmem [shape: bf16[8,288,32], index: 3, kind: input, shape index: {}]   ;;  %s18823_s4 = inlined_call_operand.vmem [shape: f32[1,32], index: 4, kind: input, shape index: {}]   ;;  %s18824_s5 = inlined_call_operand.vmem [shape: bf16[32,128], index: 5, kind: input, shape index: {}]   ;;  %s18825_s6 = inlined_call_operand.vmem [shape: f32[1,128], index: 6, kind: input, shape index: {}]   ;;  %s18826_s7 = inlined_call_operand.hbm [shape: f32[8,128], index: 7, kind: output, shape index: {}]  }
   0x1   :  { %v15805_v0 = vld [vmem:[%s18819_s0] sm:$0xff]  ;;  %v15816_v2 = vld [vmem:[%s18819_s0 + $0x14] sm:$0xf]  ;;  %v15823_v3 = vld [vmem:[%s18819_s0 + $0x8] sm:$0xf]  ;;  %134 = vmatprep.mubr.f32.mxu1 %v15751_v6  ;;  %292 = vmatprep.mubr.f32.mxu0 %v15751_v6 }
   0x2   :  { %50 = vrot.lane.b32.xlu1 %v15805_v0, %s15750_s26  ;;  %v15811_v1 = vcombine.high %v15805_v0, %v15805_v0  ;;  %v15830_v4 = vld [vmem:[%s18819_s0 + $0x2c] sm:$0xf]  ;;  %v15835_v5 = vld [vmem:[%s18819_s0 + $0x20] sm:$0xf]  ;;  %v15844_v7 = vld [vmem:[%s18819_s0 + $0x44] sm:$0xf] }
   0x3   :  { %v15851_v8 = vld [vmem:[%s18819_s0 + $0x38] sm:$0xf]  ;;  %v15858_v9 = vld [vmem:[%s18819_s0 + $0x5c] sm:$0xf]  ;;  %v15865_v10 = vld [vmem:[%s18819_s0 + $0x50] sm:$0xf] }
   0x4   :  { %52 = vrot.lane.b32.xlu0 %v15811_v1, %s15750_s26  ;;  %v15870_v11 = vld [vmem:[%s18819_s0 + $0xc] sm:$0xff]  ;;  %v15879_v12 = vld [vmem:[%s18819_s0 + $0x18] sm:$0xff]  ;;  %v15892_v14 = vld [vmem:[%s18819_s0 + $0x24] sm:$0xff] }
   0x5   :  { %v15885_v13 = vcombine.high %v15870_v11, %v15870_v11  ;;  %v15898_v15 = vcombine.high %v15879_v12, %v15879_v12  ;;  %v15905_v16 = vld [vmem:[%s18819_s0 + $0x30] sm:$0xff]  ;;  %v15911_v17 = vcombine.high %v15892_v14, %v15892_v14  ;;  %v15918_v18 = vld [vmem:[%s18819_s0 + $0x3c] sm:$0xff]  ;;  %v15931_v20 = vld [vmem:[%s18819_s0 + $0x48] sm:$0xff] }
   0x6   :  { %218 = vrot.lane.b32.xlu1 %v15816_v2, %s15750_s26  ;;  %v15924_v19 = vcombine.high %v15905_v16, %v15905_v16  ;;  %v15937_v21 = vcombine.high %v15918_v18, %v15918_v18  ;;  %v15944_v22 = vld [vmem:[%s18819_s0 + $0x54] sm:$0xff]  ;;  %v15950_v23 = vcombine.high %v15931_v20, %v15931_v20 }
   0x7   :  { %v15958_v24 = vcombine.high %v15944_v22, %v15944_v22 }
   0x8   :  { %54 = vrot.lane.b32.xlu0 %v15823_v3, %s15750_s26 }
   0xa   :  { %534 = vrot.lane.b32.xlu1 %v15830_v4, %s15750_s26 }
   0xc   :  { %376 = vrot.lane.b32.xlu0 %v15835_v5, %s15750_s26 }
   0xe   :  { %850 = vrot.lane.b32.xlu1 %v15844_v7, %s15750_s26 }
  0x10   :  { %692 = vrot.lane.b32.xlu0 %v15851_v8, %s15750_s26 }
  0x12   :  { %1166 = vrot.lane.b32.xlu1 %v15858_v9, %s15750_s26 }
  0x14   :  { %1008 = vrot.lane.b32.xlu0 %v15865_v10, %s15750_s26 }
  0x16   :  { %214 = vrot.lane.b32.xlu1 %v15870_v11, %s15750_s26 }
  0x18   :  { %216 = vrot.lane.b32.xlu0 %v15885_v13, %s15750_s26 }
  0x1a   :  { %372 = vrot.lane.b32.xlu1 %v15879_v12, %s15750_s26 }
  0x1c   :  { %374 = vrot.lane.b32.xlu0 %v15898_v15, %s15750_s26 }
  0x1e   :  { %530 = vrot.lane.b32.xlu1 %v15892_v14, %s15750_s26 }
  0x20   :  { %532 = vrot.lane.b32.xlu0 %v15911_v17, %s15750_s26 }
  0x22   :  { %688 = vrot.lane.b32.xlu1 %v15905_v16, %s15750_s26 }
  0x24   :  { %690 = vrot.lane.b32.xlu0 %v15924_v19, %s15750_s26 }
  0x26   :  { %846 = vrot.lane.b32.xlu1 %v15918_v18, %s15750_s26 }
  0x28   :  { %848 = vrot.lane.b32.xlu0 %v15937_v21, %s15750_s26 }
  0x2a   :  { %1004 = vrot.lane.b32.xlu1 %v15931_v20, %s15750_s26 }
  0x2c   :  { %1006 = vrot.lane.b32.xlu0 %v15950_v23, %s15750_s26 }
  0x2e   :  { %1162 = vrot.lane.b32.xlu1 %v15944_v22, %s15750_s26 }
  0x30   :  { %1164 = vrot.lane.b32.xlu0 %v15958_v24, %s15750_s26  ;;  %s15753_s26 = smov 110  }
  0x32   :  { %2661 = vrot.lane.b32.xlu1 %v15816_v2, %s15752_s12 }
  0x34   :  { %2502 = vrot.lane.b32.xlu0 %v15823_v3, %s15752_s12 }
  0x36   :  { %2971 = vrot.lane.b32.xlu1 %v15830_v4, %s15752_s12 }
  0x38   :  { %2816 = vrot.lane.b32.xlu0 %v15835_v5, %s15752_s12 }
  0x3a   :  { %3281 = vrot.lane.b32.xlu1 %v15844_v7, %s15752_s12 }
  0x3c   :  { %3126 = vrot.lane.b32.xlu0 %v15851_v8, %s15752_s12 }
  0x3e   :  { %3591 = vrot.lane.b32.xlu1 %v15858_v9, %s15752_s12 }
  0x40   :  { %3436 = vrot.lane.b32.xlu0 %v15865_v10, %s15752_s12 }
  0x42   :  { %2498 = vrot.lane.b32.xlu1 %v15805_v0, %s15752_s12 }
  0x44   :  { %2500 = vrot.lane.b32.xlu0 %v15811_v1, %s15752_s12 }
  0x46   :  { %2659 = vrot.lane.b32.xlu1 %v15885_v13, %s15752_s12 }
  0x48   :  { %3772 = vrot.lane.b32.xlu0 %v15823_v3, %s15753_s26 }
  0x4a   :  { %3931 = vrot.lane.b32.xlu1 %v15816_v2, %s15753_s26 }
  0x4c   :  { %2657 = vrot.lane.b32.xlu0 %v15870_v11, %s15752_s12 }
  0x4e   :  { %2812 = vrot.lane.b32.xlu1 %v15879_v12, %s15752_s12 }
  0x50   :  { %2814 = vrot.lane.b32.xlu0 %v15898_v15, %s15752_s12 }
  0x52   :  { %2969 = vrot.lane.b32.xlu1 %v15911_v17, %s15752_s12 }
  0x54   :  { %4086 = vrot.lane.b32.xlu0 %v15835_v5, %s15753_s26 }
  0x56   :  { %4241 = vrot.lane.b32.xlu1 %v15830_v4, %s15753_s26 }
  0x58   :  { %2967 = vrot.lane.b32.xlu0 %v15892_v14, %s15752_s12 }
  0x5a   :  { %3122 = vrot.lane.b32.xlu1 %v15905_v16, %s15752_s12 }
  0x5c   :  { %3124 = vrot.lane.b32.xlu0 %v15924_v19, %s15752_s12 }
  0x5e   :  { %3279 = vrot.lane.b32.xlu1 %v15937_v21, %s15752_s12 }
  0x60   :  { %4396 = vrot.lane.b32.xlu0 %v15851_v8, %s15753_s26 }
  0x62   :  { %4551 = vrot.lane.b32.xlu1 %v15844_v7, %s15753_s26 }
  0x64   :  { %3277 = vrot.lane.b32.xlu0 %v15918_v18, %s15752_s12 }
  0x66   :  { %3432 = vrot.lane.b32.xlu1 %v15931_v20, %s15752_s12 }
  0x68   :  { %3434 = vrot.lane.b32.xlu0 %v15950_v23, %s15752_s12 }
  0x69   :  { %12 = vsyncpa [#allocation3], 0  ;;  %s15754_s13 = smov 109   ;;  %vm56_vm0 = vcmask 1039360   ;;  %vm63_vm1 = vcmask 1043456   ;;  %v16042_v30 = vld [vmem:[%s18820_s1 + $0x8] sm:$0xff] }
  0x6a   :  { %3589 = vrot.lane.b32.xlu1 %v15958_v24, %s15752_s12  ;;  %vm59_vm2 = vcmask 31744   ;;  %vm15755_vm3 = vmmov 0   ;;  %s15756_s22 = smov 108   ;;  %vm2504_vm4 = vcmask 1031168   ;;  %vm3774_vm5 = vcmask 900096   ;;  %s15759_s16 = smov 90  }
  0x6b   :  { %vm5044_vm6 = vcmask 891904   ;;  %vm6314_vm7 = vcmask 883712   ;;  %vm7584_vm8 = vcmask 752640   ;;  %vm8854_vm9 = vcmask 744448  }
  0x6c   :  { %4706 = vrot.lane.b32.xlu0 %v15865_v10, %s15753_s26  ;;  %vm10124_vm10 = vcmask 736256   ;;  %vm11556_vm11 = vcmask 1041409   ;;  %vm11559_vm12 = vcmask 1042434   ;;  %vm11562_vm13 = vcmask 1043459  }
  0x6d   :  { %vm11565_vm14 = vcmask 1044484   ;;  %vm11568_vm15 = vcmask 1045509  }
  0x6e   :  { %4861 = vrot.lane.b32.xlu1 %v15858_v9, %s15753_s26 }
  0x70   :  { %3587 = vrot.lane.b32.xlu0 %v15944_v22, %s15752_s12 }
  0x72   :  { %3768 = vrot.lane.b32.xlu1 %v15805_v0, %s15753_s26 }
  0x74   :  { %v51_v25 = vpop.permute.xlu1 %50  ;;  %3770 = vrot.lane.b32.xlu0 %v15811_v1, %s15753_s26 }
  0x76   :  { %3929 = vrot.lane.b32.xlu1 %v15885_v13, %s15753_s26  ;;  %v53_v26 = vpop.permute.xlu0 %52 }
  0x77   :  { %v57_v32 = vsel %vm56_vm0, %v51_v25, %v53_v26  ;;  %v16238_v25 = vld [vmem:[%s18819_s0 + $0x8] sm:$0xf] }
  0x78   :  { %v219_v27 = vpop.permute.xlu1 %218  ;;  %5042 = vrot.lane.b32.xlu0 %v15823_v3, %s15754_s13 }
  0x7a   :  { %5201 = vrot.lane.b32.xlu1 %v15816_v2, %s15754_s13  ;;  %v55_v28 = vpop.permute.xlu0 %54  ;;  %v16188_v2 = vld [vmem:[%s18820_s1] sm:$0xff] }
  0x7b   :  { %v58_v29 = vsel %vm56_vm0, %v53_v26, %v55_v28  ;;  %v16248_v26 = vld [vmem:[%s18819_s0] sm:$0xff] }
  0x7c   :  { %v535_v31 = vpop.permute.xlu1 %534  ;;  %3927 = vrot.lane.b32.xlu0 %v15870_v11, %s15753_s26  ;;  %13818 = vmatprep.subr.msk.mxu1 %vm63_vm1, %v58_v29 }
  0x7d   :  { %13819 = vmatpush1.msk.msra.mxu1 %vm63_vm1, %v57_v32 }
  0x7e   :  { %4082 = vrot.lane.b32.xlu1 %v15879_v12, %s15753_s26  ;;  %13820 = vmatmul.mubr.msk.f32.vlgmr.msra.gmra.mrb[0].mxu1 %vm59_vm2, %v16042_v30  ;;  %v377_v33 = vpop.permute.xlu0 %376 }
  0x7f   :  { %14941 = vmatprep.subr.mxu1 %v15751_v6  ;;  %14943 = vmatprep.mubr.msk.f32.mxu1 %vm15755_vm3, %v15751_v6 }
  0x80   :  { %14942 = vmatpush3.msk.msra.mxu1 %vm63_vm1, %v55_v28  ;;  %v16057_v34 = vpop.permute.xlu1 %850  ;;  %4084 = vrot.lane.b32.xlu0 %v15898_v15, %s15753_s26  ;;  %v16258_v28 = vld [vmem:[%s18819_s0 + $0x20] sm:$0xf] }
  0x81   :  { %14946 = vmatprep.subr.mxu1 %v15751_v6 }
  0x82   :  { %4239 = vrot.lane.b32.xlu1 %v15911_v17, %s15753_s26  ;;  %14944 = vmatmul.mubr.msk.f32.vlgmr.msra.gmra.mrb[2].mxu1 %vm59_vm2, %v16042_v30  ;;  %v693_v35 = vpop.permute.xlu0 %692 }
  0x83   :  { %14947 = vmatpush3.msk.msra.mxu1 %vm63_vm1, %v219_v27  ;;  %14948 = vmatprep.mubr.msk.f32.mxu1 %vm15755_vm3, %v15751_v6 }
  0x84   :  { %v16069_v36 = vpop.permute.xlu1 %1166  ;;  %5356 = vrot.lane.b32.xlu0 %v15835_v5, %s15754_s13  ;;  %14951 = vmatprep.subr.mxu1 %v15751_v6 }
  0x86   :  { %5511 = vrot.lane.b32.xlu1 %v15830_v4, %s15754_s13  ;;  %14949 = vmatmul.mubr.msk.f32.vlgmr.msra.gmra.mrb[4].mxu1 %vm59_vm2, %v16042_v30  ;;  %v16078_v37 = vpop.permute.xlu0 %1008 }
  0x87   :  { %14952 = vmatpush3.msk.msra.mxu1 %vm63_vm1, %v377_v33  ;;  %14953 = vmatprep.mubr.msk.f32.mxu1 %vm15755_vm3, %v15751_v6 }
  0x88   :  { %v215_v38 = vpop.permute.xlu1 %214  ;;  %4237 = vrot.lane.b32.xlu0 %v15892_v14, %s15753_s26  ;;  %14956 = vmatprep.subr.mxu1 %v15751_v6 }
  0x8a   :  { %4392 = vrot.lane.b32.xlu1 %v15905_v16, %s15753_s26  ;;  %14954 = vmatmul.mubr.msk.f32.vlgmr.msra.gmra.mrb[6].mxu1 %vm59_vm2, %v16042_v30  ;;  %v217_v39 = vpop.permute.xlu0 %216 }
  0x8b   :  { %14957 = vmatpush3.msk.msra.mxu1 %vm63_vm1, %v535_v31  ;;  %v221_v40 = vsel %vm56_vm0, %v217_v39, %v219_v27  ;;  %v220_v41 = vsel %vm56_vm0, %v215_v38, %v217_v39  ;;  %14958 = vmatprep.mubr.msk.f32.mxu1 %vm15755_vm3, %v15751_v6 }
  0x8c   :  { %v373_v42 = vpop.permute.xlu1 %372  ;;  %4394 = vrot.lane.b32.xlu0 %v15924_v19, %s15753_s26  ;;  %13823 = vmatprep.subr.msk.mxu0 %vm63_vm1, %v221_v40  ;;  %v16370_v40 = vld [vmem:[%s18819_s0 + $0x50] sm:$0xf] }
  0x8d   :  { %13824 = vmatpush1.msk.msra.mxu0 %vm63_vm1, %v220_v41  ;;  %14961 = vmatprep.subr.mxu1 %v15751_v6 }
  0x8e   :  { %4549 = vrot.lane.b32.xlu1 %v15937_v21, %s15753_s26  ;;  %13825 = vmatmul.mubr.msk.f32.vlgmr.msra.gmra.mrb[0].mxu0 %vm59_vm2, %v16042_v30  ;;  %v375_v43 = vpop.permute.xlu0 %374 }
  0x8f   :  { %14959 = vmatmul.mubr.msk.f32.vlgmr.msra.gmra.mrb[8].mxu1 %vm59_vm2, %v16042_v30  ;;  %v378_v44 = vsel %vm56_vm0, %v373_v42, %v375_v43  ;;  %v379_v45 = vsel %vm56_vm0, %v375_v43, %v377_v33  ;;  %450 = vmatprep.mubr.f32.mxu0 %v15751_v6 }
  0x90   :  { %14962 = vmatpush3.msk.msra.mxu1 %vm63_vm1, %v693_v35  ;;  %v531_v46 = vpop.permute.xlu1 %530  ;;  %5666 = vrot.lane.b32.xlu0 %v15851_v8, %s15754_s13 }
  0x91   :  { %13828 = vmatprep.subr.msk.mxu0 %vm63_vm1, %v379_v45  ;;  %14963 = vmatprep.mubr.msk.f32.mxu1 %vm15755_vm3, %v15751_v6 }
  0x92   :  { %13829 = vmatpush1.msk.msra.mxu0 %vm63_vm1, %v378_v44  ;;  %14966 = vmatprep.subr.mxu1 %v15751_v6  ;;  %v533_v47 = vpop.permute.xlu0 %532  ;;  %v16428_v44 = vld [vmem:[%s18820_s1 + $0x10] sm:$0xff] }
  0x93   :  { %5821 = vrot.lane.b32.xlu1 %v15844_v7, %s15754_s13  ;;  %13830 = vmatmul.mubr.msk.f32.vlgmr.msra.gmra.mrb[2].mxu0 %vm59_vm2, %v16042_v30  ;;  %v536_v48 = vsel %vm56_vm0, %v531_v46, %v533_v47  ;;  %v537_v49 = vsel %vm56_vm0, %v533_v47, %v535_v31  ;;  %v16285_v31 = vld [vmem:[%s18819_s0 + $0x2c] sm:$0xf] }
  0x94   :  { %14964 = vmatmul.mubr.msk.f32.vlgmr.msra.gmra.mrb[10].mxu1 %vm59_vm2, %v16042_v30  ;;  %v689_v50 = vpop.permute.xlu1 %688  ;;  %4547 = vrot.lane.b32.xlu0 %v15918_v18, %s15753_s26 }
  0x95   :  { %14967 = vmatpush3.msk.msra.mxu1 %vm63_vm1, %v16057_v34  ;;  %13833 = vmatprep.subr.msk.mxu0 %vm63_vm1, %v537_v49 }
  0x96   :  { %13834 = vmatpush1.msk.msra.mxu0 %vm63_vm1, %v536_v48  ;;  %608 = vmatprep.mubr.f32.mxu0 %v15751_v6  ;;  %v691_v51 = vpop.permute.xlu0 %690  ;;  %v16456_v48 = vld [vmem:[%s18819_s0 + $0x3c] sm:$0xff] }
  0x97   :  { %14968 = vmatprep.mubr.msk.f32.mxu1 %vm15755_vm3, %v15751_v6  ;;  %14971 = vmatprep.subr.mxu1 %v15751_v6  ;;  %v695_v52 = vsel %vm56_vm0, %v691_v51, %v693_v35  ;;  %v694_v53 = vsel %vm56_vm0, %v689_v50, %v691_v51 }
  0x98   :  { %4702 = vrot.lane.b32.xlu1 %v15931_v20, %s15753_s26  ;;  %13835 = vmatmul.mubr.msk.f32.vlgmr.msra.gmra.mrb[4].mxu0 %vm59_vm2, %v16042_v30  ;;  %v847_v54 = vpop.permute.xlu1 %846 }
  0x99   :  { %14969 = vmatmul.mubr.msk.f32.vlgmr.msra.gmra.mrb[12].mxu1 %vm59_vm2, %v16042_v30  ;;  %4704 = vrot.lane.b32.xlu0 %v15950_v23, %s15753_s26 }
  0x9a   :  { %14972 = vmatpush3.msk.msra.mxu1 %vm63_vm1, %v16078_v37  ;;  %13838 = vmatprep.subr.msk.mxu0 %vm63_vm1, %v695_v52  ;;  %v849_v55 = vpop.permute.xlu0 %848 }
  0x9b   :  { %13839 = vmatpush1.msk.msra.mxu0 %vm63_vm1, %v694_v53  ;;  %766 = vmatprep.mubr.f32.mxu0 %v15751_v6  ;;  %v853_v57 = vsel %vm56_vm0, %v849_v55, %v16057_v34  ;;  %v852_v58 = vsel %vm56_vm0, %v847_v54, %v849_v55  ;;  %v16314_v34 = vld [vmem:[%s18819_s0 + $0x38] sm:$0xf] }
  0x9c   :  { %14973 = vmatprep.mubr.msk.f32.mxu1 %vm15755_vm3, %v15751_v6  ;;  %14976 = vmatprep.subr.mxu1 %v15751_v6  ;;  %v1005_v56 = vpop.permute.xlu1 %1004 }
  0x9d   :  { %4859 = vrot.lane.b32.xlu1 %v15958_v24, %s15753_s26  ;;  %13840 = vmatmul.mubr.msk.f32.vlgmr.msra.gmra.mrb[6].mxu0 %vm59_vm2, %v16042_v30 }
  0x9e   :  { %14974 = vmatmul.mubr.msk.f32.vlgmr.msra.gmra.mrb[14].mxu1 %vm59_vm2, %v16042_v30  ;;  %5976 = vrot.lane.b32.xlu0 %v15865_v10, %s15754_s13  ;;  %v1007_v59 = vpop.permute.xlu0 %1006 }
  0x9f   :  { %14977 = vmatpush3.msk.msra.mxu1 %vm63_vm1, %v16069_v36  ;;  %13843 = vmatprep.subr.msk.mxu0 %vm63_vm1, %v853_v57  ;;  %v1011_v61 = vsel %vm56_vm0, %v1007_v59, %v16078_v37  ;;  %v1010_v62 = vsel %vm56_vm0, %v1005_v56, %v1007_v59 }
  0xa0   :  { %13844 = vmatpush1.msk.msra.mxu0 %vm63_vm1, %v852_v58  ;;  %924 = vmatprep.mubr.f32.mxu0 %v15751_v6  ;;  %v1163_v60 = vpop.permute.xlu1 %1162 }
  0xa1   :  { %14978 = vmatprep.mubr.msk.f32.mxu1 %vm15755_vm3, %v15751_v6  ;;  %6131 = vrot.lane.b32.xlu1 %v15858_v9, %s15754_s13 }
  0xa2   :  { %13845 = vmatmul.mubr.msk.f32.vlgmr.msra.gmra.mrb[8].mxu0 %vm59_vm2, %v16042_v30  ;;  %14979 = vmatmul.mubr.msk.f32.vlgmr.msra.gmra.mrb[16].mxu1 %vm59_vm2, %v16042_v30  ;;  %v1165_v63 = vpop.permute.xlu0 %1164 }
  0xa3   :  { %4857 = vrot.lane.b32.xlu0 %v15944_v22, %s15753_s26  ;;  %13848 = vmatprep.subr.msk.mxu0 %vm63_vm1, %v1011_v61  ;;  %v1169_v5 = vsel %vm56_vm0, %v1165_v63, %v16069_v36  ;;  %v1168_v7 = vsel %vm56_vm0, %v1163_v60, %v1165_v63  ;;  %v16341_v36 = vld [vmem:[%s18819_s0 + $0x44] sm:$0xf]  ;;  %v16543_v61 = vld [vmem:[%s18819_s0 + $0x54] sm:$0xff]  ;;  %vm11571_vm0 = vcmask 1046534  }
  0xa4   :  { %14981 = vmatprep.subr.mxu1 %v15751_v6  ;;  %13849 = vmatpush1.msk.msra.mxu0 %vm63_vm1, %v1010_v62  ;;  %v16190_v4 = vpop.permute.xlu1 %2661 }
  0xa5   :  { %1082 = vmatprep.mubr.f32.mxu0 %v15751_v6  ;;  %14982 = vmatpush3.msk.msra.mxu1 %vm63_vm1, %v15823_v3 }
  0xa6   :  { %14983 = vmatprep.mubr.msk.f32.mxu1 %vm15755_vm3, %v15751_v6  ;;  %5038 = vrot.lane.b32.xlu1 %v15805_v0, %s15754_s13  ;;  %v16202_v8 = vpop.permute.xlu0 %2502  ;;  %v16219_v0 = vld [vmem:[%s18819_s0 + $0x14] sm:$0xf] }
  0xa7   :  { %13850 = vmatmul.mubr.msk.f32.vlgmr.msra.gmra.mrb[10].mxu0 %vm59_vm2, %v16042_v30  ;;  %14984 = vmatmul.mubr.msk.f32.vlgmr.msra.gmra.mrb[18].mxu1 %vm59_vm2, %v16188_v2 }
  0xa8   :  { %5040 = vrot.lane.b32.xlu0 %v15811_v1, %s15754_s13  ;;  %13853 = vmatprep.subr.msk.mxu0 %vm63_vm1, %v1169_v5  ;;  %v16211_v3 = vpop.permute.xlu1 %2971 }
  0xa9   :  { %14986 = vmatprep.subr.mxu1 %v15751_v6  ;;  %13854 = vmatpush1.msk.msra.mxu0 %vm63_vm1, %v1168_v7 }
  0xaa   :  { %1240 = vmatprep.mubr.f32.mxu0 %v15751_v6  ;;  %14987 = vmatpush3.msk.msra.mxu1 %vm63_vm1, %v16219_v0  ;;  %v16223_v9 = vpop.permute.xlu0 %2816 }
  0xab   :  { %14988 = vmatprep.mubr.msk.f32.mxu1 %vm15755_vm3, %v15751_v6  ;;  %5199 = vrot.lane.b32.xlu1 %v15885_v13, %s15754_s13 }
  0xac   :  { %13855 = vmatmul.mubr.msk.f32.vlgmr.msra.gmra.mrb[12].mxu0 %vm59_vm2, %v16042_v30  ;;  %14989 = vmatmul.mubr.msk.f32.vlgmr.msra.gmra.mrb[20].mxu1 %vm59_vm2, %v16188_v2  ;;  %v16233_v10 = vpop.permute.xlu1 %3281 }
  0xad   :  { %6312 = vrot.lane.b32.xlu0 %v16238_v25, %s15756_s22  ;;  %13858 = vmatprep.subr.msk.mxu0 %vm63_vm1, %v15811_v1 }
  0xae   :  { %14991 = vmatprep.subr.mxu1 %v15751_v6  ;;  %13859 = vmatpush1.msk.msra.mxu0 %vm63_vm1, %v16248_v26  ;;  %v16252_v27 = vpop.permute.xlu0 %3126 }
  0xaf   :  { %1390 = vmatprep.mubr.f32.mxu0 %v15751_v6  ;;  %14992 = vmatpush3.msk.msra.mxu1 %vm63_vm1, %v16258_v28 }
  0xb0   :  { %14993 = vmatprep.mubr.msk.f32.mxu1 %vm15755_vm3, %v15751_v6  ;;  %6471 = vrot.lane.b32.xlu1 %v16219_v0, %s15756_s22  ;;  %v16266_v29 = vpop.permute.xlu1 %3591 }
  0xb1   :  { %13860 = vmatmul.mubr.msk.f32.vlgmr.msra.gmra.mrb[14].mxu0 %vm59_vm2, %v16188_v2  ;;  %14994 = vmatmul.mubr.msk.f32.vlgmr.msra.gmra.mrb[22].mxu1 %vm59_vm2, %v16188_v2 }
  0xb2   :  { %5197 = vrot.lane.b32.xlu0 %v15870_v11, %s15754_s13  ;;  %13863 = vmatprep.subr.msk.mxu0 %vm63_vm1, %v15885_v13  ;;  %v16276_v30 = vpop.permute.xlu0 %3436 }
  0xb3   :  { %14996 = vmatprep.subr.mxu1 %v15751_v6  ;;  %13864 = vmatpush1.msk.msra.mxu0 %vm63_vm1, %v15870_v11 }
  0xb4   :  { %1537 = vmatprep.mubr.f32.mxu0 %v15751_v6  ;;  %14997 = vmatpush3.msk.msra.mxu1 %vm63_vm1, %v16285_v31  ;;  %v16289_v32 = vpop.permute.xlu1 %2498 }
  0xb5   :  { %14998 = vmatprep.mubr.msk.f32.mxu1 %vm15755_vm3, %v15751_v6  ;;  %5352 = vrot.lane.b32.xlu1 %v15879_v12, %s15754_s13 }
  0xb6   :  { %13865 = vmatmul.mubr.msk.f32.vlgmr.msra.gmra.mrb[0].mxu0 %vm59_vm2, %v16188_v2  ;;  %14999 = vmatmul.mubr.msk.f32.vlgmr.msra.gmra.mrb[24].mxu1 %vm59_vm2, %v16188_v2  ;;  %v16299_v11 = vpop.permute.xlu0 %2500 }
  0xb7   :  { %5354 = vrot.lane.b32.xlu0 %v15898_v15, %s15754_s13  ;;  %13868 = vmatprep.subr.msk.mxu0 %vm63_vm1, %v15898_v15  ;;  %v2506_v47 = vsel %vm2504_vm4, %v16299_v11, %v16202_v8  ;;  %v2505_v50 = vsel %vm2504_vm4, %v16289_v32, %v16299_v11 }
  0xb8   :  { %15001 = vmatprep.subr.mxu1 %v15751_v6  ;;  %13869 = vmatpush1.msk.msra.mxu0 %vm63_vm1, %v15879_v12  ;;  %v16308_v33 = vpop.permute.xlu1 %2659 }
  0xb9   :  { %1684 = vmatprep.mubr.f32.mxu0 %v15751_v6  ;;  %15002 = vmatpush3.msk.msra.mxu1 %vm63_vm1, %v16314_v34 }
  0xba   :  { %15003 = vmatprep.mubr.msk.f32.mxu1 %vm15755_vm3, %v15751_v6  ;;  %5509 = vrot.lane.b32.xlu1 %v15911_v17, %s15754_s13  ;;  %v16322_v35 = vpop.permute.xlu0 %3772 }
  0xbb   :  { %13870 = vmatmul.mubr.msk.f32.vlgmr.msra.gmra.mrb[2].mxu0 %vm59_vm2, %v16188_v2  ;;  %15004 = vmatmul.mubr.msk.f32.vlgmr.msra.gmra.mrb[26].mxu1 %vm59_vm2, %v16188_v2 }
  0xbc   :  { %6626 = vrot.lane.b32.xlu0 %v16258_v28, %s15756_s22  ;;  %13873 = vmatprep.subr.msk.mxu0 %vm63_vm1, %v15911_v17  ;;  %v16332_v12 = vpop.permute.xlu1 %3931 }
  0xbd   :  { %15006 = vmatprep.subr.mxu1 %v15751_v6  ;;  %13874 = vmatpush1.msk.msra.mxu0 %vm63_vm1, %v15892_v14 }
  0xbe   :  { %1831 = vmatprep.mubr.f32.mxu0 %v15751_v6  ;;  %15007 = vmatpush3.msk.msra.mxu1 %vm63_vm1, %v16341_v36  ;;  %v16345_v37 = vpop.permute.xlu0 %2657 }
  0xbf   :  { %15008 = vmatprep.mubr.msk.f32.mxu1 %vm15755_vm3, %v15751_v6  ;;  %6781 = vrot.lane.b32.xlu1 %v16285_v31, %s15756_s22  ;;  %v2663_v53 = vsel %vm2504_vm4, %v16345_v37, %v16308_v33  ;;  %v16641_v37 = vld [vmem:[%s18819_s0 + $0x18] sm:$0xff] }
  0xc0   :  { %13875 = vmatmul.mubr.msk.f32.vlgmr.msra.gmra.mrb[4].mxu0 %vm59_vm2, %v16188_v2  ;;  %15009 = vmatmul.mubr.msk.f32.vlgmr.msra.gmra.mrb[28].mxu1 %vm59_vm2, %v16188_v2  ;;  %v16355_v38 = vpop.permute.xlu1 %2812 }
  0xc1   :  { %5507 = vrot.lane.b32.xlu0 %v15892_v14, %s15754_s13  ;;  %13878 = vmatprep.subr.msk.mxu0 %vm63_vm1, %v15924_v19 }
  0xc2   :  { %15011 = vmatprep.subr.mxu1 %v15751_v6  ;;  %13879 = vmatpush1.msk.msra.mxu0 %vm63_vm1, %v15905_v16  ;;  %v16364_v39 = vpop.permute.xlu0 %2814 }
  0xc3   :  { %1978 = vmatprep.mubr.f32.mxu0 %v15751_v6  ;;  %15012 = vmatpush3.msk.msra.mxu1 %vm63_vm1, %v16370_v40  ;;  %v2819_v55 = vsel %vm2504_vm4, %v16364_v39, %v16223_v9  ;;  %v2818_v58 = vsel %vm2504_vm4, %v16355_v38, %v16364_v39 }
  0xc4   :  { %15013 = vmatprep.mubr.msk.f32.mxu1 %vm15755_vm3, %v15751_v6  ;;  %5662 = vrot.lane.b32.xlu1 %v15905_v16, %s15754_s13  ;;  %v16378_v14 = vpop.permute.xlu1 %2969  ;;  %v16394_v16 = vld [vmem:[%s18819_s0 + $0x5c] sm:$0xf] }
  0xc5   :  { %13880 = vmatmul.mubr.msk.f32.vlgmr.msra.gmra.mrb[6].mxu0 %vm59_vm2, %v16188_v2  ;;  %15014 = vmatmul.mubr.msk.f32.vlgmr.msra.gmra.mrb[30].mxu1 %vm59_vm2, %v16188_v2  ;;  %v2974_v59 = vsel %vm2504_vm4, %v16378_v14, %v16211_v3 }
  0xc6   :  { %15016 = vmatprep.subr.mxu1 %v15751_v6  ;;  %5664 = vrot.lane.b32.xlu0 %v15924_v19, %s15754_s13  ;;  %v16387_v41 = vpop.permute.xlu0 %4086 }
  0xc7   :  { %13883 = vmatprep.subr.msk.mxu0 %vm63_vm1, %v15937_v21  ;;  %15017 = vmatpush3.msk.msra.mxu1 %vm63_vm1, %v16394_v16 }
  0xc8   :  { %13884 = vmatpush1.msk.msra.mxu0 %vm63_vm1, %v15918_v18  ;;  %2125 = vmatprep.mubr.f32.mxu0 %v15751_v6  ;;  %v16401_v42 = vpop.permute.xlu1 %4241 }
  0xc9   :  { %15018 = vmatprep.mubr.msk.f32.mxu1 %vm15755_vm3, %v15751_v6  ;;  %15021 = vmatprep.subr.mxu1 %v15751_v6 }
  0xca   :  { %5819 = vrot.lane.b32.xlu1 %v15937_v21, %s15754_s13  ;;  %13885 = vmatmul.mubr.msk.f32.vlgmr.msra.gmra.mrb[8].mxu0 %vm59_vm2, %v16188_v2  ;;  %v16410_v43 = vpop.permute.xlu0 %2967 }
  0xcb   :  { %15019 = vmatmul.mubr.msk.f32.vlgmr.msra.gmra.mrb[32].mxu1 %vm59_vm2, %v16188_v2  ;;  %13888 = vmatprep.subr.msk.mxu0 %vm63_vm1, %v15950_v23  ;;  %v2973_v63 = vsel %vm2504_vm4, %v16410_v43, %v16378_v14 }
  0xcc   :  { %15022 = vmatpush3.msk.msra.mxu1 %vm63_vm1, %v16202_v8  ;;  %6936 = vrot.lane.b32.xlu0 %v16314_v34, %s15756_s22  ;;  %v16420_v18 = vpop.permute.xlu1 %3122 }
  0xcd   :  { %13889 = vmatpush1.msk.msra.mxu0 %vm63_vm1, %v15931_v20  ;;  %2272 = vmatprep.mubr.f32.mxu0 %v15751_v6 }
  0xce   :  { %13893 = vmatprep.subr.msk.mxu0 %vm63_vm1, %v15958_v24  ;;  %15023 = vmatprep.mubr.msk.f32.mxu1 %vm15755_vm3, %v15751_v6  ;;  %v16434_v45 = vpop.permute.xlu0 %3124 }
  0xcf   :  { %15026 = vmatprep.subr.mxu1 %v15751_v6  ;;  %7091 = vrot.lane.b32.xlu1 %v16341_v36, %s15756_s22  ;;  %v3128_v8 = vsel %vm2504_vm4, %v16420_v18, %v16434_v45 }
  0xd0   :  { %13890 = vmatmul.mubr.msk.f32.vlgmr.msra.gmra.mrb[10].mxu0 %vm59_vm2, %v16188_v2  ;;  %15024 = vmatmul.mubr.msk.f32.vlgmr.msra.gmra.mrb[34].mxu1 %vm59_vm2, %v16428_v44  ;;  %v16443_v46 = vpop.permute.xlu1 %3279 }
  0xd1   :  { %13894 = vmatpush1.msk.msra.mxu0 %vm63_vm1, %v15944_v22  ;;  %15027 = vmatpush3.msk.msra.mxu1 %vm63_vm1, %v16190_v4 }
  0xd2   :  { %13899 = vmatprep.subr.msk.mxu0 %vm63_vm1, %v2506_v47  ;;  %5817 = vrot.lane.b32.xlu0 %v16456_v48, %s15754_s13  ;;  %v16460_v49 = vpop.permute.xlu0 %4396 }
  0xd3   :  { %2419 = vmatprep.mubr.f32.mxu0 %v15751_v6  ;;  %15028 = vmatprep.mubr.msk.f32.mxu1 %vm15755_vm3, %v15751_v6 }
  0xd4   :  { %15031 = vmatprep.subr.mxu1 %v15751_v6  ;;  %5972 = vrot.lane.b32.xlu1 %v15931_v20, %s15754_s13  ;;  %v16468_v22 = vpop.permute.xlu1 %4551  ;;  %v2664_v20 = vsel %vm2504_vm4, %v16308_v33, %v16190_v4  ;;  %v3129_v4 = vsel %vm2504_vm4, %v16434_v45, %v16252_v27 }
  0xd5   :  { %13895 = vmatmul.mubr.msk.f32.vlgmr.msra.gmra.mrb[12].mxu0 %vm59_vm2, %v16188_v2  ;;  %15029 = vmatmul.mubr.msk.f32.vlgmr.msra.gmra.mrb[36].mxu1 %vm59_vm2, %v16428_v44 }
  0xd6   :  { %13900 = vmatpush1.msk.msra.mxu0 %vm63_vm1, %v2505_v50  ;;  %15032 = vmatpush3.msk.msra.mxu1 %vm63_vm1, %v16223_v9  ;;  %v16483_v51 = vpop.permute.xlu0 %3277 }
  0xd7   :  { %13904 = vmatprep.subr.msk.mxu0 %vm63_vm1, %v2664_v20  ;;  %5974 = vrot.lane.b32.xlu0 %v15950_v23, %s15754_s13  ;;  %v3283_v32 = vsel %vm2504_vm4, %v16483_v51, %v16443_v46 }
  0xd8   :  { %2580 = vmatprep.mubr.f32.mxu0 %v15751_v6  ;;  %15033 = vmatprep.mubr.msk.f32.mxu1 %vm15755_vm3, %v15751_v6  ;;  %v16491_v52 = vpop.permute.xlu1 %3432 }
  0xd9   :  { %15036 = vmatprep.subr.mxu1 %v15751_v6  ;;  %6129 = vrot.lane.b32.xlu1 %v15958_v24, %s15754_s13 }
  0xda   :  { %13901 = vmatmul.mubr.msk.f32.vlgmr.msra.gmra.mrb[14].mxu0 %vm59_vm2, %v16428_v44  ;;  %15034 = vmatmul.mubr.msk.f32.vlgmr.msra.gmra.mrb[38].mxu1 %vm59_vm2, %v16428_v44  ;;  %v16503_v54 = vpop.permute.xlu0 %3434 }
  0xdb   :  { %13905 = vmatpush1.msk.msra.mxu0 %vm63_vm1, %v2663_v53  ;;  %15037 = vmatpush3.msk.msra.mxu1 %vm63_vm1, %v16211_v3  ;;  %v3284_v3 = vsel %vm2504_vm4, %v16443_v46, %v16233_v10  ;;  %v3438_v14 = vsel %vm2504_vm4, %v16491_v52, %v16503_v54  ;;  %v16715_v52 = vld [vmem:[%s18819_s0 + $0x24] sm:$0xff] }
  0xdc   :  { %13909 = vmatprep.subr.msk.mxu0 %vm63_vm1, %v2819_v55  ;;  %7246 = vrot.lane.b32.xlu0 %v16370_v40, %s15756_s22  ;;  %v16514_v56 = vpop.permute.xlu1 %3589 }
  0xdd   :  { %2735 = vmatprep.mubr.f32.mxu0 %v15751_v6  ;;  %15038 = vmatprep.mubr.msk.f32.mxu1 %vm15755_vm3, %v15751_v6  ;;  %v3594_v38 = vsel %vm2504_vm4, %v16514_v56, %v16266_v29 }
  0xde   :  { %15041 = vmatprep.subr.mxu1 %v15751_v6  ;;  %7401 = vrot.lane.b32.xlu1 %v16394_v16, %s15756_s22  ;;  %v16522_v57 = vpop.permute.xlu0 %4706 }
  0xdf   :  { %13906 = vmatmul.mubr.msk.f32.vlgmr.msra.gmra.mrb[0].mxu0 %vm59_vm2, %v16428_v44  ;;  %15039 = vmatmul.mubr.msk.f32.vlgmr.msra.gmra.mrb[40].mxu1 %vm59_vm2, %v16428_v44 }
  0xe0   :  { %13910 = vmatpush1.msk.msra.mxu0 %vm63_vm1, %v2818_v58  ;;  %15042 = vmatpush3.msk.msra.mxu1 %vm63_vm1, %v16252_v27  ;;  %v16537_v60 = vpop.permute.xlu1 %4861 }
  0xe1   :  { %13914 = vmatprep.subr.msk.mxu0 %vm63_vm1, %v2974_v59  ;;  %6127 = vrot.lane.b32.xlu0 %v16543_v61, %s15754_s13  ;;  %s15757_s13 = smov 92  }
  0xe2   :  { %2890 = vmatprep.mubr.f32.mxu0 %v15751_v6  ;;  %15043 = vmatprep.mubr.msk.f32.mxu1 %vm15755_vm3, %v15751_v6  ;;  %v16550_v62 = vpop.permute.xlu0 %3587 }
  0xe3   :  { %15046 = vmatprep.subr.mxu1 %v15751_v6  ;;  %6308 = vrot.lane.b32.xlu1 %v16248_v26, %s15756_s22  ;;  %v3593_v45 = vsel %vm2504_vm4, %v16550_v62, %v16514_v56 }
  0xe4   :  { %13911 = vmatmul.mubr.msk.f32.vlgmr.msra.gmra.mrb[2].mxu0 %vm59_vm2, %v16428_v44  ;;  %15044 = vmatmul.mubr.msk.f32.vlgmr.msra.gmra.mrb[42].mxu1 %vm59_vm2, %v16428_v44  ;;  %v16562_v2 = vpop.permute.xlu1 %3768 }
  0xe5   :  { %13915 = vmatpush1.msk.msra.mxu0 %vm63_vm1, %v2973_v63  ;;  %15047 = vmatpush3.msk.msra.mxu1 %vm63_vm1, %v16233_v10  ;;  %v3439_v10 = vsel %vm2504_vm4, %v16503_v54, %v16276_v30  ;;  %v16734_v54 = vld [vmem:[%s18819_s0 + $0x30] sm:$0xff] }
  0xe6   :  { %13919 = vmatprep.subr.msk.mxu0 %vm63_vm1, %v3129_v4  ;;  %6310 = vrot.lane.b32.xlu0 %v15811_v1, %s15756_s22  ;;  %v16573_v5 = vpop.permute.xlu0 %3770  ;;  %v16806_v4 = vld [vmem:[%s18819_s0 + $0x48] sm:$0xff] }
  0xe7   :  { %3045 = vmatprep.mubr.f32.mxu0 %v15751_v6  ;;  %15048 = vmatprep.mubr.msk.f32.mxu1 %vm15755_vm3, %v15751_v6  ;;  %v3776_v50 = vsel %vm3774_vm5, %v16573_v5, %v16322_v35  ;;  %v3775_v20 = vsel %vm3774_vm5, %v16562_v2, %v16573_v5 }
  0xe8   :  { %15051 = vmatprep.subr.mxu1 %v15751_v6  ;;  %6469 = vrot.lane.b32.xlu1 %v15885_v13, %s15756_s22  ;;  %v16581_v7 = vpop.permute.xlu1 %3929 }
  0xe9   :  { %13916 = vmatmul.mubr.msk.f32.vlgmr.msra.gmra.mrb[4].mxu0 %vm59_vm2, %v16428_v44  ;;  %15049 = vmatmul.mubr.msk.f32.vlgmr.msra.gmra.mrb[44].mxu1 %vm59_vm2, %v16428_v44 }
  0xea   :  { %13920 = vmatpush1.msk.msra.mxu0 %vm63_vm1, %v3128_v8  ;;  %15052 = vmatpush3.msk.msra.mxu1 %vm63_vm1, %v16276_v30  ;;  %v16596_v9 = vpop.permute.xlu0 %5042  ;;  %v16627_v30 = vld [vmem:[%s18819_s0 + $0xc] sm:$0xff] }
  0xeb   :  { %13924 = vmatprep.subr.msk.mxu0 %vm63_vm1, %v3284_v3  ;;  %7582 = vrot.lane.b32.xlu0 %v16238_v25, %s15757_s13 }
  0xec   :  { %3200 = vmatprep.mubr.f32.mxu0 %v15751_v6  ;;  %15053 = vmatprep.mubr.msk.f32.mxu1 %vm15755_vm3, %v15751_v6  ;;  %v16604_v27 = vpop.permute.xlu1 %5201 }
  0xed   :  { %15056 = vmatprep.subr.mxu1 %v15751_v6  ;;  %7741 = vrot.lane.b32.xlu1 %v16219_v0, %s15757_s13 }
  0xee   :  { %13921 = vmatmul.mubr.msk.f32.vlgmr.msra.gmra.mrb[6].mxu0 %vm59_vm2, %v16428_v44  ;;  %15054 = vmatmul.mubr.msk.f32.vlgmr.msra.gmra.mrb[46].mxu1 %vm59_vm2, %v16428_v44  ;;  %v16619_v11 = vpop.permute.xlu0 %3927 }
  0xef   :  { %13925 = vmatpush1.msk.msra.mxu0 %vm63_vm1, %v3283_v32  ;;  %15057 = vmatpush3.msk.msra.mxu1 %vm63_vm1, %v16266_v29  ;;  %v16663_v29 = vld [vmem:[%s18820_s1 + $0x18] sm:$0xff]  ;;  %v3933_v55 = vsel %vm3774_vm5, %v16619_v11, %v16581_v7  ;;  %v16868_v11 = vld [vmem:[%s18820_s1 + $0x20] sm:$0xff] }
  0xf0   :  { %6467 = vrot.lane.b32.xlu0 %v16627_v30, %s15756_s22  ;;  %13929 = vmatprep.subr.msk.mxu0 %vm63_vm1, %v3439_v10  ;;  %v16632_v33 = vpop.permute.xlu1 %4082 }
  0xf1   :  { %3355 = vmatprep.mubr.f32.mxu0 %v15751_v6  ;;  %15058 = vmatprep.mubr.msk.f32.mxu1 %vm15755_vm3, %v15751_v6 }
  0xf2   :  { %15061 = vmatprep.subr.mxu1 %v15751_v6  ;;  %6622 = vrot.lane.b32.xlu1 %v16641_v37, %s15756_s22  ;;  %v16648_v39 = vpop.permute.xlu0 %4084 }
  0xf3   :  { %13926 = vmatmul.mubr.msk.f32.vlgmr.msra.gmra.mrb[8].mxu0 %vm59_vm2, %v16428_v44  ;;  %15059 = vmatmul.mubr.msk.f32.vlgmr.msra.gmra.mrb[48].mxu1 %vm59_vm2, %v16428_v44  ;;  %v4089_v59 = vsel %vm3774_vm5, %v16648_v39, %v16387_v41  ;;  %v4088_v62 = vsel %vm3774_vm5, %v16632_v33, %v16648_v39 }
  0xf4   :  { %13930 = vmatpush1.msk.msra.mxu0 %vm63_vm1, %v3438_v14  ;;  %15062 = vmatpush3.msk.msra.mxu1 %vm63_vm1, %v16322_v35  ;;  %v16665_v43 = vpop.permute.xlu1 %4239  ;;  %v3934_v35 = vsel %vm3774_vm5, %v16581_v7, %v16332_v12 }
  0xf5   :  { %13934 = vmatprep.subr.msk.mxu0 %vm63_vm1, %v3594_v38  ;;  %6624 = vrot.lane.b32.xlu0 %v15898_v15, %s15756_s22 }
  0xf6   :  { %15063 = vmatprep.mubr.msk.f32.mxu1 %vm15755_vm3, %v15751_v6  ;;  %15066 = vmatprep.subr.mxu1 %v15751_v6  ;;  %v16673_v18 = vpop.permute.xlu0 %5356 }
  0xf7   :  { %6779 = vrot.lane.b32.xlu1 %v15911_v17, %s15756_s22  ;;  %15064 = vmatmul.mubr.msk.f32.vlgmr.msra.gmra.mrb[50].mxu1 %vm59_vm2, %v16663_v29 }
  0xf8   :  { %15067 = vmatpush3.msk.msra.mxu1 %vm63_vm1, %v16332_v12  ;;  %3510 = vmatprep.mubr.f32.mxu0 %v15751_v6  ;;  %v16685_v46 = vpop.permute.xlu1 %5511 }
  0xf9   :  { %7896 = vrot.lane.b32.xlu0 %v16258_v28, %s15757_s13  ;;  %13931 = vmatmul.mubr.msk.f32.vlgmr.msra.gmra.mrb[10].mxu0 %vm59_vm2, %v16428_v44 }
  0xfa   :  { %13935 = vmatpush1.msk.msra.mxu0 %vm63_vm1, %v3593_v45  ;;  %15068 = vmatprep.mubr.msk.f32.mxu1 %vm15755_vm3, %v15751_v6  ;;  %v16694_v47 = vpop.permute.xlu0 %4237 }
  0xfb   :  { %15071 = vmatprep.subr.mxu1 %v15751_v6  ;;  %8051 = vrot.lane.b32.xlu1 %v16285_v31, %s15757_s13  ;;  %v4243_v7 = vsel %vm3774_vm5, %v16694_v47, %v16665_v43 }
  0xfc   :  { %15069 = vmatmul.mubr.msk.f32.vlgmr.msra.gmra.mrb[52].mxu1 %vm59_vm2, %v16663_v29  ;;  %3665 = vmatprep.mubr.f32.mxu0 %v15751_v6  ;;  %v16708_v51 = vpop.permute.xlu1 %4392 }
  0xfd   :  { %15072 = vmatpush3.msk.msra.mxu1 %vm63_vm1, %v16387_v41  ;;  %6777 = vrot.lane.b32.xlu0 %v16715_v52, %s15756_s22  ;;  %v4244_v41 = vsel %vm3774_vm5, %v16665_v43, %v16401_v42 }
  0xfe   :  { %13940 = vmatprep.subr.msk.mxu0 %vm63_vm1, %v3776_v50  ;;  %13936 = vmatmul.mubr.msk.f32.vlgmr.msra.gmra.mrb[12].mxu0 %vm59_vm2, %v16428_v44  ;;  %v16725_v53 = vpop.permute.xlu0 %4394 }
  0xff   :  { %13941 = vmatpush1.msk.msra.mxu0 %vm63_vm1, %v3775_v20  ;;  %15073 = vmatprep.mubr.msk.f32.mxu1 %vm15755_vm3, %v15751_v6  ;;  %v4399_v3 = vsel %vm3774_vm5, %v16725_v53, %v16460_v49  ;;  %v4398_v32 = vsel %vm3774_vm5, %v16708_v51, %v16725_v53 }
 0x100   :  { %15076 = vmatprep.subr.mxu1 %v15751_v6  ;;  %6932 = vrot.lane.b32.xlu1 %v16734_v54, %s15756_s22  ;;  %v16738_v44 = vpop.permute.xlu1 %4549 }
 0x101   :  { %13945 = vmatprep.subr.msk.mxu0 %vm63_vm1, %v3934_v35  ;;  %15074 = vmatmul.mubr.msk.f32.vlgmr.msra.gmra.mrb[54].mxu1 %vm59_vm2, %v16663_v29 }
 0x102   :  { %15077 = vmatpush3.msk.msra.mxu1 %vm63_vm1, %v16401_v42  ;;  %6934 = vrot.lane.b32.xlu0 %v15924_v19, %s15756_s22  ;;  %v16747_v12 = vpop.permute.xlu0 %5666 }
 0x103   :  { %15078 = vmatprep.mubr.msk.f32.mxu1 %vm15755_vm3, %v15751_v6  ;;  %15081 = vmatprep.subr.mxu1 %v15751_v6 }
 0x104   :  { %7089 = vrot.lane.b32.xlu1 %v15937_v21, %s15756_s22  ;;  %3850 = vmatprep.mubr.f32.mxu0 %v15751_v6 }
 0x105   :  { %15079 = vmatmul.mubr.msk.f32.vlgmr.msra.gmra.mrb[56].mxu1 %vm59_vm2, %v16663_v29  ;;  %13942 = vmatmul.mubr.msk.f32.vlgmr.msra.gmra.mrb[14].mxu0 %vm59_vm2, %v16663_v29  ;;  %v16762_v56 = vpop.permute.xlu1 %5821 }
 0x106   :  { %15082 = vmatpush3.msk.msra.mxu1 %vm63_vm1, %v16460_v49  ;;  %8206 = vrot.lane.b32.xlu0 %v16314_v34, %s15757_s13  ;;  %v16768_v58 = vpop.permute.xlu0 %4547  ;;  %v4554_v49 = vsel %vm3774_vm5, %v16738_v44, %v16468_v22 }
 0x107   :  { %13946 = vmatpush1.msk.msra.mxu0 %vm63_vm1, %v3933_v55  ;;  %15083 = vmatprep.mubr.msk.f32.mxu1 %vm15755_vm3, %v15751_v6  ;;  %v4553_v39 = vsel %vm3774_vm5, %v16768_v58, %v16738_v44 }
 0x108   :  { %15086 = vmatprep.subr.mxu1 %v15751_v6  ;;  %8361 = vrot.lane.b32.xlu1 %v16341_v36, %s15757_s13 }
 0x109   :  { %15084 = vmatmul.mubr.msk.f32.vlgmr.msra.gmra.mrb[58].mxu1 %vm59_vm2, %v16663_v29  ;;  %4005 = vmatprep.mubr.f32.mxu0 %v15751_v6 }
 0x10a   :  { %15087 = vmatpush3.msk.msra.mxu1 %vm63_vm1, %v16468_v22  ;;  %7087 = vrot.lane.b32.xlu0 %v16456_v48, %s15756_s22  ;;  %v16789_v63 = vpop.permute.xlu1 %4702 }
 0x10b   :  { %13950 = vmatprep.subr.msk.mxu0 %vm63_vm1, %v4089_v59  ;;  %13947 = vmatmul.mubr.msk.f32.vlgmr.msra.gmra.mrb[0].mxu0 %vm59_vm2, %v16663_v29  ;;  %v16797_v2 = vpop.permute.xlu0 %4704 }
 0x10c   :  { %13951 = vmatpush1.msk.msra.mxu0 %vm63_vm1, %v4088_v62  ;;  %15088 = vmatprep.mubr.msk.f32.mxu1 %vm15755_vm3, %v15751_v6  ;;  %v4709_v43 = vsel %vm3774_vm5, %v16797_v2, %v16522_v57  ;;  %v4708_v47 = vsel %vm3774_vm5, %v16789_v63, %v16797_v2  ;;  %v17023_v63 = vld [vmem:[%s18820_s1 + $0x28] sm:$0xff] }
 0x10d   :  { %15091 = vmatprep.subr.mxu1 %v15751_v6  ;;  %7242 = vrot.lane.b32.xlu1 %v16806_v4, %s15756_s22 }
 0x10e   :  { %13955 = vmatprep.subr.msk.mxu0 %vm63_vm1, %v4244_v41  ;;  %15089 = vmatmul.mubr.msk.f32.vlgmr.msra.gmra.mrb[60].mxu1 %vm59_vm2, %v16663_v29 }
 0x10f   :  { %15092 = vmatpush3.msk.msra.mxu1 %vm63_vm1, %v16522_v57  ;;  %7244 = vrot.lane.b32.xlu0 %v15950_v23, %s15756_s22  ;;  %v16817_v42 = vpop.permute.xlu1 %4859 }
 0x110   :  { %15093 = vmatprep.mubr.msk.f32.mxu1 %vm15755_vm3, %v15751_v6  ;;  %15096 = vmatprep.subr.mxu1 %v15751_v6  ;;  %v16822_v5 = vpop.permute.xlu0 %5976  ;;  %v4864_v57 = vsel %vm3774_vm5, %v16817_v42, %v16537_v60 }
 0x111   :  { %7399 = vrot.lane.b32.xlu1 %v15958_v24, %s15756_s22  ;;  %4160 = vmatprep.mubr.f32.mxu0 %v15751_v6 }
 0x112   :  { %15094 = vmatmul.mubr.msk.f32.vlgmr.msra.gmra.mrb[62].mxu1 %vm59_vm2, %v16663_v29  ;;  %13952 = vmatmul.mubr.msk.f32.vlgmr.msra.gmra.mrb[2].mxu0 %vm59_vm2, %v16663_v29 }
 0x113   :  { %15097 = vmatpush3.msk.msra.mxu1 %vm63_vm1, %v16537_v60  ;;  %8516 = vrot.lane.b32.xlu0 %v16370_v40, %s15757_s13  ;;  %v16838_v8 = vpop.permute.xlu1 %6131 }
 0x114   :  { %13956 = vmatpush1.msk.msra.mxu0 %vm63_vm1, %v4243_v7  ;;  %15098 = vmatprep.mubr.msk.f32.mxu1 %vm15755_vm3, %v15751_v6 }
 0x115   :  { %15101 = vmatprep.subr.mxu1 %v15751_v6  ;;  %8671 = vrot.lane.b32.xlu1 %v16394_v16, %s15757_s13  ;;  %v4858_v10 = vpop.permute.xlu0 %4857 }
 0x116   :  { %15099 = vmatmul.mubr.msk.f32.vlgmr.msra.gmra.mrb[64].mxu1 %vm59_vm2, %v16663_v29  ;;  %4315 = vmatprep.mubr.f32.mxu0 %v15751_v6  ;;  %v4863_v51 = vsel %vm3774_vm5, %v4858_v10, %v16817_v42 }
 0x117   :  { %15102 = vmatpush3.msk.msra.mxu1 %vm63_vm1, %v16596_v9  ;;  %7397 = vrot.lane.b32.xlu0 %v16543_v61, %s15756_s22  ;;  %s15758_s22 = smov 91  }
 0x118   :  { %13960 = vmatprep.subr.msk.mxu0 %vm63_vm1, %v4399_v3  ;;  %13957 = vmatmul.mubr.msk.f32.vlgmr.msra.gmra.mrb[4].mxu0 %vm59_vm2, %v16663_v29  ;;  %v16870_v33 = vpop.permute.xlu1 %5038 }
 0x119   :  { %13961 = vmatpush1.msk.msra.mxu0 %vm63_vm1, %v4398_v32  ;;  %15103 = vmatprep.mubr.msk.f32.mxu1 %vm15755_vm3, %v15751_v6 }
 0x11a   :  { %15106 = vmatprep.subr.mxu1 %v15751_v6  ;;  %7578 = vrot.lane.b32.xlu1 %v16248_v26, %s15757_s13  ;;  %v5041_v38 = vpop.permute.xlu0 %5040 }
 0x11b   :  { %13965 = vmatprep.subr.msk.mxu0 %vm63_vm1, %v4554_v49  ;;  %15104 = vmatmul.mubr.msk.f32.vlgmr.msra.gmra.mrb[66].mxu1 %vm59_vm2, %v16868_v11  ;;  %v5046_v44 = vsel %vm5044_vm6, %v5041_v38, %v16596_v9  ;;  %v5045_v55 = vsel %vm5044_vm6, %v16870_v33, %v5041_v38 }
 0x11c   :  { %15107 = vmatpush3.msk.msra.mxu1 %vm63_vm1, %v16604_v27  ;;  %7580 = vrot.lane.b32.xlu0 %v15811_v1, %s15757_s13 }
 0x11d   :  { %15108 = vmatprep.mubr.msk.f32.mxu1 %vm15755_vm3, %v15751_v6  ;;  %15111 = vmatprep.subr.mxu1 %v15751_v6  ;;  %v16888_v22 = vpop.permute.xlu1 %5199 }
 0x11e   :  { %7739 = vrot.lane.b32.xlu1 %v15885_v13, %s15757_s13  ;;  %4470 = vmatprep.mubr.f32.mxu0 %v15751_v6  ;;  %v5204_v9 = vsel %vm5044_vm6, %v16888_v22, %v16604_v27 }
 0x11f   :  { %15109 = vmatmul.mubr.msk.f32.vlgmr.msra.gmra.mrb[68].mxu1 %vm59_vm2, %v16868_v11  ;;  %13962 = vmatmul.mubr.msk.f32.vlgmr.msra.gmra.mrb[6].mxu0 %vm59_vm2, %v16663_v29  ;;  %v16900_v14 = vpop.permute.xlu0 %6312 }
 0x120   :  { %15112 = vmatpush3.msk.msra.mxu1 %vm63_vm1, %v16673_v18  ;;  %8852 = vrot.lane.b32.xlu0 %v16238_v25, %s15758_s22 }
 0x121   :  { %13966 = vmatpush1.msk.msra.mxu0 %vm63_vm1, %v4553_v39  ;;  %15113 = vmatprep.mubr.msk.f32.mxu1 %vm15755_vm3, %v15751_v6 }
 0x122   :  { %15116 = vmatprep.subr.mxu1 %v15751_v6  ;;  %9011 = vrot.lane.b32.xlu1 %v16219_v0, %s15758_s22  ;;  %v16915_v45 = vpop.permute.xlu1 %6471 }
 0x123   :  { %15114 = vmatmul.mubr.msk.f32.vlgmr.msra.gmra.mrb[70].mxu1 %vm59_vm2, %v16868_v11  ;;  %4625 = vmatprep.mubr.f32.mxu0 %v15751_v6 }
 0x124   :  { %15117 = vmatpush3.msk.msra.mxu1 %vm63_vm1, %v16685_v46  ;;  %7737 = vrot.lane.b32.xlu0 %v16627_v30, %s15757_s13  ;;  %v5198_v50 = vpop.permute.xlu0 %5197 }
 0x125   :  { %13970 = vmatprep.subr.msk.mxu0 %vm63_vm1, %v4709_v43  ;;  %13967 = vmatmul.mubr.msk.f32.vlgmr.msra.gmra.mrb[8].mxu0 %vm59_vm2, %v16663_v29 }
 0x126   :  { %13971 = vmatpush1.msk.msra.mxu0 %vm63_vm1, %v4708_v47  ;;  %15118 = vmatprep.mubr.msk.f32.mxu1 %vm15755_vm3, %v15751_v6 }
 0x127   :  { %15121 = vmatprep.subr.mxu1 %v15751_v6  ;;  %7892 = vrot.lane.b32.xlu1 %v16641_v37, %s15757_s13  ;;  %v5353_v20 = vpop.permute.xlu1 %5352 }
 0x128   :  { %13975 = vmatprep.subr.msk.mxu0 %vm63_vm1, %v4864_v57  ;;  %15119 = vmatmul.mubr.msk.f32.vlgmr.msra.gmra.mrb[72].mxu1 %vm59_vm2, %v16868_v11 }
 0x129   :  { %15122 = vmatpush3.msk.msra.mxu1 %vm63_vm1, %v16747_v12  ;;  %7894 = vrot.lane.b32.xlu0 %v15898_v15, %s15757_s13  ;;  %v5355_v60 = vpop.permute.xlu0 %5354 }
 0x12a   :  { %15123 = vmatprep.mubr.msk.f32.mxu1 %vm15755_vm3, %v15751_v6  ;;  %15126 = vmatprep.subr.mxu1 %v15751_v6  ;;  %v5359_v41 = vsel %vm5044_vm6, %v5355_v60, %v16673_v18  ;;  %v5358_v42 = vsel %vm5044_vm6, %v5353_v20, %v5355_v60 }
 0x12b   :  { %8049 = vrot.lane.b32.xlu1 %v15911_v17, %s15757_s13  ;;  %4780 = vmatprep.mubr.f32.mxu0 %v15751_v6 }
 0x12c   :  { %15124 = vmatmul.mubr.msk.f32.vlgmr.msra.gmra.mrb[74].mxu1 %vm59_vm2, %v16868_v11  ;;  %13972 = vmatmul.mubr.msk.f32.vlgmr.msra.gmra.mrb[10].mxu0 %vm59_vm2, %v16663_v29  ;;  %v16958_v35 = vpop.permute.xlu1 %5509 }
 0x12d   :  { %15127 = vmatpush3.msk.msra.mxu1 %vm63_vm1, %v16762_v56  ;;  %9166 = vrot.lane.b32.xlu0 %v16258_v28, %s15758_s22  ;;  %v5514_v7 = vsel %vm5044_vm6, %v16958_v35, %v16685_v46 }
 0x12e   :  { %13976 = vmatpush1.msk.msra.mxu0 %vm63_vm1, %v4863_v51  ;;  %15128 = vmatprep.mubr.msk.f32.mxu1 %vm15755_vm3, %v15751_v6  ;;  %v16967_v53 = vpop.permute.xlu0 %6626 }
 0x12f   :  { %15131 = vmatprep.subr.mxu1 %v15751_v6  ;;  %9321 = vrot.lane.b32.xlu1 %v16285_v31, %s15758_s22 }
 0x130   :  { %15129 = vmatmul.mubr.msk.f32.vlgmr.msra.gmra.mrb[76].mxu1 %vm59_vm2, %v16868_v11  ;;  %4935 = vmatprep.mubr.f32.mxu0 %v15751_v6 }
 0x131   :  { %15132 = vmatpush3.msk.msra.mxu1 %vm63_vm1, %v16822_v5  ;;  %8047 = vrot.lane.b32.xlu0 %v16715_v52, %s15757_s13  ;;  %v16983_v58 = vpop.permute.xlu1 %6781 }
 0x132   :  { %13981 = vmatprep.subr.msk.mxu0 %vm63_vm1, %v5046_v44  ;;  %13977 = vmatmul.mubr.msk.f32.vlgmr.msra.gmra.mrb[12].mxu0 %vm59_vm2, %v16663_v29  ;;  %v5203_v29 = vsel %vm5044_vm6, %v5198_v50, %v16888_v22 }
 0x133   :  { %13982 = vmatpush1.msk.msra.mxu0 %vm63_vm1, %v5045_v55  ;;  %15133 = vmatprep.mubr.msk.f32.mxu1 %vm15755_vm3, %v15751_v6  ;;  %v5508_v59 = vpop.permute.xlu0 %5507 }
 0x134   :  { %15136 = vmatprep.subr.mxu1 %v15751_v6  ;;  %8202 = vrot.lane.b32.xlu1 %v16734_v54, %s15757_s13  ;;  %v5513_v46 = vsel %vm5044_vm6, %v5508_v59, %v16958_v35 }
 0x135   :  { %13986 = vmatprep.subr.msk.mxu0 %vm63_vm1, %v5204_v9  ;;  %15134 = vmatmul.mubr.msk.f32.vlgmr.msra.gmra.mrb[78].mxu1 %vm59_vm2, %v16868_v11 }
 0x136   :  { %15137 = vmatpush3.msk.msra.mxu1 %vm63_vm1, %v16838_v8  ;;  %8204 = vrot.lane.b32.xlu0 %v15924_v19, %s15757_s13  ;;  %v5663_v27 = vpop.permute.xlu1 %5662 }
 0x137   :  { %15138 = vmatprep.mubr.msk.f32.mxu1 %vm15755_vm3, %v15751_v6  ;;  %15141 = vmatprep.subr.mxu1 %v15751_v6 }
 0x138   :  { %8359 = vrot.lane.b32.xlu1 %v15937_v21, %s15757_s13  ;;  %5120 = vmatprep.mubr.f32.mxu0 %v15751_v6  ;;  %v5665_v62 = vpop.permute.xlu0 %5664 }
 0x139   :  { %15139 = vmatmul.mubr.msk.f32.vlgmr.msra.gmra.mrb[80].mxu1 %vm59_vm2, %v16868_v11  ;;  %13983 = vmatmul.mubr.msk.f32.vlgmr.msra.gmra.mrb[14].mxu0 %vm59_vm2, %v16868_v11  ;;  %v5669_v49 = vsel %vm5044_vm6, %v5665_v62, %v16747_v12  ;;  %v5668_v33 = vsel %vm5044_vm6, %v5663_v27, %v5665_v62 }
 0x13a   :  { %15142 = vmatpush3.msk.msra.mxu1 %vm63_vm1, %v16900_v14  ;;  %9476 = vrot.lane.b32.xlu0 %v16314_v34, %s15758_s22 }
 0x13b   :  { %13987 = vmatpush1.msk.msra.mxu0 %vm63_vm1, %v5203_v29  ;;  %15143 = vmatprep.mubr.msk.f32.mxu1 %vm15755_vm3, %v15751_v6 }
 0x13c   :  { %15146 = vmatprep.subr.mxu1 %v15751_v6  ;;  %9631 = vrot.lane.b32.xlu1 %v16341_v36, %s15758_s22  ;;  %v5820_v2 = vpop.permute.xlu1 %5819 }
 0x13d   :  { %15144 = vmatmul.mubr.msk.f32.vlgmr.msra.gmra.mrb[82].mxu1 %vm59_vm2, %v17023_v63  ;;  %5275 = vmatprep.mubr.f32.mxu0 %v15751_v6 }
 0x13e   :  { %15147 = vmatpush3.msk.msra.mxu1 %vm63_vm1, %v16915_v45  ;;  %8357 = vrot.lane.b32.xlu0 %v16456_v48, %s15757_s13  ;;  %v17044_v3 = vpop.permute.xlu0 %6936 }
 0x13f   :  { %13991 = vmatprep.subr.msk.mxu0 %vm63_vm1, %v5359_v41  ;;  %13988 = vmatmul.mubr.msk.f32.vlgmr.msra.gmra.mrb[0].mxu0 %vm59_vm2, %v16868_v11 }
 0x140   :  { %13992 = vmatpush1.msk.msra.mxu0 %vm63_vm1, %v5358_v42  ;;  %15148 = vmatprep.mubr.msk.f32.mxu1 %vm15755_vm3, %v15751_v6 }
 0x141   :  { %8512 = vrot.lane.b32.xlu1 %v16806_v4, %s15757_s13  ;;  %13996 = vmatprep.subr.msk.mxu0 %vm63_vm1, %v5514_v7  ;;  %v17055_v18 = vpop.permute.xlu1 %7091 }
 0x142   :  { %15149 = vmatmul.mubr.msk.f32.vlgmr.msra.gmra.mrb[84].mxu1 %vm59_vm2, %v17023_v63  ;;  %15151 = vmatprep.subr.mxu1 %v15751_v6 }
 0x143   :  { %15152 = vmatpush3.msk.msra.mxu1 %vm63_vm1, %v16967_v53  ;;  %8514 = vrot.lane.b32.xlu0 %v15950_v23, %s15757_s13 }
 0x144   :  { %15153 = vmatprep.mubr.msk.f32.mxu1 %vm15755_vm3, %v15751_v6  ;;  %5430 = vmatprep.mubr.f32.mxu0 %v15751_v6  ;;  %v5818_v10 = vpop.permute.xlu0 %5817 }
 0x145   :  { %8669 = vrot.lane.b32.xlu1 %v15958_v24, %s15757_s13  ;;  %15156 = vmatprep.subr.mxu1 %v15751_v6 }
 0x146   :  { %15154 = vmatmul.mubr.msk.f32.vlgmr.msra.gmra.mrb[86].mxu1 %vm59_vm2, %v17023_v63  ;;  %13993 = vmatmul.mubr.msk.f32.vlgmr.msra.gmra.mrb[2].mxu0 %vm59_vm2, %v16868_v11  ;;  %v5973_v32 = vpop.permute.xlu1 %5972 }
 0x147   :  { %9786 = vrot.lane.b32.xlu0 %v16370_v40, %s15758_s22  ;;  %13997 = vmatpush1.msk.msra.mxu0 %vm63_vm1, %v5513_v46  ;;  %v5824_v40 = vsel %vm5044_vm6, %v5820_v2, %v16762_v56 }
 0x148   :  { %15157 = vmatpush3.msk.msra.mxu1 %vm63_vm1, %v16983_v58  ;;  %15158 = vmatprep.mubr.msk.f32.mxu1 %vm15755_vm3, %v15751_v6 }
 0x149   :  { %9941 = vrot.lane.b32.xlu1 %v16394_v16, %s15758_s22  ;;  %5585 = vmatprep.mubr.f32.mxu0 %v15751_v6  ;;  %v5975_v38 = vpop.permute.xlu0 %5974 }
 0x14a   :  { %15159 = vmatmul.mubr.msk.f32.vlgmr.msra.gmra.mrb[88].mxu1 %vm59_vm2, %v17023_v63  ;;  %14001 = vmatprep.subr.msk.mxu0 %vm63_vm1, %v5669_v49  ;;  %v5979_v39 = vsel %vm5044_vm6, %v5975_v38, %v16822_v5  ;;  %v5978_v50 = vsel %vm5044_vm6, %v5973_v32, %v5975_v38 }
 0x14b   :  { %8667 = vrot.lane.b32.xlu0 %v16543_v61, %s15757_s13  ;;  %13998 = vmatmul.mubr.msk.f32.vlgmr.msra.gmra.mrb[4].mxu0 %vm59_vm2, %v16868_v11  ;;  %v6130_v16 = vpop.permute.xlu1 %6129 }
 0x14c   :  { %14002 = vmatpush1.msk.msra.mxu0 %vm63_vm1, %v5668_v33  ;;  %15161 = vmatprep.subr.mxu1 %v15751_v6  ;;  %v6134_v5 = vsel %vm5044_vm6, %v6130_v16, %v16838_v8 }
 0x14d   :  { %8848 = vrot.lane.b32.xlu1 %v16248_v26, %s15758_s22  ;;  %14006 = vmatprep.subr.msk.mxu0 %vm63_vm1, %v5824_v40  ;;  %v5823_v26 = vsel %vm5044_vm6, %v5818_v10, %v5820_v2 }
 0x14e   :  { %15162 = vmatpush3.msk.msra.mxu1 %vm63_vm1, %v17044_v3  ;;  %15163 = vmatprep.mubr.msk.f32.mxu1 %vm15755_vm3, %v15751_v6  ;;  %v17107_v12 = vpop.permute.xlu0 %7246 }
 0x14f   :  { %8850 = vrot.lane.b32.xlu0 %v15811_v1, %s15758_s22  ;;  %15164 = vmatmul.mubr.msk.f32.vlgmr.msra.gmra.mrb[90].mxu1 %vm59_vm2, %v17023_v63 }
 0x150   :  { %15166 = vmatprep.subr.mxu1 %v15751_v6  ;;  %5740 = vmatprep.mubr.f32.mxu0 %v15751_v6  ;;  %v17116_v56 = vpop.permute.xlu1 %7401 }
 0x151   :  { %9009 = vrot.lane.b32.xlu1 %v15885_v13, %s15758_s22  ;;  %15167 = vmatpush3.msk.msra.mxu1 %vm63_vm1, %v17055_v18  ;;  %v17122_v22 = vpop.f32.mrb[0].mxu1 }
 0x152   :  { %15168 = vmatprep.mubr.msk.f32.mxu1 %vm15755_vm3, %v15751_v6  ;;  %14003 = vmatmul.mubr.msk.f32.vlgmr.msra.gmra.mrb[6].mxu0 %vm59_vm2, %v16868_v11  ;;  %v17130_v43 = vpop.f32.mrb[1].mxu1 }
 0x153   :  { %10122 = vrot.lane.b32.xlu0 %v16238_v25, %s15759_s16  ;;  %14007 = vmatpush1.msk.msra.mxu0 %vm63_vm1, %v5823_v26  ;;  %v6128_v47 = vpop.permute.xlu0 %6127 }
 0x154   :  { %15169 = vmatmul.mubr.msk.f32.vlgmr.msra.gmra.mrb[92].mxu1 %vm59_vm2, %v17023_v63  ;;  %5895 = vmatprep.mubr.f32.mxu0 %v15751_v6  ;;  %v6133_v35 = vsel %vm5044_vm6, %v6128_v47, %v6130_v16 }
 0x155   :  { %10281 = vrot.lane.b32.xlu1 %v16219_v0, %s15759_s16  ;;  %14011 = vmatprep.subr.msk.mxu0 %vm63_vm1, %v5979_v39  ;;  %v6309_v57 = vpop.permute.xlu1 %6308  ;;  %v17144_v25 = vpop.f32.mrb[2].mxu1 }
 0x156   :  { %14008 = vmatmul.mubr.msk.f32.vlgmr.msra.gmra.mrb[8].mxu0 %vm59_vm2, %v16868_v11  ;;  %15171 = vmatprep.subr.mxu1 %v15751_v6  ;;  %v14945_v20 = vpop.f32.mrb[3].mxu1 }
 0x157   :  { %9007 = vrot.lane.b32.xlu0 %v16627_v30, %s15758_s22  ;;  %14012 = vmatpush1.msk.msra.mxu0 %vm63_vm1, %v5978_v50  ;;  %v15721_v20 = vld [vmem:[%s18819_s0 + $0x50] sm:$0xf] }
 0x158   :  { %14016 = vmatprep.subr.msk.mxu0 %vm63_vm1, %v6134_v5  ;;  %15172 = vmatpush3.msk.msra.mxu1 %vm63_vm1, %v17107_v12  ;;  %v6311_v0 = vpop.permute.xlu0 %6310 }
 0x159   :  { %9162 = vrot.lane.b32.xlu1 %v16641_v37, %s15758_s22  ;;  %15173 = vmatprep.mubr.msk.f32.mxu1 %vm15755_vm3, %v15751_v6  ;;  %v17159_v8 = vpop.f32.mrb[4].mxu1  ;;  %v6316_v44 = vsel %vm6314_vm7, %v6311_v0, %v16900_v14  ;;  %v6315_v27 = vsel %vm6314_vm7, %v6309_v57, %v6311_v0 }
 0x15a   :  { %15174 = vmatmul.mubr.msk.f32.vlgmr.msra.gmra.mrb[94].mxu1 %vm59_vm2, %v17023_v63  ;;  %15176 = vmatprep.subr.mxu1 %v15751_v6  ;;  %v6470_v60 = vpop.permute.xlu1 %6469  ;;  %v14950_v51 = vpop.f32.mrb[5].mxu1 }
 0x15b   :  { %9164 = vrot.lane.b32.xlu0 %v15898_v15, %s15758_s22  ;;  %6050 = vmatprep.mubr.f32.mxu0 %v15751_v6  ;;  %v6474_v14 = vsel %vm6314_vm7, %v6470_v60, %v16915_v45 }
 0x15c   :  { %15177 = vmatpush3.msk.msra.mxu1 %vm63_vm1, %v17116_v56  ;;  %15178 = vmatprep.mubr.msk.f32.mxu1 %vm15755_vm3, %v15751_v6 }
 0x15d   :  { %9319 = vrot.lane.b32.xlu1 %v15911_v17, %s15758_s22  ;;  %14013 = vmatmul.mubr.msk.f32.vlgmr.msra.gmra.mrb[10].mxu0 %vm59_vm2, %v16868_v11  ;;  %v17178_v55 = vpop.permute.xlu0 %7582  ;;  %v17180_v9 = vpop.f32.mrb[6].mxu1 }
 0x15e   :  { %14017 = vmatpush1.msk.msra.mxu0 %vm63_vm1, %v6133_v35  ;;  %15179 = vmatmul.mubr.msk.f32.vlgmr.msra.gmra.mrb[96].mxu1 %vm59_vm2, %v17023_v63  ;;  %v14955_v59 = vpop.f32.mrb[7].mxu1 }
 0x15f   :  { %10436 = vrot.lane.b32.xlu0 %v16258_v28, %s15759_s16  ;;  %6205 = vmatprep.mubr.f32.mxu0 %v15751_v6  ;;  %v17189_v29 = vpop.permute.xlu1 %7741  ;;  %v17205_v28 = vld [vmem:[%s18820_s1 + $0x30] sm:$0xff] }
 0x160   :  { %14022 = vmatprep.subr.msk.mxu0 %vm63_vm1, %v6316_v44  ;;  %15181 = vmatprep.subr.mxu1 %v15751_v6 }
 0x161   :  { %10591 = vrot.lane.b32.xlu1 %v16285_v31, %s15759_s16  ;;  %14018 = vmatmul.mubr.msk.f32.vlgmr.msra.gmra.mrb[12].mxu0 %vm59_vm2, %v16868_v11 }
 0x162   :  { %14023 = vmatpush1.msk.msra.mxu0 %vm63_vm1, %v6315_v27  ;;  %15182 = vmatpush3.msk.msra.mxu1 %vm63_vm1, %v17178_v55  ;;  %v6468_v45 = vpop.permute.xlu0 %6467  ;;  %v17207_v62 = vpop.f32.mrb[8].mxu1  ;;  %v15723_v27 = vld [vmem:[%s18819_s0] sm:$0xff] }
 0x163   :  { %9317 = vrot.lane.b32.xlu0 %v16715_v52, %s15758_s22  ;;  %14027 = vmatprep.subr.msk.mxu0 %vm63_vm1, %v6474_v14  ;;  %v14960_v31 = vpop.f32.mrb[9].mxu1  ;;  %v6473_v41 = vsel %vm6314_vm7, %v6468_v45, %v6470_v60  ;;  %v15722_v60 = vld [vmem:[%s18819_s0 + $0x5c] sm:$0xf] }
 0x164   :  { %15183 = vmatprep.mubr.msk.f32.mxu1 %vm15755_vm3, %v15751_v6  ;;  %15186 = vmatprep.subr.mxu1 %v15751_v6  ;;  %v6623_v11 = vpop.permute.xlu1 %6622 }
 0x165   :  { %9472 = vrot.lane.b32.xlu1 %v16734_v54, %s15758_s22  ;;  %15184 = vmatmul.mubr.msk.f32.vlgmr.msra.gmra.mrb[98].mxu1 %vm59_vm2, %v17205_v28 }
 0x166   :  { %6390 = vmatprep.mubr.f32.mxu0 %v15751_v6  ;;  %15187 = vmatpush3.msk.msra.mxu1 %vm63_vm1, %v17189_v29 }
 0x167   :  { %9474 = vrot.lane.b32.xlu0 %v15924_v19, %s15758_s22  ;;  %15188 = vmatprep.mubr.msk.f32.mxu1 %vm15755_vm3, %v15751_v6  ;;  %v6625_v2 = vpop.permute.xlu0 %6624  ;;  %v17227_v42 = vpop.f32.mrb[10].mxu1 }
 0x168   :  { %14024 = vmatmul.mubr.msk.f32.vlgmr.msra.gmra.mrb[14].mxu0 %vm59_vm2, %v17023_v63  ;;  %v6629_v7 = vsel %vm6314_vm7, %v6625_v2, %v16967_v53  ;;  %15191 = vmatprep.subr.mxu1 %v15751_v6  ;;  %v14965_v46 = vpop.f32.mrb[11].mxu1  ;;  %v6628_v32 = vsel %vm6314_vm7, %v6623_v11, %v6625_v2 }
 0x169   :  { %9629 = vrot.lane.b32.xlu1 %v15937_v21, %s15758_s22  ;;  %14028 = vmatpush1.msk.msra.mxu0 %vm63_vm1, %v6473_v41  ;;  %v6780_v10 = vpop.permute.xlu1 %6779 }
 0x16a   :  { %15189 = vmatmul.mubr.msk.f32.vlgmr.msra.gmra.mrb[100].mxu1 %vm59_vm2, %v17205_v28  ;;  %6545 = vmatprep.mubr.f32.mxu0 %v15751_v6  ;;  %v6784_v53 = vsel %vm6314_vm7, %v6780_v10, %v16983_v58 }
 0x16b   :  { %10746 = vrot.lane.b32.xlu0 %v16314_v34, %s15759_s16  ;;  %14032 = vmatprep.subr.msk.mxu0 %vm63_vm1, %v6629_v7  ;;  %v17246_v49 = vpop.permute.xlu0 %7896 }
 0x16c   :  { %14029 = vmatmul.mubr.msk.f32.vlgmr.msra.gmra.mrb[0].mxu0 %vm59_vm2, %v17023_v63  ;;  %15192 = vmatpush3.msk.msra.mxu1 %vm63_vm1, %v17246_v49  ;;  %v17252_v33 = vpop.f32.mrb[12].mxu1 }
 0x16d   :  { %10901 = vrot.lane.b32.xlu1 %v16341_v36, %s15759_s16  ;;  %14033 = vmatpush1.msk.msra.mxu0 %vm63_vm1, %v6628_v32  ;;  %v17257_v34 = vpop.permute.xlu1 %8051  ;;  %v14970_v58 = vpop.f32.mrb[13].mxu1 }
 0x16e   :  { %14037 = vmatprep.subr.msk.mxu0 %vm63_vm1, %v6784_v53  ;;  %15193 = vmatprep.mubr.msk.f32.mxu1 %vm15755_vm3, %v15751_v6 }
 0x16f   :  { %9627 = vrot.lane.b32.xlu0 %v16456_v48, %s15758_s22  ;;  %15194 = vmatmul.mubr.msk.f32.vlgmr.msra.gmra.mrb[102].mxu1 %vm59_vm2, %v17205_v28  ;;  %v6778_v38 = vpop.permute.xlu0 %6777 }
 0x170   :  { %15196 = vmatprep.subr.mxu1 %v15751_v6  ;;  %v6783_v36 = vsel %vm6314_vm7, %v6778_v38, %v6780_v10  ;;  %6700 = vmatprep.mubr.f32.mxu0 %v15751_v6  ;;  %v15724_v38 = vld [vmem:[%s18819_s0 + $0x3c] sm:$0xff] }
 0x171   :  { %9782 = vrot.lane.b32.xlu1 %v16806_v4, %s15758_s22  ;;  %15197 = vmatpush3.msk.msra.mxu1 %vm63_vm1, %v17257_v34  ;;  %v17273_v40 = vpop.f32.mrb[14].mxu1 }
 0x172   :  { %15198 = vmatprep.mubr.msk.f32.mxu1 %vm15755_vm3, %v15751_v6  ;;  %v6933_v48 = vpop.permute.xlu1 %6932  ;;  %14034 = vmatmul.mubr.msk.f32.vlgmr.msra.gmra.mrb[2].mxu0 %vm59_vm2, %v17023_v63  ;;  %v14975_v16 = vpop.f32.mrb[15].mxu1 }
 0x173   :  { %9784 = vrot.lane.b32.xlu0 %v15950_v23, %s15758_s22  ;;  %14038 = vmatpush1.msk.msra.mxu0 %vm63_vm1, %v6783_v36 }
 0x174   :  { %15199 = vmatmul.mubr.msk.f32.vlgmr.msra.gmra.mrb[104].mxu1 %vm59_vm2, %v17205_v28  ;;  %v6935_v26 = vpop.permute.xlu0 %6934  ;;  %6855 = vmatprep.mubr.f32.mxu0 %v15751_v6 }
 0x175   :  { %9939 = vrot.lane.b32.xlu1 %v15958_v24, %s15758_s22  ;;  %v6938_v39 = vsel %vm6314_vm7, %v6933_v48, %v6935_v26  ;;  %v6939_v47 = vsel %vm6314_vm7, %v6935_v26, %v17044_v3  ;;  %15201 = vmatprep.subr.mxu1 %v15751_v6  ;;  %v17291_v50 = vpop.f32.mrb[16].mxu1 }
 0x176   :  { %v7090_v5 = vpop.permute.xlu1 %7089  ;;  %14042 = vmatprep.subr.msk.mxu0 %vm63_vm1, %v6939_v47  ;;  %14039 = vmatmul.mubr.msk.f32.vlgmr.msra.gmra.mrb[4].mxu0 %vm59_vm2, %v17023_v63  ;;  %v14980_v57 = vpop.f32.mrb[17].mxu1 }
 0x177   :  { %11056 = vrot.lane.b32.xlu0 %v15721_v20, %s15759_s16  ;;  %v7094_v3 = vsel %vm6314_vm7, %v7090_v5, %v17055_v18  ;;  %14043 = vmatpush1.msk.msra.mxu0 %vm63_vm1, %v6938_v39 }
 0x178   :  { %14047 = vmatprep.subr.msk.mxu0 %vm63_vm1, %v7094_v3  ;;  %v17304_v0 = vpop.permute.xlu0 %8206  ;;  %15203 = vmatprep.mubr.msk.f32.mxu1 %vm15755_vm3, %v15751_v6  ;;  %v15760_v3 = vmov 0  }
 0x179   :  { %11211 = vrot.lane.b32.xlu1 %v15722_v60, %s15759_s16  ;;  %15202 = vmatpush3.msk.msra.mxu1 %vm63_vm1, %v17304_v0 }
 0x17a   :  { %v17314_v51 = vpop.permute.xlu1 %8361  ;;  %15204 = vmatmul.mubr.msk.f32.vlgmr.msra.gmra.mrb[106].mxu1 %vm59_vm2, %v17205_v28  ;;  %15206 = vmatprep.subr.mxu1 %v15751_v6  ;;  %v1463_v18 = vpop.f32.mrb[18].mxu1 }
 0x17b   :  { %9937 = vrot.lane.b32.xlu0 %v16543_v61, %s15758_s22  ;;  %7010 = vmatprep.mubr.f32.mxu0 %v15751_v6  ;;  %v17323_v35 = vadd.f32 %v1463_v18, %v17144_v25  ;;  %v14985_v44 = vpop.f32.mrb[19].mxu1 }
 0x17c   :  { %v7088_v59 = vpop.permute.xlu0 %7087  ;;  %15207 = vmatpush3.msk.msra.mxu1 %vm63_vm1, %v17314_v51  ;;  %15208 = vmatprep.mubr.msk.f32.mxu1 %vm15755_vm3, %v15751_v6 }
 0x17d   :  { %10118 = vrot.lane.b32.xlu1 %v15723_v27, %s15759_s16  ;;  %v7093_v61 = vsel %vm6314_vm7, %v7088_v59, %v7090_v5  ;;  %14044 = vmatmul.mubr.msk.f32.vlgmr.msra.gmra.mrb[6].mxu0 %vm59_vm2, %v17023_v63 }
 0x17e   :  { %14048 = vmatpush1.msk.msra.mxu0 %vm63_vm1, %v7093_v61  ;;  %15209 = vmatmul.mubr.msk.f32.vlgmr.msra.gmra.mrb[108].mxu1 %vm59_vm2, %v17205_v28 }
 0x17f   :  { %10120 = vrot.lane.b32.xlu0 %v15811_v1, %s15759_s16  ;;  %v7243_v25 = vpop.permute.xlu1 %7242  ;;  %7165 = vmatprep.mubr.f32.mxu0 %v15751_v6  ;;  %v1610_v14 = vpop.f32.mrb[20].mxu1 }
 0x180   :  { %15211 = vmatprep.subr.mxu1 %v15751_v6  ;;  %15213 = vmatprep.mubr.msk.f32.mxu1 %vm15755_vm3, %v15751_v6  ;;  %v17346_v45 = vadd.f32 %v1610_v14, %v17159_v8  ;;  %v14990_v31 = vpop.f32.mrb[21].mxu1 }
 0x181   :  { %10277 = vrot.lane.b32.xlu1 %v16627_v30, %s15759_s16  ;;  %v7245_v11 = vpop.permute.xlu0 %7244  ;;  %14049 = vmatmul.mubr.msk.f32.vlgmr.msra.gmra.mrb[8].mxu0 %vm59_vm2, %v17023_v63 }
 0x182   :  { %v7248_v1 = vsel %vm6314_vm7, %v7243_v25, %v7245_v11  ;;  %v7249_v41 = vsel %vm6314_vm7, %v7245_v11, %v17107_v12  ;;  %7320 = vmatprep.mubr.f32.mxu0 %v15751_v6  ;;  %15550 = vset.pattern.permute.xlu0 %v15760_v3 }
 0x183   :  { %10279 = vrot.lane.b32.xlu0 %v15885_v13, %s15759_s16  ;;  %v7400_v8 = vpop.permute.xlu1 %7399  ;;  %14052 = vmatprep.subr.msk.mxu0 %vm63_vm1, %v7249_v41 }
 0x184   :  { %v7404_v30 = vsel %vm6314_vm7, %v7400_v8, %v17116_v56  ;;  %14053 = vmatpush1.msk.msra.mxu0 %vm63_vm1, %v7248_v1  ;;  %v1757_v2 = vpop.f32.mrb[22].mxu1 }
 0x185   :  { %10432 = vrot.lane.b32.xlu1 %v16641_v37, %s15759_s16  ;;  %14057 = vmatprep.subr.msk.mxu0 %vm63_vm1, %v7404_v30  ;;  %v17365_v12 = vpop.permute.xlu0 %8516  ;;  %v17368_v7 = vadd.f32 %v1757_v2, %v17180_v9  ;;  %v14995_v13 = vpop.f32.mrb[23].mxu1 }
 0x186   :  { %15212 = vmatpush3.msk.msra.mxu1 %vm63_vm1, %v17365_v12  ;;  %14054 = vmatmul.mubr.msk.f32.vlgmr.msra.gmra.mrb[10].mxu0 %vm59_vm2, %v17023_v63 }
 0x187   :  { %10434 = vrot.lane.b32.xlu0 %v15898_v15, %s15759_s16  ;;  %v17376_v56 = vpop.permute.xlu1 %8671  ;;  %15214 = vmatmul.mubr.msk.f32.vlgmr.msra.gmra.mrb[110].mxu1 %vm59_vm2, %v17205_v28 }
 0x188   :  { %15216 = vmatprep.subr.mxu1 %v15751_v6  ;;  %15218 = vmatprep.mubr.msk.f32.mxu1 %vm15755_vm3, %v15751_v6 }
 0x189   :  { %10587 = vrot.lane.b32.xlu1 %v16715_v52, %s15759_s16  ;;  %v7398_v37 = vpop.permute.xlu0 %7397  ;;  %15217 = vmatpush3.msk.msra.mxu1 %vm63_vm1, %v17376_v56  ;;  %v1904_v9 = vpop.f32.mrb[24].mxu1 }
 0x18a   :  { %v7403_v15 = vsel %vm6314_vm7, %v7398_v37, %v7400_v8  ;;  %7475 = vmatprep.mubr.f32.mxu0 %v15751_v6  ;;  %15221 = vmatprep.subr.mxu1 %v15751_v6  ;;  %v17391_v46 = vadd.f32 %v1904_v9, %v17207_v62  ;;  %v15000_v10 = vpop.f32.mrb[25].mxu1 }
 0x18b   :  { %10589 = vrot.lane.b32.xlu0 %v15911_v17, %s15759_s16  ;;  %14058 = vmatpush1.msk.msra.mxu0 %vm63_vm1, %v7403_v15 }
 0x18c   :  { %v7579_v52 = vpop.permute.xlu1 %7578  ;;  %15219 = vmatmul.mubr.msk.f32.vlgmr.msra.gmra.mrb[112].mxu1 %vm59_vm2, %v17205_v28  ;;  %14059 = vmatmul.mubr.msk.f32.vlgmr.msra.gmra.mrb[12].mxu0 %vm59_vm2, %v17023_v63 }
 0x18d   :  { %10742 = vrot.lane.b32.xlu1 %v16734_v54, %s15759_s16  ;;  %15223 = vmatprep.mubr.msk.f32.mxu1 %vm15755_vm3, %v15751_v6 }
 0x18e   :  { %v7581_v62 = vpop.permute.xlu0 %7580  ;;  %7660 = vmatprep.mubr.f32.mxu0 %v15751_v6  ;;  %v2051_v17 = vpop.f32.mrb[26].mxu1 }
 0x18f   :  { %10744 = vrot.lane.b32.xlu0 %v15924_v19, %s15759_s16  ;;  %v7585_v32 = vsel %vm7584_vm8, %v7579_v52, %v7581_v62  ;;  %v7586_v53 = vsel %vm7584_vm8, %v7581_v62, %v17178_v55  ;;  %v17411_v63 = vadd.f32 %v2051_v17, %v17227_v42  ;;  %v15005_v58 = vpop.f32.mrb[27].mxu1  ;;  %v17424_v55 = vld [vmem:[%s18820_s1 + $0x38] sm:$0xff] }
 0x190   :  { %v7740_v54 = vpop.permute.xlu1 %7739  ;;  %14063 = vmatprep.subr.msk.mxu0 %vm63_vm1, %v7586_v53 }
 0x191   :  { %10897 = vrot.lane.b32.xlu1 %v15724_v38, %s15759_s16  ;;  %v7744_v19 = vsel %vm7584_vm8, %v7740_v54, %v17189_v29  ;;  %14064 = vmatpush1.msk.msra.mxu0 %vm63_vm1, %v7585_v32 }
 0x192   :  { %14068 = vmatprep.subr.msk.mxu0 %vm63_vm1, %v7744_v19  ;;  %v17427_v42 = vpop.permute.xlu0 %8852  ;;  %14065 = vmatmul.mubr.msk.f32.vlgmr.msra.gmra.mrb[14].mxu0 %vm59_vm2, %v17205_v28 }
 0x193   :  { %10899 = vrot.lane.b32.xlu0 %v15937_v21, %s15759_s16  ;;  %15222 = vmatpush3.msk.msra.mxu1 %vm63_vm1, %v17427_v42  ;;  %v2198_v29 = vpop.f32.mrb[28].mxu1 }
 0x194   :  { %v17435_v36 = vpop.permute.xlu1 %9011  ;;  %15224 = vmatmul.mubr.msk.f32.vlgmr.msra.gmra.mrb[114].mxu1 %vm59_vm2, %v17424_v55  ;;  %15226 = vmatprep.subr.mxu1 %v15751_v6  ;;  %v17441_v48 = vadd.f32 %v2198_v29, %v17252_v33  ;;  %v15010_v16 = vpop.f32.mrb[29].mxu1  ;;  %v15725_v33 = vld [vmem:[%s18819_s0 + $0x54] sm:$0xff] }
 0x195   :  { %11052 = vrot.lane.b32.xlu1 %v16806_v4, %s15759_s16  ;;  %15227 = vmatpush3.msk.msra.mxu1 %vm63_vm1, %v17435_v36 }
 0x196   :  { %v7738_v21 = vpop.permute.xlu0 %7737  ;;  %15228 = vmatprep.mubr.msk.f32.mxu1 %vm15755_vm3, %v15751_v6  ;;  %7815 = vmatprep.mubr.f32.mxu0 %v15751_v6 }
 0x197   :  { %11054 = vrot.lane.b32.xlu0 %v15950_v23, %s15759_s16  ;;  %v7743_v26 = vsel %vm7584_vm8, %v7738_v21, %v7740_v54  ;;  %15231 = vmatprep.subr.mxu1 %v15751_v6 }
 0x198   :  { %14069 = vmatpush1.msk.msra.mxu0 %vm63_vm1, %v7743_v26  ;;  %15229 = vmatmul.mubr.msk.f32.vlgmr.msra.gmra.mrb[116].mxu1 %vm59_vm2, %v17424_v55  ;;  %v2345_v4 = vpop.f32.mrb[30].mxu1 }
 0x199   :  { %11207 = vrot.lane.b32.xlu1 %v15725_v33, %s15759_s16  ;;  %v7893_v39 = vpop.permute.xlu1 %7892  ;;  %14070 = vmatmul.mubr.msk.f32.vlgmr.msra.gmra.mrb[0].mxu0 %vm59_vm2, %v17205_v28  ;;  %v17464_v23 = vadd.f32 %v2345_v4, %v17273_v40  ;;  %v15015_v47 = vpop.f32.mrb[31].mxu1 }
 0x19a   :  { %15233 = vmatprep.mubr.msk.f32.mxu1 %vm15755_vm3, %v15751_v6  ;;  %7970 = vmatprep.mubr.f32.mxu0 %v15751_v6 }
 0x19b   :  { %11209 = vrot.lane.b32.xlu0 %v15958_v24, %s15759_s16  ;;  %v7895_v5 = vpop.permute.xlu0 %7894  ;;  %s15761_s16 = smov [#allocation2]  }
 0x19c   :  { %v7898_v57 = vsel %vm7584_vm8, %v7893_v39, %v7895_v5  ;;  %v7899_v20 = vsel %vm7584_vm8, %v7895_v5, %v17246_v49  ;;  %s13809_s17 = sshll.u32 %s15761_s16, 4  ;;  %s13810_s17 = int_to_ptr.vmem [resolvable:$true] %s13809_s17 }
 0x19d   :  { %v8050_v60 = vpop.permute.xlu1 %8049  ;;  %14073 = vmatprep.subr.msk.mxu0 %vm63_vm1, %v7899_v20  ;;  %s15726_s18 = scalar_lea.vmem %s13810_s17, 128  ;;  %p15731_p1 = scmp.lt.s32.totalorder %s13810_s17, %s13810_s17 }
 0x19e   :  { %v8054_v40 = vsel %vm7584_vm8, %v8050_v60, %v17257_v34  ;;  %14074 = vmatpush1.msk.msra.mxu0 %vm63_vm1, %v7898_v57  ;;  %v2492_v18 = vpop.f32.mrb[32].mxu1  ;;  %v11386_v34 = vld [vmem:[%s18821_s2] sm:$0xff]  ;;  %p15727_p0 = scmp.ne.s32.totalorder %s13810_s17, %s15726_s18  ;;  %p15732_p2 = scmp.lt.s32.totalorder %s15726_s18, %s15726_s18 }
 0x19f   :  { %14078 = vmatprep.subr.msk.mxu0 %vm63_vm1, %v8054_v40  ;;  %v17479_v24 = vpop.permute.xlu0 %9166  ;;  %14075 = vmatmul.mubr.msk.f32.vlgmr.msra.gmra.mrb[2].mxu0 %vm59_vm2, %v17205_v28  ;;  %v17484_v49 = vadd.f32 %v2492_v18, %v17291_v50  ;;  %v15020_v44 = vpop.f32.mrb[33].mxu1 }
 0x1a0   :  { %15232 = vmatpush3.msk.msra.mxu1 %vm63_vm1, %v17479_v24  ;;  %8125 = vmatprep.mubr.f32.mxu0 %v15751_v6  ;;  %p15733_p3 = por %p15732_p2, %p15731_p1 }
 0x1a1   :  { %v17492_v59 = vpop.permute.xlu1 %9321  ;;  %15234 = vmatmul.mubr.msk.f32.vlgmr.msra.gmra.mrb[118].mxu1 %vm59_vm2, %v17424_v55  ;;  %15236 = vmatprep.subr.mxu1 %v15751_v6 }
 0x1a2   :  { %15237 = vmatpush3.msk.msra.mxu1 %vm63_vm1, %v17492_v59  ;;  %15238 = vmatprep.mubr.msk.f32.mxu1 %vm15755_vm3, %v15751_v6  ;;  %p15734_p4 = pnand %p15733_p3, %p15727_p0 }
 0x1a3   :  { %v8048_v50 = vpop.permute.xlu0 %8047  ;;  %15241 = vmatprep.subr.mxu1 %v15751_v6  ;;  %v2653_v27 = vpop.f32.mrb[34].mxu1  ;;  %11389 = vperm.xlu0 %15550, %v11386_v34  }
 0x1a4   :  { %v8053_v61 = vsel %vm7584_vm8, %v8048_v50, %v8050_v60  ;;  %v17504_v25 = vadd.f32 %v2653_v27, %v17323_v35  ;;  %v15025_v14 = vpop.f32.mrb[35].mxu1  ;;  %v17610_v60 = vld [vmem:[%s18820_s1 + $0x40] sm:$0xff] }
 0x1a5   :  { %14079 = vmatpush1.msk.msra.mxu0 %vm63_vm1, %v8053_v61  ;;  %15239 = vmatmul.mubr.msk.f32.vlgmr.msra.gmra.mrb[120].mxu1 %vm59_vm2, %v17424_v55 }
 0x1a6   :  { %v8203_v31 = vpop.permute.xlu1 %8202  ;;  %14080 = vmatmul.mubr.msk.f32.vlgmr.msra.gmra.mrb[4].mxu0 %vm59_vm2, %v17205_v28  ;;  %15243 = vmatprep.mubr.msk.f32.mxu1 %vm15755_vm3, %v15751_v6 }
 0x1a7   :  { %8280 = vmatprep.mubr.f32.mxu0 %v15751_v6 }
 0x1a8   :  { %v8205_v11 = vpop.permute.xlu0 %8204  ;;  %v2808_v1 = vpop.f32.mrb[36].mxu1 }
 0x1a9   :  { %v8208_v35 = vsel %vm7584_vm8, %v8203_v31, %v8205_v11  ;;  %v8209_v41 = vsel %vm7584_vm8, %v8205_v11, %v17304_v0  ;;  %v17518_v8 = vadd.f32 %v2808_v1, %v17346_v45  ;;  %v15030_v30 = vpop.f32.mrb[37].mxu1 }
 0x1aa   :  { %v8360_v2 = vpop.permute.xlu1 %8359  ;;  %14083 = vmatprep.subr.msk.mxu0 %vm63_vm1, %v8209_v41 }
 0x1ab   :  { %v8364_v13 = vsel %vm7584_vm8, %v8360_v2, %v17314_v51  ;;  %14084 = vmatpush1.msk.msra.mxu0 %vm63_vm1, %v8208_v35 }
 0x1ac   :  { %14088 = vmatprep.subr.msk.mxu0 %vm63_vm1, %v8364_v13  ;;  %v17525_v37 = vpop.permute.xlu0 %9476  ;;  %14085 = vmatmul.mubr.msk.f32.vlgmr.msra.gmra.mrb[6].mxu0 %vm59_vm2, %v17205_v28 }
 0x1ad   :  { %15242 = vmatpush3.msk.msra.mxu1 %vm63_vm1, %v17525_v37  ;;  %8435 = vmatprep.mubr.f32.mxu0 %v15751_v6  ;;  %v2963_v0 = vpop.f32.mrb[38].mxu1 }
 0x1ae   :  { %v17532_v45 = vpop.permute.xlu1 %9631  ;;  %15244 = vmatmul.mubr.msk.f32.vlgmr.msra.gmra.mrb[122].mxu1 %vm59_vm2, %v17424_v55  ;;  %15246 = vmatprep.subr.mxu1 %v15751_v6  ;;  %v17538_v51 = vadd.f32 %v2963_v0, %v17368_v7  ;;  %v15035_v9 = vpop.f32.mrb[39].mxu1 }
 0x1af   :  { %15247 = vmatpush3.msk.msra.mxu1 %vm63_vm1, %v17532_v45  ;;  %15248 = vmatprep.mubr.msk.f32.mxu1 %vm15755_vm3, %v15751_v6 }
 0x1b0   :  { %v8358_v15 = vpop.permute.xlu0 %8357  ;;  %15251 = vmatprep.subr.mxu1 %v15751_v6 }
 0x1b1   :  { %v8363_v10 = vsel %vm7584_vm8, %v8358_v15, %v8360_v2 }
 0x1b2   :  { %14089 = vmatpush1.msk.msra.mxu0 %vm63_vm1, %v8363_v10  ;;  %15249 = vmatmul.mubr.msk.f32.vlgmr.msra.gmra.mrb[124].mxu1 %vm59_vm2, %v17424_v55  ;;  %v3118_v52 = vpop.f32.mrb[40].mxu1 }
 0x1b3   :  { %v8513_v7 = vpop.permute.xlu1 %8512  ;;  %14090 = vmatmul.mubr.msk.f32.vlgmr.msra.gmra.mrb[8].mxu0 %vm59_vm2, %v17205_v28  ;;  %15253 = vmatprep.mubr.msk.f32.mxu1 %vm15755_vm3, %v15751_v6  ;;  %v17554_v62 = vadd.f32 %v3118_v52, %v17391_v46  ;;  %v15040_v17 = vpop.f32.mrb[41].mxu1 }
 0x1b4   :  { %8590 = vmatprep.mubr.f32.mxu0 %v15751_v6 }
 0x1b5   :  { %v8515_v32 = vpop.permute.xlu0 %8514 }
 0x1b6   :  { %v8518_v53 = vsel %vm7584_vm8, %v8513_v7, %v8515_v32  ;;  %v8519_v58 = vsel %vm7584_vm8, %v8515_v32, %v17365_v12 }
 0x1b7   :  { %v8670_v54 = vpop.permute.xlu1 %8669  ;;  %14093 = vmatprep.subr.msk.mxu0 %vm63_vm1, %v8519_v58  ;;  %v3273_v38 = vpop.f32.mrb[42].mxu1 }
 0x1b8   :  { %v8674_v19 = vsel %vm7584_vm8, %v8670_v54, %v17376_v56  ;;  %14094 = vmatpush1.msk.msra.mxu0 %vm63_vm1, %v8518_v53  ;;  %v17565_v46 = vadd.f32 %v3273_v38, %v17411_v63  ;;  %v15045_v29 = vpop.f32.mrb[43].mxu1 }
 0x1b9   :  { %14098 = vmatprep.subr.msk.mxu0 %vm63_vm1, %v8674_v19  ;;  %v17568_v16 = vpop.permute.xlu0 %9786  ;;  %14095 = vmatmul.mubr.msk.f32.vlgmr.msra.gmra.mrb[10].mxu0 %vm59_vm2, %v17205_v28 }
 0x1ba   :  { %15252 = vmatpush3.msk.msra.mxu1 %vm63_vm1, %v17568_v16  ;;  %8745 = vmatprep.mubr.f32.mxu0 %v15751_v6 }
 0x1bb   :  { %v17575_v12 = vpop.permute.xlu1 %9941  ;;  %15254 = vmatmul.mubr.msk.f32.vlgmr.msra.gmra.mrb[126].mxu1 %vm59_vm2, %v17424_v55  ;;  %15256 = vmatprep.subr.mxu1 %v15751_v6 }
 0x1bc   :  { %15257 = vmatpush3.msk.msra.mxu1 %vm63_vm1, %v17575_v12  ;;  %15258 = vmatprep.mubr.msk.f32.mxu1 %vm15755_vm3, %v15751_v6  ;;  %v3428_v56 = vpop.f32.mrb[44].mxu1 }
 0x1bd   :  { %v8668_v63 = vpop.permute.xlu0 %8667  ;;  %v17585_v21 = vadd.f32 %v3428_v56, %v17441_v48  ;;  %15261 = vmatprep.subr.mxu1 %v15751_v6  ;;  %v15050_v26 = vpop.f32.mrb[45].mxu1 }
 0x1be   :  { %v8673_v4 = vsel %vm7584_vm8, %v8668_v63, %v8670_v54 }
 0x1bf   :  { %v8849_v33 = vpop.permute.xlu1 %8848  ;;  %14099 = vmatpush1.msk.msra.mxu0 %vm63_vm1, %v8673_v4  ;;  %15259 = vmatmul.mubr.msk.f32.vlgmr.msra.gmra.mrb[128].mxu1 %vm59_vm2, %v17424_v55 }
 0x1c0   :  { %14100 = vmatmul.mubr.msk.f32.vlgmr.msra.gmra.mrb[12].mxu0 %vm59_vm2, %v17205_v28  ;;  %15263 = vmatprep.mubr.msk.f32.mxu1 %vm15755_vm3, %v15751_v6 }
 0x1c1   :  { %v8851_v48 = vpop.permute.xlu0 %8850  ;;  %v3583_v39 = vpop.f32.mrb[46].mxu1  ;;  %8930 = vmatprep.mubr.f32.mxu0 %v15751_v6 }
 0x1c2   :  { %v8855_v47 = vsel %vm8854_vm9, %v8849_v33, %v8851_v48  ;;  %v8856_v5 = vsel %vm8854_vm9, %v8851_v48, %v17427_v42  ;;  %v17601_v57 = vadd.f32 %v3583_v39, %v17464_v23  ;;  %v15055_v20 = vpop.f32.mrb[47].mxu1 }
 0x1c3   :  { %v9010_v3 = vpop.permute.xlu1 %9009  ;;  %14104 = vmatprep.subr.msk.mxu0 %vm63_vm1, %v8856_v5 }
 0x1c4   :  { %v9014_v28 = vsel %vm8854_vm9, %v9010_v3, %v17435_v36  ;;  %14105 = vmatpush1.msk.msra.mxu0 %vm63_vm1, %v8855_v47 }
 0x1c5   :  { %14109 = vmatprep.subr.msk.mxu0 %vm63_vm1, %v9014_v28  ;;  %v17613_v42 = vpop.permute.xlu0 %10122  ;;  %14106 = vmatmul.mubr.msk.f32.vlgmr.msra.gmra.mrb[14].mxu0 %vm59_vm2, %v17424_v55 }
 0x1c6   :  { %15262 = vmatpush3.msk.msra.mxu1 %vm63_vm1, %v17613_v42  ;;  %v3738_v23 = vpop.f32.mrb[48].mxu1  ;;  %9085 = vmatprep.mubr.f32.mxu0 %v15751_v6 }
 0x1c7   :  { %v17620_v36 = vpop.permute.xlu1 %10281  ;;  %15264 = vmatmul.mubr.msk.f32.vlgmr.msra.gmra.mrb[130].mxu1 %vm59_vm2, %v17610_v60  ;;  %15266 = vmatprep.subr.mxu1 %v15751_v6  ;;  %v17626_v40 = vadd.f32 %v3738_v23, %v17484_v49  ;;  %v15060_v18 = vpop.f32.mrb[49].mxu1 }
 0x1c8   :  { %15267 = vmatpush3.msk.msra.mxu1 %vm63_vm1, %v17620_v36  ;;  %15268 = vmatprep.mubr.msk.f32.mxu1 %vm15755_vm3, %v15751_v6 }
 0x1c9   :  { %v9008_v44 = vpop.permute.xlu0 %9007  ;;  %15271 = vmatprep.subr.mxu1 %v15751_v6 }
 0x1ca   :  { %v9013_v34 = vsel %vm8854_vm9, %v9008_v44, %v9010_v3  ;;  %v3923_v50 = vpop.f32.mrb[50].mxu1 }
 0x1cb   :  { %v9163_v27 = vpop.permute.xlu1 %9162  ;;  %14110 = vmatpush1.msk.msra.mxu0 %vm63_vm1, %v9013_v34  ;;  %15269 = vmatmul.mubr.msk.f32.vlgmr.msra.gmra.mrb[132].mxu1 %vm59_vm2, %v17610_v60  ;;  %v17638_v49 = vadd.f32 %v3923_v50, %v17504_v25  ;;  %v15065_v61 = vpop.f32.mrb[51].mxu1 }
 0x1cc   :  { %14111 = vmatmul.mubr.msk.f32.vlgmr.msra.gmra.mrb[0].mxu0 %vm59_vm2, %v17424_v55  ;;  %15273 = vmatprep.mubr.msk.f32.mxu1 %vm15755_vm3, %v15751_v6 }
 0x1cd   :  { %v9165_v14 = vpop.permute.xlu0 %9164  ;;  %9240 = vmatprep.mubr.f32.mxu0 %v15751_v6 }
 0x1ce   :  { %v9168_v31 = vsel %vm8854_vm9, %v9163_v27, %v9165_v14  ;;  %v9169_v11 = vsel %vm8854_vm9, %v9165_v14, %v17479_v24 }
 0x1cf   :  { %v9320_v1 = vpop.permute.xlu1 %9319  ;;  %14114 = vmatprep.subr.msk.mxu0 %vm63_vm1, %v9169_v11  ;;  %v4078_v25 = vpop.f32.mrb[52].mxu1 }
 0x1d0   :  { %v9324_v35 = vsel %vm8854_vm9, %v9320_v1, %v17492_v59  ;;  %14115 = vmatpush1.msk.msra.mxu0 %vm63_vm1, %v9168_v31  ;;  %v17653_v41 = vadd.f32 %v4078_v25, %v17518_v8  ;;  %v15070_v30 = vpop.f32.mrb[53].mxu1 }
 0x1d1   :  { %14119 = vmatprep.subr.msk.mxu0 %vm63_vm1, %v9324_v35  ;;  %v17656_v2 = vpop.permute.xlu0 %10436  ;;  %14116 = vmatmul.mubr.msk.f32.vlgmr.msra.gmra.mrb[2].mxu0 %vm59_vm2, %v17424_v55 }
 0x1d2   :  { %15272 = vmatpush3.msk.msra.mxu1 %vm63_vm1, %v17656_v2  ;;  %9395 = vmatprep.mubr.f32.mxu0 %v15751_v6 }
 0x1d3   :  { %v17663_v24 = vpop.permute.xlu1 %10591  ;;  %15274 = vmatmul.mubr.msk.f32.vlgmr.msra.gmra.mrb[134].mxu1 %vm59_vm2, %v17610_v60  ;;  %15276 = vmatprep.subr.mxu1 %v15751_v6 }
 0x1d4   :  { %15277 = vmatpush3.msk.msra.mxu1 %vm63_vm1, %v17663_v24  ;;  %15278 = vmatprep.mubr.msk.f32.mxu1 %vm15755_vm3, %v15751_v6  ;;  %v4233_v59 = vpop.f32.mrb[54].mxu1 }
 0x1d5   :  { %v9318_v8 = vpop.permute.xlu0 %9317  ;;  %v17673_v13 = vadd.f32 %v4233_v59, %v17538_v51  ;;  %v15075_v0 = vpop.f32.mrb[55].mxu1  ;;  %15281 = vmatprep.subr.mxu1 %v15751_v6 }
 0x1d6   :  { %v9323_v9 = vsel %vm8854_vm9, %v9318_v8, %v9320_v1 }
 0x1d7   :  { %v9473_v15 = vpop.permute.xlu1 %9472  ;;  %14120 = vmatpush1.msk.msra.mxu0 %vm63_vm1, %v9323_v9  ;;  %15279 = vmatmul.mubr.msk.f32.vlgmr.msra.gmra.mrb[136].mxu1 %vm59_vm2, %v17610_v60 }
 0x1d8   :  { %v4388_v10 = vpop.f32.mrb[56].mxu1  ;;  %14121 = vmatmul.mubr.msk.f32.vlgmr.msra.gmra.mrb[4].mxu0 %vm59_vm2, %v17424_v55  ;;  %15283 = vmatprep.mubr.msk.f32.mxu1 %vm15755_vm3, %v15751_v6 }
 0x1d9   :  { %v9475_v51 = vpop.permute.xlu0 %9474  ;;  %v17685_v52 = vadd.f32 %v4388_v10, %v17554_v62  ;;  %v15080_v7 = vpop.f32.mrb[57].mxu1  ;;  %9550 = vmatprep.mubr.f32.mxu0 %v15751_v6 }
 0x1da   :  { %v9478_v17 = vsel %vm8854_vm9, %v9473_v15, %v9475_v51  ;;  %v9479_v32 = vsel %vm8854_vm9, %v9475_v51, %v17525_v37 }
 0x1db   :  { %v9630_v53 = vpop.permute.xlu1 %9629  ;;  %14124 = vmatprep.subr.msk.mxu0 %vm63_vm1, %v9479_v32 }
 0x1dc   :  { %v9634_v58 = vsel %vm8854_vm9, %v9630_v53, %v17532_v45  ;;  %14125 = vmatpush1.msk.msra.mxu0 %vm63_vm1, %v9478_v17  ;;  %v4543_v54 = vpop.f32.mrb[58].mxu1 }
 0x1dd   :  { %14129 = vmatprep.subr.msk.mxu0 %vm63_vm1, %v9634_v58  ;;  %v17696_v62 = vpop.permute.xlu0 %10746  ;;  %v17699_v38 = vadd.f32 %v4543_v54, %v17565_v46  ;;  %v15085_v19 = vpop.f32.mrb[59].mxu1  ;;  %14126 = vmatmul.mubr.msk.f32.vlgmr.msra.gmra.mrb[6].mxu0 %vm59_vm2, %v17424_v55 }
 0x1de   :  { %15282 = vmatpush3.msk.msra.mxu1 %vm63_vm1, %v17696_v62  ;;  %9705 = vmatprep.mubr.f32.mxu0 %v15751_v6 }
 0x1df   :  { %v17706_v37 = vpop.permute.xlu1 %10901  ;;  %15284 = vmatmul.mubr.msk.f32.vlgmr.msra.gmra.mrb[138].mxu1 %vm59_vm2, %v17610_v60  ;;  %15286 = vmatprep.subr.mxu1 %v15751_v6 }
 0x1e0   :  { %15287 = vmatpush3.msk.msra.mxu1 %vm63_vm1, %v17706_v37  ;;  %15288 = vmatprep.mubr.msk.f32.mxu1 %vm15755_vm3, %v15751_v6 }
 0x1e1   :  { %v9628_v45 = vpop.permute.xlu0 %9627  ;;  %v4698_v46 = vpop.f32.mrb[60].mxu1  ;;  %15291 = vmatprep.subr.mxu1 %v15751_v6 }
 0x1e2   :  { %v9633_v29 = vsel %vm8854_vm9, %v9628_v45, %v9630_v53  ;;  %v17718_v56 = vadd.f32 %v4698_v46, %v17585_v21  ;;  %v15090_v63 = vpop.f32.mrb[61].mxu1 }
 0x1e3   :  { %v9783_v26 = vpop.permute.xlu1 %9782  ;;  %14130 = vmatpush1.msk.msra.mxu0 %vm63_vm1, %v9633_v29  ;;  %15289 = vmatmul.mubr.msk.f32.vlgmr.msra.gmra.mrb[140].mxu1 %vm59_vm2, %v17610_v60 }
 0x1e4   :  { %14131 = vmatmul.mubr.msk.f32.vlgmr.msra.gmra.mrb[8].mxu0 %vm59_vm2, %v17424_v55  ;;  %15293 = vmatprep.mubr.msk.f32.mxu1 %vm15755_vm3, %v15751_v6 }
 0x1e5   :  { %v9785_v4 = vpop.permute.xlu0 %9784  ;;  %v4853_v33 = vpop.f32.mrb[62].mxu1  ;;  %9860 = vmatprep.mubr.f32.mxu0 %v15751_v6 }
 0x1e6   :  { %v9788_v21 = vsel %vm8854_vm9, %v9783_v26, %v9785_v4  ;;  %v9789_v48 = vsel %vm8854_vm9, %v9785_v4, %v17568_v16  ;;  %v17732_v39 = vadd.f32 %v4853_v33, %v17601_v57  ;;  %v15095_v47 = vpop.f32.mrb[63].mxu1 }
 0x1e7   :  { %v9940_v5 = vpop.permute.xlu1 %9939  ;;  %14134 = vmatprep.subr.msk.mxu0 %vm63_vm1, %v9789_v48 }
 0x1e8   :  { %v9944_v20 = vsel %vm8854_vm9, %v9940_v5, %v17575_v12  ;;  %14135 = vmatpush1.msk.msra.mxu0 %vm63_vm1, %v9788_v21 }
 0x1e9   :  { %14139 = vmatprep.subr.msk.mxu0 %vm63_vm1, %v9944_v20  ;;  %v17739_v3 = vpop.permute.xlu0 %11056  ;;  %v5008_v28 = vpop.f32.mrb[64].mxu1  ;;  %14136 = vmatmul.mubr.msk.f32.vlgmr.msra.gmra.mrb[10].mxu0 %vm59_vm2, %v17424_v55 }
 0x1ea   :  { %15292 = vmatpush3.msk.msra.mxu1 %vm63_vm1, %v17739_v3  ;;  %v17746_v16 = vadd.f32 %v5008_v28, %v17626_v40  ;;  %v15100_v57 = vpop.f32.mrb[65].mxu1  ;;  %10015 = vmatprep.mubr.f32.mxu0 %v15751_v6 }
 0x1eb   :  { %15294 = vmatmul.mubr.msk.f32.vlgmr.msra.gmra.mrb[142].mxu1 %vm59_vm2, %v17610_v60  ;;  %v17751_v12 = vpop.permute.xlu1 %11211  ;;  %15296 = vmatprep.subr.mxu1 %v15751_v6 }
 0x1ec   :  { %15297 = vmatpush3.msk.msra.mxu1 %vm63_vm1, %v17751_v12  ;;  %15298 = vmatprep.mubr.msk.f32.mxu1 %vm15755_vm3, %v15751_v6 }
 0x1ed   :  { %v9938_v23 = vpop.permute.xlu0 %9937  ;;  %15301 = vmatprep.subr.bf16.mxu1 %v15751_v6 }
 0x1ee   :  { %v9943_v40 = vsel %vm8854_vm9, %v9938_v23, %v9940_v5  ;;  %v5193_v18 = vpop.f32.mrb[66].mxu1 }
 0x1ef   :  { %14140 = vmatpush1.msk.msra.mxu0 %vm63_vm1, %v9943_v40  ;;  %15299 = vmatmul.mubr.msk.f32.vlgmr.msra.gmra.mrb[144].mxu1 %vm59_vm2, %v17610_v60  ;;  %v17764_v44 = vadd.f32 %v5193_v18, %v17638_v49  ;;  %v10119_v34 = vpop.permute.xlu1 %10118  ;;  %v15105_v50 = vpop.f32.mrb[67].mxu1 }
 0x1f0   :  { %14141 = vmatmul.mubr.msk.f32.vlgmr.msra.gmra.mrb[12].mxu0 %vm59_vm2, %v17424_v55  ;;  %15305 = vmatprep.mubr.msk.bf16.mxu1 %vm15755_vm3, %v15751_v6 }
 0x1f1   :  { %v10121_v27 = vpop.permute.xlu0 %10120  ;;  %10200 = vmatprep.mubr.f32.mxu0 %v15751_v6 }
 0x1f2   :  { %v10125_v61 = vsel %vm10124_vm10, %v10119_v34, %v10121_v27  ;;  %v10126_v14 = vsel %vm10124_vm10, %v10121_v27, %v17613_v42  ;;  %v5348_v31 = vpop.f32.mrb[68].mxu1 }
 0x1f3   :  { %14145 = vmatprep.subr.msk.mxu0 %vm63_vm1, %v10126_v14  ;;  %v17776_v49 = vadd.f32 %v5348_v31, %v17653_v41  ;;  %v10278_v11 = vpop.permute.xlu1 %10277  ;;  %v15110_v1 = vpop.f32.mrb[69].mxu1 }
 0x1f4   :  { %14146 = vmatpush1.msk.msra.mxu0 %vm63_vm1, %v10125_v61 }
 0x1f5   :  { %14147 = vmatmul.mubr.msk.f32.vlgmr.msra.gmra.mrb[14].mxu0 %vm59_vm2, %v17610_v60  ;;  %v10280_v55 = vpop.permute.xlu0 %10279 }
 0x1f6   :  { %v10283_v25 = vsel %vm10124_vm10, %v10278_v11, %v10280_v55  ;;  %v10284_v35 = vsel %vm10124_vm10, %v10280_v55, %v17620_v36  ;;  %v5503_v42 = vpop.f32.mrb[70].mxu1  ;;  %10355 = vmatprep.mubr.f32.mxu0 %v15751_v6 }
 0x1f7   :  { %14150 = vmatprep.subr.msk.mxu0 %vm63_vm1, %v10284_v35  ;;  %v17787_v41 = vadd.f32 %v5503_v42, %v17673_v13  ;;  %v10433_v30 = vpop.permute.xlu1 %10432  ;;  %v15115_v59 = vpop.f32.mrb[71].mxu1 }
 0x1f8   :  { %14151 = vmatpush1.msk.msra.mxu0 %vm63_vm1, %v10283_v25 }
 0x1f9   :  { %14152 = vmatmul.mubr.msk.f32.vlgmr.msra.gmra.mrb[0].mxu0 %vm59_vm2, %v17610_v60  ;;  %v10435_v8 = vpop.permute.xlu0 %10434 }
 0x1fa   :  { %v10438_v0 = vsel %vm10124_vm10, %v10433_v30, %v10435_v8  ;;  %v10439_v36 = vsel %vm10124_vm10, %v10435_v8, %v17656_v2  ;;  %10510 = vmatprep.mubr.f32.mxu0 %v15751_v6 }
 0x1fb   :  { %14155 = vmatprep.subr.msk.mxu0 %vm63_vm1, %v10439_v36  ;;  %v5658_v9 = vpop.f32.mrb[72].mxu1  ;;  %v10588_v13 = vpop.permute.xlu1 %10587 }
 0x1fc   :  { %v17798_v15 = vadd.f32 %v5658_v9, %v17685_v52  ;;  %14156 = vmatpush1.msk.msra.mxu0 %vm63_vm1, %v10438_v0  ;;  %v15120_v10 = vpop.f32.mrb[73].mxu1 }
 0x1fd   :  { %14157 = vmatmul.mubr.msk.f32.vlgmr.msra.gmra.mrb[2].mxu0 %vm59_vm2, %v17610_v60  ;;  %v10590_v51 = vpop.permute.xlu0 %10589 }
 0x1fe   :  { %v10593_v7 = vsel %vm10124_vm10, %v10588_v13, %v10590_v51  ;;  %v10594_v2 = vsel %vm10124_vm10, %v10590_v51, %v17663_v24  ;;  %10665 = vmatprep.mubr.f32.mxu0 %v15751_v6 }
 0x1ff   :  { %14160 = vmatprep.subr.msk.mxu0 %vm63_vm1, %v10594_v2  ;;  %v5813_v17 = vpop.f32.mrb[74].mxu1  ;;  %v10743_v32 = vpop.permute.xlu1 %10742 }
 0x200   :  { %v6296_v52 = vadd.f32 %v5813_v17, %v17699_v38  ;;  %14161 = vmatpush1.msk.msra.mxu0 %vm63_vm1, %v10593_v7  ;;  %v15125_v53 = vpop.f32.mrb[75].mxu1 }
 0x201   :  { %14162 = vmatmul.mubr.msk.f32.vlgmr.msra.gmra.mrb[4].mxu0 %vm59_vm2, %v17610_v60  ;;  %v10745_v58 = vpop.permute.xlu0 %10744  ;;  %v15559_v53 = vld [vmem:[%s18822_s3 + $0x80] sm:$0xff]  }
 0x202   :  { %v10748_v54 = vsel %vm10124_vm10, %v10743_v32, %v10745_v58  ;;  %v10749_v24 = vsel %vm10124_vm10, %v10745_v58, %v17696_v62  ;;  %10820 = vmatprep.mubr.f32.mxu0 %v15751_v6  ;;  %15302 = vmatpush3.bf16.msra.mxu1 %v15559_v53 }
 0x203   :  { %14165 = vmatprep.subr.msk.mxu0 %vm63_vm1, %v10749_v24  ;;  %v5968_v19 = vpop.f32.mrb[76].mxu1  ;;  %v10898_v45 = vpop.permute.xlu1 %10897  ;;  %15303 = vmatprep.subr.bf16.mxu1 %v15751_v6 }
 0x204   :  { %v6299_v38 = vadd.f32 %v5968_v19, %v17718_v56  ;;  %14166 = vmatpush1.msk.msra.mxu0 %vm63_vm1, %v10748_v54  ;;  %v15130_v46 = vpop.f32.mrb[77].mxu1  ;;  %v15560_v19 = vld [vmem:[%s18822_s3 + $0x88] sm:$0xff]  }
 0x205   :  { %14167 = vmatmul.mubr.msk.f32.vlgmr.msra.gmra.mrb[6].mxu0 %vm59_vm2, %v17610_v60  ;;  %v10900_v29 = vpop.permute.xlu0 %10899 }
 0x206   :  { %v10903_v63 = vsel %vm10124_vm10, %v10898_v45, %v10900_v29  ;;  %v10904_v62 = vsel %vm10124_vm10, %v10900_v29, %v17706_v37  ;;  %10975 = vmatprep.mubr.f32.mxu0 %v15751_v6  ;;  %15304 = vmatpush3.bf16.msra.mxu1 %v15560_v19  ;;  %v15561_v29 = vld [vmem:[%s18822_s3 + $0x40] sm:$0xff]  }
 0x207   :  { %14170 = vmatprep.subr.msk.mxu0 %vm63_vm1, %v10904_v62  ;;  %v11053_v26 = vpop.permute.xlu1 %11052  ;;  %v15563_v62 = vld [vmem:[%s18822_s3 + $0xd0] sm:$0xff]  }
 0x208   :  { %v6123_v4 = vpop.f32.mrb[78].mxu1  ;;  %14171 = vmatpush1.msk.msra.mxu0 %vm63_vm1, %v10903_v63  ;;  %v15562_v63 = vld [vmem:[%s18822_s3] sm:$0xff]   ;;  %14763 = vmatprep.subr.bf16.mxu1 %v15563_v62 }
 0x209   :  { %v6302_v56 = vadd.f32 %v6123_v4, %v17732_v39  ;;  %14172 = vmatmul.mubr.msk.f32.vlgmr.msra.gmra.mrb[8].mxu0 %vm59_vm2, %v17610_v60  ;;  %v11055_v33 = vpop.permute.xlu0 %11054  ;;  %v15135_v21 = vpop.f32.mrb[79].mxu1  ;;  %v15566_v4 = vld [vmem:[%s18822_s3 + $0x8] sm:$0xff]  }
 0x20a   :  { %v11058_v48 = vsel %vm10124_vm10, %v11053_v26, %v11055_v33  ;;  %v11059_v37 = vsel %vm10124_vm10, %v11055_v33, %v17739_v3  ;;  %11130 = vmatprep.mubr.f32.mxu0 %v15751_v6  ;;  %v15565_v26 = vld [vmem:[%s18822_s3 + $0x48] sm:$0xff]   ;;  %v15569_v33 = vld [vmem:[%s18822_s3 + $0x50] sm:$0xff]  }
 0x20b   :  { %14175 = vmatprep.subr.msk.mxu0 %vm63_vm1, %v11059_v37  ;;  %v11208_v47 = vpop.permute.xlu1 %11207  ;;  %v15570_v37 = vld [vmem:[%s18822_s3 + $0x10] sm:$0xff]  }
 0x20c   :  { %v6278_v5 = vpop.f32.mrb[80].mxu1  ;;  %14176 = vmatpush1.msk.msra.mxu0 %vm63_vm1, %v11058_v48 }
 0x20d   :  { %v6305_v39 = vadd.f32 %v6278_v5, %v17746_v16  ;;  %14177 = vmatmul.mubr.msk.f32.vlgmr.msra.gmra.mrb[10].mxu0 %vm59_vm2, %v17610_v60  ;;  %v11210_v20 = vpop.permute.xlu0 %11209  ;;  %v15140_v28 = vpop.f32.mrb[81].mxu1 }
 0x20e   :  { %v11213_v57 = vsel %vm10124_vm10, %v11208_v47, %v11210_v20  ;;  %v11214_v3 = vsel %vm10124_vm10, %v11210_v20, %v17751_v12  ;;  %11285 = vmatprep.mubr.f32.mxu0 %v15751_v6  ;;  %v15573_v47 = vld [vmem:[%s18822_s3 + $0x58] sm:$0xff]  }
 0x20f   :  { %14180 = vmatprep.subr.msk.mxu0 %vm63_vm1, %v11214_v3  ;;  %v15578_v3 = vld [vmem:[%s18822_s3 + $0x20] sm:$0xff]  }
 0x210   :  { %v6463_v23 = vpop.f32.mrb[82].mxu1  ;;  %14181 = vmatpush1.msk.msra.mxu0 %vm63_vm1, %v11213_v57  ;;  %v15577_v57 = vld [vmem:[%s18822_s3 + $0x60] sm:$0xff]   ;;  %vm11574_vm1 = vcmask 1047559  }
 0x211   :  { %v7554_v40 = vadd.f32 %v6463_v23, %v17764_v44  ;;  %14182 = vmatmul.mubr.msk.f32.vlgmr.msra.gmra.mrb[12].mxu0 %vm59_vm2, %v17610_v60  ;;  %v15145_v16 = vpop.f32.mrb[83].mxu1  ;;  %14738 = vmatprep.subr.bf16.mxu0 %v15561_v29  ;;  %v15581_v23 = vld [vmem:[%s18822_s3 + $0x68] sm:$0xff]   ;;  %vm11717_vm2 = vcmask 261120  }
 0x212   :  { %14739 = vmatpush3.bf16.msra.mxu0 %v15562_v63  ;;  %v15582_v16 = vld [vmem:[%s18822_s3 + $0x28] sm:$0xff]  }
 0x213   :  { %14740 = vmatprep.subr.bf16.mxu0 %v15565_v26 }
 0x215   :  { %v6618_v18 = vpop.f32.mrb[84].mxu1 }
 0x216   :  { %v7557_v34 = vadd.f32 %v6618_v18, %v17776_v49  ;;  %v15150_v50 = vpop.f32.mrb[85].mxu1  ;;  %14741 = vmatpush3.bf16.msra.mxu0 %v15566_v4 }
 0x217   :  { %14742 = vmatprep.subr.bf16.mxu0 %v15569_v33  ;;  %v15585_v50 = vld [vmem:[%s18822_s3 + $0x70] sm:$0xff]  }
 0x219   :  { %v6773_v27 = vpop.f32.mrb[86].mxu1 }
 0x21a   :  { %v7560_v12 = vadd.f32 %v6773_v27, %v17787_v41  ;;  %v15155_v61 = vpop.f32.mrb[87].mxu1  ;;  %14743 = vmatpush3.bf16.msra.mxu0 %v15570_v37 }
 0x21b   :  { %14744 = vmatprep.subr.bf16.mxu0 %v15573_v47 }
 0x21d   :  { %v6928_v14 = vpop.f32.mrb[88].mxu1 }
 0x21e   :  { %v7563_v31 = vadd.f32 %v6928_v14, %v17798_v15  ;;  %v15160_v11 = vpop.f32.mrb[89].mxu1 }
 0x21f   :  { %v15590_v11 = vld [vmem:[%s18822_s3 + $0x38] sm:$0xff]  }
 0x222   :  { %v7083_v1 = vpop.f32.mrb[90].mxu1 }
 0x223   :  { %v7566_v55 = vadd.f32 %v7083_v1, %v6296_v52  ;;  %v15165_v25 = vpop.f32.mrb[91].mxu1  ;;  %v15593_v1 = vld [vmem:[%s18822_s3 + $0x160] sm:$0xff]  }
 0x227   :  { %v7238_v44 = vpop.f32.mrb[92].mxu1 }
 0x228   :  { %v7569_v35 = vadd.f32 %v7238_v44, %v6299_v38  ;;  %v15170_v42 = vpop.f32.mrb[93].mxu1 }
 0x22d   :  { %v7393_v60 = vpop.f32.mrb[94].mxu1 }
 0x22e   :  { %v7572_v30 = vadd.f32 %v7393_v60, %v6302_v56  ;;  %v15175_v59 = vpop.f32.mrb[95].mxu1 }
 0x231   :  { %v7548_v8 = vpop.f32.mrb[96].mxu1 }
 0x232   :  { %v7575_v49 = vadd.f32 %v7548_v8, %v6305_v39  ;;  %v15180_v0 = vpop.f32.mrb[97].mxu1  ;;  %v15574_v39 = vld [vmem:[%s18822_s3 + $0x18] sm:$0xff]  }
 0x233   :  { %14745 = vmatpush3.bf16.msra.mxu0 %v15574_v39 }
 0x234   :  { %14746 = vmatprep.subr.bf16.mxu0 %v15577_v57 }
 0x237   :  { %14747 = vmatpush3.bf16.msra.mxu0 %v15578_v3 }
 0x238   :  { %v7733_v36 = vpop.f32.mrb[98].mxu1  ;;  %14748 = vmatprep.subr.bf16.mxu0 %v15581_v23 }
 0x239   :  { %v8824_v9 = vadd.f32 %v7733_v36, %v7554_v40  ;;  %v15185_v41 = vpop.f32.mrb[99].mxu1 }
 0x23b   :  { %14749 = vmatpush3.bf16.msra.mxu0 %v15582_v16 }
 0x23c   :  { %14750 = vmatprep.subr.bf16.mxu0 %v15585_v50 }
 0x23d   :  { %v7888_v13 = vpop.f32.mrb[100].mxu1 }
 0x23e   :  { %v8827_v10 = vadd.f32 %v7888_v13, %v7557_v34  ;;  %v15190_v51 = vpop.f32.mrb[101].mxu1 }
 0x242   :  { %v8043_v15 = vpop.f32.mrb[102].mxu1 }
 0x243   :  { %v17851_v7 = vadd.f32 %v8043_v15, %v7560_v12  ;;  %v15195_v2 = vpop.f32.mrb[103].mxu1  ;;  %v15586_v12 = vld [vmem:[%s18822_s3 + $0x30] sm:$0xff]  }
 0x244   :  { %14751 = vmatpush3.bf16.msra.mxu0 %v15586_v12  ;;  %v17926_v2 = vpop.permute.xlu0 %11389 }
 0x247   :  { %v8198_v17 = vpop.f32.mrb[104].mxu1 }
 0x248   :  { %v17853_v32 = vadd.f32 %v8198_v17, %v7563_v31  ;;  %v15200_v52 = vpop.f32.mrb[105].mxu1  ;;  %v15589_v31 = vld [vmem:[%s18822_s3 + $0x78] sm:$0xff]  }
 0x249   :  { %14752 = vmatprep.subr.bf16.mxu0 %v15589_v31 }
 0x24a   :  { %14753 = vmatpush3.bf16.msra.mxu0 %v15590_v11 }
 0x24b   :  { %14788 = vmatprep.subr.bf16.mxu0 %v15593_v1 }
 0x24d   :  { %v8353_v58 = vpop.f32.mrb[106].mxu1 }
 0x24e   :  { %v8836_v54 = vadd.f32 %v8353_v58, %v7566_v55  ;;  %v15205_v24 = vpop.f32.mrb[107].mxu1 }
 0x251   :  { %v8508_v45 = vpop.f32.mrb[108].mxu1 }
 0x252   :  { %v8839_v38 = vadd.f32 %v8508_v45, %v7569_v35  ;;  %v15210_v46 = vpop.f32.mrb[109].mxu1 }
 0x25a   :  { %v8663_v56 = vpop.f32.mrb[110].mxu1 }
 0x25b   :  { %v8842_v21 = vadd.f32 %v8663_v56, %v7572_v30  ;;  %v15215_v48 = vpop.f32.mrb[111].mxu1 }
 0x25f   :  { %v8818_v5 = vpop.f32.mrb[112].mxu1 }
 0x260   :  { %v8845_v20 = vadd.f32 %v8818_v5, %v7575_v49  ;;  %v15220_v28 = vpop.f32.mrb[113].mxu1 }
 0x267   :  { %v9003_v40 = vpop.f32.mrb[114].mxu1 }
 0x268   :  { %v10094_v18 = vadd.f32 %v9003_v40, %v8824_v9  ;;  %v15225_v34 = vpop.f32.mrb[115].mxu1 }
 0x26b   :  { %v9158_v27 = vpop.f32.mrb[116].mxu1 }
 0x26c   :  { %v10097_v61 = vadd.f32 %v9158_v27, %v8827_v10  ;;  %v15230_v14 = vpop.f32.mrb[117].mxu1 }
 0x274   :  { %v9313_v55 = vpop.f32.mrb[118].mxu1 }
 0x275   :  { %v10100_v25 = vadd.f32 %v9313_v55, %v17851_v7  ;;  %v15235_v44 = vpop.f32.mrb[119].mxu1 }
 0x278   :  { %v9468_v35 = vpop.f32.mrb[120].mxu1 }
 0x279   :  { %v10103_v42 = vadd.f32 %v9468_v35, %v17853_v32  ;;  %v15240_v60 = vpop.f32.mrb[121].mxu1 }
 0x281   :  { %v9623_v30 = vpop.f32.mrb[122].mxu1 }
 0x282   :  { %v17918_v59 = vadd.f32 %v9623_v30, %v8836_v54  ;;  %v15245_v8 = vpop.f32.mrb[123].mxu1 }
 0x285   :  { %v9778_v49 = vpop.f32.mrb[124].mxu1 }
 0x286   :  { %v17920_v0 = vadd.f32 %v9778_v49, %v8839_v38  ;;  %v15250_v36 = vpop.f32.mrb[125].mxu1 }
 0x28e   :  { %v9933_v9 = vpop.f32.mrb[126].mxu1 }
 0x28f   :  { %v17922_v41 = vadd.f32 %v9933_v9, %v8842_v21  ;;  %v15255_v13 = vpop.f32.mrb[127].mxu1 }
 0x292   :  { %v10088_v10 = vpop.f32.mrb[128].mxu1 }
 0x293   :  { %v17924_v51 = vadd.f32 %v10088_v10, %v8845_v20  ;;  %v15260_v15 = vpop.f32.mrb[129].mxu1 }
 0x29a   :  { %v10273_v7 = vpop.f32.mrb[130].mxu1 }
 0x29b   :  { %v11364_v17 = vadd.f32 %v10273_v7, %v10094_v18  ;;  %v15265_v32 = vpop.f32.mrb[131].mxu1 }
 0x29d   :  { %v11394_v52 = vadd.f32 %v17926_v2, %v11364_v17 }
 0x29e   :  { %v10428_v53 = vpop.f32.mrb[132].mxu1 }
 0x29f   :  { %v11367_v58 = vadd.f32 %v10428_v53, %v10097_v61  ;;  %v15270_v54 = vpop.f32.mrb[133].mxu1  ;;  %v11418_v24 = vmax.f32 %v11394_v52, 0.0 }
 0x2a1   :  { %v11397_v19 = vadd.f32 %v17926_v2, %v11367_v58  ;;  %v11442_v45 = vpack.c.bf16 %v11418_v24, %v11418_v24 }
 0x2a3   :  { %v11421_v38 = vmax.f32 %v11397_v19, 0.0  ;;  %v11533_v46 = vunpack.c.l.b16 %v11442_v45 }
 0x2a5   :  { %v11445_v29 = vpack.c.bf16 %v11421_v38, %v11421_v38  ;;  %v11867_v56 = vrot.slane %v11533_v46, 1  ;;  %v12143_v33 = vrot.slane %v11533_v46, 2  ;;  %v12419_v21 = vrot.slane %v11533_v46, 3 }
 0x2a6   :  { %v10583_v63 = vpop.f32.mrb[134].mxu1  ;;  %v12695_v48 = vrot.slane %v11533_v46, 4  ;;  %v12971_v37 = vrot.slane %v11533_v46, 5  ;;  %v13247_v40 = vrot.slane %v11533_v46, 6  ;;  %v13523_v55 = vrot.slane %v11533_v46, 7 }
 0x2a7   :  { %v11536_v62 = vunpack.c.l.b16 %v11445_v29  ;;  %v11370_v26 = vadd.f32 %v10583_v63, %v10100_v25  ;;  %v15275_v4 = vpop.f32.mrb[135].mxu1 }
 0x2a9   :  { %v11400_v47 = vadd.f32 %v17926_v2, %v11370_v26  ;;  %v11590_v5 = vrot.slane %v11536_v62, 7  ;;  %v11868_v39 = vsel %vm11556_vm11, %v11536_v62, %v11867_v56  ;;  %v12144_v20 = vrot.slane %v11536_v62, 1 }
 0x2aa   :  { %v10738_v28 = vpop.f32.mrb[136].mxu1  ;;  %v12420_v57 = vrot.slane %v11536_v62, 2  ;;  %v12696_v3 = vrot.slane %v11536_v62, 3  ;;  %v12972_v23 = vrot.slane %v11536_v62, 4  ;;  %v13248_v31 = vrot.slane %v11536_v62, 5 }
 0x2ab   :  { %v11424_v16 = vmax.f32 %v11400_v47, 0.0  ;;  %v11373_v18 = vadd.f32 %v10738_v28, %v10103_v42  ;;  %v15280_v34 = vpop.f32.mrb[137].mxu1  ;;  %v11591_v50 = vsel %vm11556_vm11, %v11590_v5, %v11533_v46  ;;  %v12145_v27 = vsel %vm11556_vm11, %v12144_v20, %v12143_v33 }
 0x2ac   :  { %v12421_v12 = vsel %vm11556_vm11, %v12420_v57, %v12419_v21  ;;  %v12697_v61 = vsel %vm11556_vm11, %v12696_v3, %v12695_v48  ;;  %v12973_v14 = vsel %vm11556_vm11, %v12972_v23, %v12971_v37  ;;  %v13524_v25 = vrot.slane %v11536_v62, 6 }
 0x2ad   :  { %v11448_v11 = vpack.c.bf16 %v11424_v16, %v11424_v16  ;;  %v11403_v1 = vadd.f32 %v17926_v2, %v11373_v18  ;;  %v13249_v44 = vsel %vm11556_vm11, %v13248_v31, %v13247_v40 }
 0x2ae   :  { %v13525_v60 = vsel %vm11556_vm11, %v13524_v25, %v13523_v55 }
 0x2af   :  { %v11539_v35 = vunpack.c.l.b16 %v11448_v11  ;;  %v11427_v42 = vmax.f32 %v11403_v1, 0.0 }
 0x2b1   :  { %v11451_v30 = vpack.c.bf16 %v11427_v42, %v11427_v42  ;;  %v11592_v8 = vrot.slane %v11539_v35, 6  ;;  %v11869_v49 = vrot.slane %v11539_v35, 7  ;;  %v12146_v36 = vsel %vm11559_vm12, %v11539_v35, %v12145_v27 }
 0x2b2   :  { %v10893_v9 = vpop.f32.mrb[138].mxu1  ;;  %v12422_v13 = vrot.slane %v11539_v35, 1  ;;  %v12698_v10 = vrot.slane %v11539_v35, 2  ;;  %v12974_v15 = vrot.slane %v11539_v35, 3  ;;  %v13250_v7 = vrot.slane %v11539_v35, 4 }
 0x2b3   :  { %v11542_v17 = vunpack.c.l.b16 %v11451_v30  ;;  %v11376_v32 = vadd.f32 %v10893_v9, %v17918_v59  ;;  %v15285_v52 = vpop.f32.mrb[139].mxu1  ;;  %v11593_v53 = vsel %vm11559_vm12, %v11592_v8, %v11591_v50  ;;  %v11870_v58 = vsel %vm11559_vm12, %v11869_v49, %v11868_v39 }
 0x2b4   :  { %v12423_v54 = vsel %vm11559_vm12, %v12422_v13, %v12421_v12  ;;  %v12699_v24 = vsel %vm11559_vm12, %v12698_v10, %v12697_v61  ;;  %v12975_v19 = vsel %vm11559_vm12, %v12974_v15, %v12973_v14  ;;  %v13251_v45 = vsel %vm11559_vm12, %v13250_v7, %v13249_v44 }
 0x2b5   :  { %v11406_v38 = vadd.f32 %v17926_v2, %v11376_v32  ;;  %v11594_v46 = vrot.slane %v11542_v17, 5  ;;  %v11871_v29 = vrot.slane %v11542_v17, 6  ;;  %v12147_v63 = vrot.slane %v11542_v17, 7 }
 0x2b6   :  { %v11048_v62 = vpop.f32.mrb[140].mxu1  ;;  %v12424_v59 = vsel %vm11562_vm13, %v11542_v17, %v12423_v54  ;;  %v12700_v26 = vrot.slane %v11542_v17, 1  ;;  %v12976_v4 = vrot.slane %v11542_v17, 2  ;;  %v13252_v56 = vrot.slane %v11542_v17, 3 }
 0x2b7   :  { %v11430_v33 = vmax.f32 %v11406_v38, 0.0  ;;  %v11379_v21 = vadd.f32 %v11048_v62, %v17920_v0  ;;  %v15290_v48 = vpop.f32.mrb[141].mxu1  ;;  %v11595_v37 = vsel %vm11562_vm13, %v11594_v46, %v11593_v53  ;;  %v11872_v47 = vsel %vm11562_vm13, %v11871_v29, %v11870_v58 }
 0x2b8   :  { %v12148_v5 = vsel %vm11562_vm13, %v12147_v63, %v12146_v36  ;;  %v12701_v39 = vsel %vm11562_vm13, %v12700_v26, %v12699_v24  ;;  %v12977_v20 = vsel %vm11562_vm13, %v12976_v4, %v12975_v19  ;;  %v13253_v28 = vsel %vm11562_vm13, %v13252_v56, %v13251_v45 }
 0x2b9   :  { %v11454_v57 = vpack.c.bf16 %v11430_v33, %v11430_v33  ;;  %v11409_v3 = vadd.f32 %v17926_v2, %v11379_v21  ;;  %v13526_v23 = vrot.slane %v11539_v35, 5  ;;  %v13528_v40 = vrot.slane %v11542_v17, 4 }
 0x2bb   :  { %v11545_v16 = vunpack.c.l.b16 %v11454_v57  ;;  %v11433_v0 = vmax.f32 %v11409_v3, 0.0  ;;  %v13527_v18 = vsel %vm11559_vm12, %v13526_v23, %v13525_v60 }
 0x2bc   :  { %v13529_v34 = vsel %vm11562_vm13, %v13528_v40, %v13527_v18 }
 0x2bd   :  { %v11457_v50 = vpack.c.bf16 %v11433_v0, %v11433_v0  ;;  %v11596_v27 = vrot.slane %v11545_v16, 4  ;;  %v11873_v12 = vrot.slane %v11545_v16, 5  ;;  %v12149_v61 = vrot.slane %v11545_v16, 6 }
 0x2be   :  { %v11203_v14 = vpop.f32.mrb[142].mxu1  ;;  %v12425_v31 = vrot.slane %v11545_v16, 7  ;;  %v12702_v11 = vsel %vm11565_vm14, %v11545_v16, %v12701_v39  ;;  %v12978_v1 = vrot.slane %v11545_v16, 1  ;;  %v13254_v55 = vrot.slane %v11545_v16, 2 }
 0x2bf   :  { %v11548_v25 = vunpack.c.l.b16 %v11457_v50  ;;  %v11382_v44 = vadd.f32 %v11203_v14, %v17922_v41  ;;  %v15295_v35 = vpop.f32.mrb[143].mxu1  ;;  %v11597_v42 = vsel %vm11565_vm14, %v11596_v27, %v11595_v37  ;;  %v11874_v60 = vsel %vm11565_vm14, %v11873_v12, %v11872_v47  ;;  %v15564_v14 = vld [vmem:[%s18822_s3 + $0x90] sm:$0xff]  }
 0x2c0   :  { %v12150_v30 = vsel %vm11565_vm14, %v12149_v61, %v12148_v5  ;;  %v12426_v8 = vsel %vm11565_vm14, %v12425_v31, %v12424_v59  ;;  %v12979_v49 = vsel %vm11565_vm14, %v12978_v1, %v12977_v20  ;;  %v13255_v36 = vsel %vm11565_vm14, %v13254_v55, %v13253_v28 }
 0x2c1   :  { %v11412_v9 = vadd.f32 %v17926_v2, %v11382_v44  ;;  %v11598_v13 = vrot.slane %v11548_v25, 3  ;;  %v11875_v10 = vrot.slane %v11548_v25, 4  ;;  %v12151_v15 = vrot.slane %v11548_v25, 5 }
 0x2c2   :  { %v11358_v7 = vpop.f32.mrb[144].mxu1  ;;  %v12427_v41 = vrot.slane %v11548_v25, 6  ;;  %v12703_v17 = vrot.slane %v11548_v25, 7  ;;  %v17970_v32 = vsel %vm11568_vm15, %v11548_v25, %v12979_v49  ;;  %v13256_v52 = vrot.slane %v11548_v25, 1 }
 0x2c3   :  { %v11436_v53 = vmax.f32 %v11412_v9, 0.0  ;;  %v11385_v58 = vadd.f32 %v11358_v7, %v17924_v51  ;;  %v15300_v54 = vpop.f32.mrb[145].mxu1  ;;  %v11599_v24 = vsel %vm11568_vm15, %v11598_v13, %v11597_v42  ;;  %v11876_v19 = vsel %vm11568_vm15, %v11875_v10, %v11874_v60  ;;  %v15568_v7 = vld [vmem:[%s18822_s3 + $0x98] sm:$0xff]  }
 0x2c4   :  { %v17976_v45 = vsel %vm11568_vm15, %v12151_v15, %v12150_v30  ;;  %v17979_v38 = vsel %vm11568_vm15, %v12427_v41, %v12426_v8  ;;  %v17982_v46 = vsel %vm11568_vm15, %v12703_v17, %v12702_v11  ;;  %v17985_v29 = vsel %vm11568_vm15, %v13256_v52, %v13255_v36  ;;  %v15571_v54 = vld [vmem:[%s18822_s3 + $0xe0] sm:$0xff]  }
 0x2c5   :  { %v11460_v63 = vpack.c.bf16 %v11436_v53, %v11436_v53  ;;  %v11415_v51 = vadd.f32 %v17926_v2, %v11385_v58  ;;  %v13530_v62 = vrot.slane %v11545_v16, 3  ;;  %v13532_v59 = vrot.slane %v11548_v25, 2  ;;  %v15567_v25 = vld [vmem:[%s18822_s3 + $0xd8] sm:$0xff]  }
 0x2c7   :  { %v17988_v26 = vunpack.c.l.b16 %v11460_v63  ;;  %v11439_v4 = vmax.f32 %v11415_v51, 0.0  ;;  %v13531_v56 = vsel %vm11565_vm14, %v13530_v62, %v13529_v34 }
 0x2c8   :  { %v10202_v33 = vpop.f32.mrb[14].mxu0  ;;  %v17992_v21 = vsel %vm11568_vm15, %v13532_v59, %v13531_v56 }
 0x2c9   :  { %v11463_v48 = vpack.c.bf16 %v11439_v4, %v11439_v4  ;;  %v15373_v37 = vadd.f32 %v10202_v33, %v17122_v22  ;;  %v10204_v47 = vpop.f32.mrb[15].mxu0  ;;  %v11600_v39 = vrot.slane %v17988_v26, 2  ;;  %v11877_v0 = vrot.slane %v17988_v26, 3 }
 0x2ca   :  { %v15374_v5 = vadd.f32 %v10204_v47, %v17130_v43  ;;  %v12153_v44 = vrot.slane %v17988_v26, 4 }
 0x2cb   :  { %v17997_v20 = vunpack.c.l.b16 %v11463_v48  ;;  %v11392_v28 = vadd.f32 %v15373_v37, %v17926_v2  ;;  %v11601_v34 = vsel %vm11571_vm0, %v11600_v39, %v11599_v24  ;;  %v11878_v8 = vsel %vm11571_vm0, %v11877_v0, %v11876_v19  ;;  %v15572_v39 = vld [vmem:[%s18822_s3 + $0xa0] sm:$0xff]  }
 0x2cc   :  { %v11393_v57 = vadd.f32 %v15374_v5, %v17926_v2  ;;  %v10357_v3 = vpop.f32.mrb[0].mxu0 }
 0x2cd   :  { %v11416_v23 = vmax.f32 %v11392_v28, 0.0  ;;  %v11395_v40 = vadd.f32 %v17926_v2, %v10357_v3  ;;  %v10359_v16 = vpop.f32.mrb[1].mxu0  ;;  %v11602_v22 = vrot.slane %v17997_v20, 1  ;;  %v11879_v50 = vrot.slane %v17997_v20, 2 }
 0x2ce   :  { %v11417_v43 = vmax.f32 %v11393_v57, 0.0  ;;  %v11396_v18 = vadd.f32 %v17926_v2, %v10359_v16  ;;  %v15575_v16 = vld [vmem:[%s18822_s3 + $0xe8] sm:$0xff]  }
 0x2cf   :  { %v11440_v27 = vpack.c.bf16 %v11416_v23, %v11416_v23  ;;  %v11419_v12 = vmax.f32 %v11395_v40, 0.0  ;;  %v11603_v61 = vsel %vm11574_vm1, %v11602_v22, %v11601_v34  ;;  %v18024_v13 = vsel %vm11574_vm1, %v11879_v50, %v11878_v8 }
 0x2d0   :  { %v11441_v31 = vpack.c.bf16 %v11417_v43, %v11417_v43  ;;  %v11420_v11 = vmax.f32 %v11396_v18, 0.0  ;;  %v10512_v1 = vpop.f32.mrb[2].mxu0  ;;  %v11606_v55 = vpack.c.b16 %v11603_v61, %v11603_v61 }
 0x2d1   :  { %v18015_v35 = vunpack.c.l.b16 %v11440_v27  ;;  %v11443_v42 = vpack.c.bf16 %v11419_v12, %v11419_v12  ;;  %v11398_v60 = vadd.f32 %v17926_v2, %v10512_v1  ;;  %v10514_v30 = vpop.f32.mrb[3].mxu0 }
 0x2d2   :  { %v18019_v49 = vunpack.c.l.b16 %v11441_v31  ;;  %v11444_v36 = vpack.c.bf16 %v11420_v11, %v11420_v11  ;;  %v11399_v9 = vadd.f32 %v17926_v2, %v10514_v30  ;;  %15306 = vmatmul.mubr.msk.bf16.vlgmr.msra.gmra.mrb[148].mxu1 %vm11717_vm2, %v11606_v55  ;;  %v15576_v55 = vld [vmem:[%s18822_s3 + $0xa8] sm:$0xff]  }
 0x2d3   :  { %v18026_v10 = vunpack.c.l.b16 %v11443_v42  ;;  %v11422_v15 = vmax.f32 %v11398_v60, 0.0  ;;  %14764 = vmatpush3.bf16.msra.mxu1 %v15564_v14  ;;  %v11839_v41 = vrot.slane %v18015_v35, 1  ;;  %v12115_v17 = vrot.slane %v18015_v35, 2 }
 0x2d4   :  { %v18033_v52 = vunpack.c.l.b16 %v11444_v36  ;;  %v11423_v53 = vmax.f32 %v11399_v9, 0.0  ;;  %v10667_v58 = vpop.f32.mrb[4].mxu0  ;;  %14765 = vmatprep.subr.bf16.mxu1 %v15567_v25  ;;  %v11853_v24 = vrot.slane %v18019_v49, 1  ;;  %v12129_v19 = vrot.slane %v18019_v49, 2  ;;  %v15579_v36 = vld [vmem:[%s18822_s3 + $0xf0] sm:$0xff]  }
 0x2d5   :  { %v11446_v63 = vpack.c.bf16 %v11422_v15, %v11422_v15  ;;  %v11401_v51 = vadd.f32 %v17926_v2, %v10667_v58  ;;  %v10669_v62 = vpop.f32.mrb[5].mxu0  ;;  %v11555_v59 = vrot.slane %v18026_v10, 7  ;;  %v11840_v4 = vsel %vm11556_vm11, %v18026_v10, %v11839_v41 }
 0x2d6   :  { %v11447_v56 = vpack.c.bf16 %v11423_v53, %v11423_v53  ;;  %v11402_v33 = vadd.f32 %v17926_v2, %v10669_v62  ;;  %v11576_v48 = vrot.slane %v18033_v52, 7  ;;  %v11854_v37 = vsel %vm11556_vm11, %v18033_v52, %v11853_v24 }
 0x2d7   :  { %v18048_v47 = vunpack.c.l.b16 %v11446_v63  ;;  %v11425_v5 = vmax.f32 %v11401_v51, 0.0  ;;  %14766 = vmatpush3.bf16.msra.mxu1 %v15568_v7  ;;  %v11557_v28 = vsel %vm11556_vm11, %v11555_v59, %v18015_v35  ;;  %v12130_v57 = vrot.slane %v18033_v52, 1 }
 0x2d8   :  { %v18056_v3 = vunpack.c.l.b16 %v11447_v56  ;;  %v11426_v23 = vmax.f32 %v11402_v33, 0.0  ;;  %v10822_v40 = vpop.f32.mrb[6].mxu0  ;;  %14767 = vmatprep.subr.bf16.mxu1 %v15571_v54  ;;  %v11577_v22 = vsel %vm11556_vm11, %v11576_v48, %v18019_v49  ;;  %v12405_v0 = vrot.slane %v18019_v49, 3  ;;  %v15580_v56 = vld [vmem:[%s18822_s3 + $0xb0] sm:$0xff]  }
 0x2d9   :  { %v11449_v43 = vpack.c.bf16 %v11425_v5, %v11425_v5  ;;  %v11404_v18 = vadd.f32 %v17926_v2, %v10822_v40  ;;  %v10824_v34 = vpop.f32.mrb[7].mxu0  ;;  %v11558_v50 = vrot.slane %v18048_v47, 6  ;;  %v11841_v27 = vrot.slane %v18048_v47, 7 }
 0x2da   :  { %v11450_v12 = vpack.c.bf16 %v11426_v23, %v11426_v23  ;;  %v11405_v61 = vadd.f32 %v17926_v2, %v10824_v34  ;;  %v11578_v14 = vrot.slane %v18056_v3, 6  ;;  %v11855_v31 = vrot.slane %v18056_v3, 7 }
 0x2db   :  { %v18070_v11 = vunpack.c.l.b16 %v11449_v43  ;;  %v11428_v1 = vmax.f32 %v11404_v18, 0.0  ;;  %14768 = vmatpush3.bf16.msra.mxu1 %v15572_v39  ;;  %v11560_v25 = vsel %vm11559_vm12, %v11558_v50, %v11557_v28  ;;  %v11842_v42 = vsel %vm11559_vm12, %v11841_v27, %v11840_v4  ;;  %v15583_v28 = vld [vmem:[%s18822_s3 + $0xf8] sm:$0xff]  }
 0x2dc   :  { %v18077_v60 = vunpack.c.l.b16 %v11450_v12  ;;  %v11429_v30 = vmax.f32 %v11405_v61, 0.0  ;;  %v10977_v8 = vpop.f32.mrb[8].mxu0  ;;  %14769 = vmatprep.subr.bf16.mxu1 %v15575_v16  ;;  %v11579_v9 = vsel %vm11559_vm12, %v11578_v14, %v11577_v22  ;;  %v11856_v15 = vsel %vm11559_vm12, %v11855_v31, %v11854_v37 }
 0x2dd   :  { %v11452_v7 = vpack.c.bf16 %v11428_v1, %v11428_v1  ;;  %v11407_v41 = vadd.f32 %v17926_v2, %v10977_v8  ;;  %v10979_v53 = vpop.f32.mrb[9].mxu0  ;;  %v11561_v58 = vrot.slane %v18070_v11, 5  ;;  %v11843_v54 = vrot.slane %v18070_v11, 6  ;;  %v15584_v1 = vld [vmem:[%s18822_s3 + $0xb8] sm:$0xff]  }
 0x2de   :  { %v11453_v24 = vpack.c.bf16 %v11429_v30, %v11429_v30  ;;  %v11408_v63 = vadd.f32 %v17926_v2, %v10979_v53  ;;  %v11580_v51 = vrot.slane %v18077_v60, 5  ;;  %v11857_v62 = vrot.slane %v18077_v60, 6 }
 0x2df   :  { %v18090_v59 = vunpack.c.l.b16 %v11452_v7  ;;  %v11431_v4 = vmax.f32 %v11407_v41, 0.0  ;;  %14770 = vmatpush3.bf16.msra.mxu1 %v15576_v55  ;;  %v11563_v33 = vsel %vm11562_vm13, %v11561_v58, %v11560_v25  ;;  %v11844_v48 = vsel %vm11562_vm13, %v11843_v54, %v11842_v42 }
 0x2e0   :  { %v18097_v37 = vunpack.c.l.b16 %v11453_v24  ;;  %v11432_v5 = vmax.f32 %v11408_v63, 0.0  ;;  %v11132_v39 = vpop.f32.mrb[10].mxu0  ;;  %14771 = vmatprep.subr.bf16.mxu1 %v15579_v36  ;;  %v11581_v23 = vsel %vm11562_vm13, %v11580_v51, %v11579_v9  ;;  %v11858_v40 = vsel %vm11562_vm13, %v11857_v62, %v11856_v15  ;;  %v15587_v36 = vld [vmem:[%s18822_s3 + $0x100] sm:$0xff]  }
 0x2e1   :  { %v11455_v16 = vpack.c.bf16 %v11431_v4, %v11431_v4  ;;  %v11410_v22 = vadd.f32 %v17926_v2, %v11132_v39  ;;  %v11134_v43 = vpop.f32.mrb[11].mxu0  ;;  %v11564_v18 = vrot.slane %v18090_v59, 4  ;;  %v11845_v34 = vrot.slane %v18090_v59, 5 }
 0x2e2   :  { %v11456_v50 = vpack.c.bf16 %v11432_v5, %v11432_v5  ;;  %v11411_v27 = vadd.f32 %v17926_v2, %v11134_v43  ;;  %v11582_v12 = vrot.slane %v18097_v37, 4  ;;  %v11859_v61 = vrot.slane %v18097_v37, 5 }
 0x2e3   :  { %v18110_v14 = vunpack.c.l.b16 %v11455_v16  ;;  %v11434_v31 = vmax.f32 %v11410_v22, 0.0  ;;  %14772 = vmatpush3.bf16.msra.mxu1 %v15580_v56  ;;  %v11566_v55 = vsel %vm11565_vm14, %v11564_v18, %v11563_v33  ;;  %v11846_v25 = vsel %vm11565_vm14, %v11845_v34, %v11844_v48  ;;  %v15588_v33 = vld [vmem:[%s18822_s3 + $0xc0] sm:$0xff]  }
 0x2e4   :  { %v18117_v42 = vunpack.c.l.b16 %v11456_v50  ;;  %v11435_v30 = vmax.f32 %v11411_v27, 0.0  ;;  %v11287_v8 = vpop.f32.mrb[12].mxu0  ;;  %14773 = vmatprep.subr.bf16.mxu1 %v15583_v28  ;;  %v11583_v9 = vsel %vm11565_vm14, %v11582_v12, %v11581_v23  ;;  %v11860_v15 = vsel %vm11565_vm14, %v11859_v61, %v11858_v40 }
 0x2e5   :  { %v11458_v7 = vpack.c.bf16 %v11434_v31, %v11434_v31  ;;  %v11413_v41 = vadd.f32 %v17926_v2, %v11287_v8  ;;  %v11289_v53 = vpop.f32.mrb[13].mxu0  ;;  %v11567_v58 = vrot.slane %v18110_v14, 3  ;;  %v11847_v54 = vrot.slane %v18110_v14, 4  ;;  %v15592_v31 = vld [vmem:[%s18822_s3 + $0xc8] sm:$0xff]  }
 0x2e6   :  { %v11459_v24 = vpack.c.bf16 %v11435_v30, %v11435_v30  ;;  %v11414_v63 = vadd.f32 %v17926_v2, %v11289_v53  ;;  %v11584_v51 = vrot.slane %v18117_v42, 3  ;;  %v11861_v62 = vrot.slane %v18117_v42, 4  ;;  %v15591_v2 = vld [vmem:[%s18822_s3 + $0x108] sm:$0xff]  }
 0x2e7   :  { %v18130_v4 = vunpack.c.l.b16 %v11458_v7  ;;  %v11437_v56 = vmax.f32 %v11413_v41, 0.0  ;;  %14774 = vmatpush3.bf16.msra.mxu1 %v15584_v1  ;;  %v11569_v48 = vsel %vm11568_vm15, %v11567_v58, %v11566_v55  ;;  %v11848_v5 = vsel %vm11568_vm15, %v11847_v54, %v11846_v25 }
 0x2e8   :  { %v18137_v39 = vunpack.c.l.b16 %v11459_v24  ;;  %v11438_v28 = vmax.f32 %v11414_v63, 0.0  ;;  %14775 = vmatprep.subr.bf16.mxu1 %v15587_v36  ;;  %v11585_v23 = vsel %vm11568_vm15, %v11584_v51, %v11583_v9  ;;  %v11862_v40 = vsel %vm11568_vm15, %v11861_v62, %v11860_v15 }
 0x2e9   :  { %v11461_v16 = vpack.c.bf16 %v11437_v56, %v11437_v56  ;;  %v11570_v22 = vrot.slane %v18130_v4, 2  ;;  %v11849_v43 = vrot.slane %v18130_v4, 3  ;;  %v12131_v18 = vsel %vm11556_vm11, %v12130_v57, %v12129_v19 }
 0x2ea   :  { %v11462_v34 = vpack.c.bf16 %v11438_v28, %v11438_v28  ;;  %v11586_v50 = vrot.slane %v18137_v39, 2  ;;  %v11863_v27 = vrot.slane %v18137_v39, 3  ;;  %v12132_v12 = vsel %vm11559_vm12, %v18056_v3, %v12131_v18  ;;  %v15596_v18 = vld [vmem:[%s18822_s3 + $0x168] sm:$0xff]  }
 0x2eb   :  { %v18155_v61 = vunpack.c.l.b16 %v11461_v16  ;;  %14776 = vmatpush3.bf16.msra.mxu1 %v15588_v33  ;;  %v11572_v1 = vsel %vm11571_vm0, %v11570_v22, %v11569_v48  ;;  %v11850_v55 = vsel %vm11571_vm0, %v11849_v43, %v11848_v5  ;;  %v12133_v19 = vrot.slane %v18077_v60, 7 }
 0x2ec   :  { %v18163_v57 = vunpack.c.l.b16 %v11462_v34  ;;  %14777 = vmatprep.subr.bf16.mxu1 %v15591_v2  ;;  %v11587_v25 = vsel %vm11571_vm0, %v11586_v50, %v11585_v23  ;;  %v11864_v30 = vsel %vm11571_vm0, %v11863_v27, %v11862_v40  ;;  %v12135_v8 = vrot.slane %v18097_v37, 6  ;;  %v15594_v23 = vld [vmem:[%s18822_s3 + $0x120] sm:$0xff]   ;;  %v15595_v40 = vld [vmem:[%s18822_s3 + $0x110] sm:$0xff]  }
 0x2ed   :  { %v11573_v36 = vrot.slane %v18155_v61, 1  ;;  %v11851_v9 = vrot.slane %v18155_v61, 2  ;;  %v12134_v15 = vsel %vm11562_vm13, %v12133_v19, %v12132_v12  ;;  %v12137_v7 = vrot.slane %v18117_v42, 5 }
 0x2ee   :  { %v11588_v41 = vrot.slane %v18163_v57, 1  ;;  %v11865_v53 = vrot.slane %v18163_v57, 2  ;;  %v12136_v58 = vsel %vm11565_vm14, %v12135_v8, %v12134_v15  ;;  %v12139_v54 = vrot.slane %v18137_v39, 4 }
 0x2ef   :  { %14778 = vmatpush3.bf16.msra.mxu1 %v15592_v31  ;;  %v11575_v24 = vsel %vm11574_vm1, %v11573_v36, %v11572_v1  ;;  %v11852_v63 = vsel %vm11574_vm1, %v11851_v9, %v11850_v55  ;;  %v12138_v51 = vsel %vm11568_vm15, %v12137_v7, %v12136_v58  ;;  %v12141_v62 = vrot.slane %v18163_v57, 3  ;;  %v15598_v36 = vld [vmem:[%s18822_s3 + $0x118] sm:$0xff]  }
 0x2f0   :  { %v11589_v56 = vsel %vm11574_vm1, %v11588_v41, %v11587_v25  ;;  %v11866_v33 = vsel %vm11574_vm1, %v11865_v53, %v11864_v30  ;;  %v11604_v48 = vpack.c.b16 %v11575_v24, %v11575_v24  ;;  %v11881_v5 = vpack.c.b16 %v11852_v63, %v11852_v63  ;;  %15309 = vmatprep.subr.bf16.mxu1 %v15751_v6  ;;  %v15599_v53 = vld [vmem:[%s18822_s3 + $0x170] sm:$0xff]  }
 0x2f1   :  { %v11605_v28 = vpack.c.b16 %v11589_v56, %v11589_v56  ;;  %v11882_v2 = vpack.c.b16 %v11866_v33, %v11866_v33  ;;  %v12140_v16 = vsel %vm11571_vm0, %v12139_v54, %v12138_v51  ;;  %v12406_v22 = vrot.slane %v18033_v52, 2 }
 0x2f2   :  { %v12142_v43 = vsel %vm11574_vm1, %v12141_v62, %v12140_v16  ;;  %v12408_v34 = vrot.slane %v18056_v3, 1  ;;  %v12411_v50 = vrot.slane %v18097_v37, 7  ;;  %v12413_v27 = vrot.slane %v18117_v42, 6 }
 0x2f3   :  { %11753 = vmatprep.mubr.bf16.mxu0 %v11605_v28  ;;  %12029 = vmatprep.mubr.bf16.mxu1 %v11882_v2  ;;  %v12158_v12 = vpack.c.b16 %v12142_v43, %v12142_v43  ;;  %v12407_v31 = vsel %vm11556_vm11, %v12406_v22, %v12405_v0  ;;  %v12415_v1 = vrot.slane %v18137_v39, 5  ;;  %v12417_v55 = vrot.slane %v18163_v57, 4  ;;  %v15597_v0 = vld [vmem:[%s18822_s3 + $0x128] sm:$0xff]   ;;  %v15600_v2 = vld [vmem:[%s18822_s3 + $0x130] sm:$0xff]  }
 0x2f4   :  { %11754 = vmatmul.mubr.bf16.vlgmr.msra.gmra.mrb[16].mxu0 %v11604_v48  ;;  %12030 = vmatmul.mubr.bf16.vlgmr.msra.gmra.mrb[152].mxu1 %v11881_v5  ;;  %v12409_v19 = vsel %vm11559_vm12, %v12408_v34, %v12407_v31  ;;  %v12116_v25 = vrot.slane %v18026_v10, 1  ;;  %v12119_v30 = vrot.slane %v18070_v11, 7  ;;  %v12121_v8 = vrot.slane %v18090_v59, 6  ;;  %v15601_v34 = vld [vmem:[%s18822_s3 + $0x178] sm:$0xff]  }
 0x2f5   :  { %14789 = vmatpush3.bf16.msra.mxu0 %v15594_v23  ;;  %15310 = vmatpush3.bf16.msra.mxu1 %v15595_v40  ;;  %v12410_v9 = vsel %vm11562_vm13, %v18077_v60, %v12409_v19  ;;  %v12123_v15 = vrot.slane %v18110_v14, 5  ;;  %v12125_v7 = vrot.slane %v18130_v4, 4  ;;  %v12127_v41 = vrot.slane %v18155_v61, 3  ;;  %v15602_v23 = vld [vmem:[%s18822_s3 + $0x1a0] sm:$0xff]  }
 0x2f6   :  { %12305 = vmatprep.mubr.bf16.mxu0 %v12158_v12  ;;  %14790 = vmatprep.subr.bf16.mxu0 %v15596_v18  ;;  %v12412_v58 = vsel %vm11565_vm14, %v12411_v50, %v12410_v9  ;;  %v12117_v54 = vsel %vm11556_vm11, %v12116_v25, %v12115_v17  ;;  %v12681_v24 = vrot.slane %v18019_v49, 4  ;;  %v12682_v63 = vrot.slane %v18033_v52, 3 }
 0x2f7   :  { %15311 = vmatprep.subr.bf16.mxu1 %v15751_v6  ;;  %15313 = vmatprep.mubr.msk.bf16.mxu1 %vm15755_vm3, %v15751_v6  ;;  %v12414_v51 = vsel %vm11568_vm15, %v12413_v27, %v12412_v58  ;;  %v12118_v62 = vsel %vm11559_vm12, %v18048_v47, %v12117_v54  ;;  %v12684_v56 = vrot.slane %v18056_v3, 2  ;;  %v12686_v33 = vrot.slane %v18077_v60, 1  ;;  %v15608_v58 = vld [vmem:[%s18822_s3 + $0x1f0] sm:$0xff]  }
 0x2f8   :  { %v12416_v17 = vsel %vm11571_vm0, %v12415_v1, %v12414_v51  ;;  %v12120_v48 = vsel %vm11562_vm13, %v12119_v30, %v12118_v62  ;;  %v12683_v5 = vsel %vm11556_vm11, %v12682_v63, %v12681_v24  ;;  %v12689_v28 = vrot.slane %v18117_v42, 7 }
 0x2f9   :  { %14791 = vmatpush3.bf16.msra.mxu0 %v15597_v0  ;;  %15312 = vmatpush3.bf16.msra.mxu1 %v15598_v36  ;;  %v18246_v40 = vsel %vm11574_vm1, %v12417_v55, %v12416_v17  ;;  %v12122_v16 = vsel %vm11565_vm14, %v12121_v8, %v12120_v48  ;;  %v12685_v22 = vsel %vm11559_vm12, %v12684_v56, %v12683_v5  ;;  %v12691_v43 = vrot.slane %v18137_v39, 6  ;;  %v15603_v0 = vld [vmem:[%s18822_s3 + $0x138] sm:$0xff]   ;;  %v15606_v36 = vld [vmem:[%s18822_s3 + $0x1a8] sm:$0xff]  }
 0x2fa   :  { %14792 = vmatprep.subr.bf16.mxu0 %v15599_v53  ;;  %v11883_v18 = vpack.c.b16 %v18024_v13, %v18024_v13  ;;  %15317 = vmatprep.subr.bf16.mxu1 %v15751_v6  ;;  %v12124_v50 = vsel %vm11568_vm15, %v12123_v15, %v12122_v16  ;;  %v12687_v27 = vsel %vm11562_vm13, %v12686_v33, %v12685_v22  ;;  %v12693_v12 = vrot.slane %v18163_v57, 5  ;;  %v15604_v53 = vld [vmem:[%s18822_s3 + $0x180] sm:$0xff]   ;;  %v15607_v16 = vld [vmem:[%s18822_s3 + $0x188] sm:$0xff]  }
 0x2fb   :  { %v12126_v31 = vsel %vm11571_vm0, %v12125_v7, %v12124_v50  ;;  %v12688_v1 = vsel %vm11565_vm14, %v18097_v37, %v12687_v27  ;;  %v12391_v55 = vrot.slane %v18015_v35, 3  ;;  %v12392_v13 = vrot.slane %v18026_v10, 2 }
 0x2fc   :  { %15314 = vmatmul.mubr.msk.bf16.vlgmr.msra.gmra.mrb[148].mxu1 %vm11717_vm2, %v11883_v18  ;;  %v18267_v19 = vsel %vm11574_vm1, %v12127_v41, %v12126_v31  ;;  %v12690_v25 = vsel %vm11568_vm15, %v12689_v28, %v12688_v1  ;;  %v12394_v30 = vrot.slane %v18048_v47, 1  ;;  %v12397_v8 = vrot.slane %v18090_v59, 7  ;;  %v15605_v28 = vld [vmem:[%s18822_s3 + $0x140] sm:$0xff]  }
 0x2fd   :  { %14793 = vmatpush3.bf16.msra.mxu0 %v15600_v2  ;;  %15318 = vmatpush3.bf16.msra.mxu1 %v15602_v23  ;;  %v12155_v9 = vrot.slane %v17997_v20, 3  ;;  %v12692_v15 = vsel %vm11571_vm0, %v12691_v43, %v12690_v25  ;;  %v12393_v7 = vsel %vm11556_vm11, %v12392_v13, %v12391_v55  ;;  %v12399_v41 = vrot.slane %v18110_v14, 6 }
 0x2fe   :  { %14794 = vmatprep.subr.bf16.mxu0 %v15601_v34  ;;  %15319 = vmatprep.subr.bf16.mxu1 %v15751_v6  ;;  %v18290_v54 = vsel %vm11574_vm1, %v12693_v12, %v12692_v15  ;;  %v12395_v24 = vsel %vm11559_vm12, %v12394_v30, %v12393_v7  ;;  %v12401_v63 = vrot.slane %v18130_v4, 5  ;;  %v12154_v51 = vsel %vm11571_vm0, %v12153_v44, %v17976_v45  ;;  %v15609_v30 = vld [vmem:[%s18822_s3 + $0x148] sm:$0xff]   ;;  %v15611_v15 = vld [vmem:[%s18822_s3 + $0x190] sm:$0xff]  }
 0x2ff   :  { %15321 = vmatprep.mubr.msk.bf16.mxu1 %vm15755_vm3, %v15751_v6  ;;  %v12396_v62 = vsel %vm11562_vm13, %v18070_v11, %v12395_v24  ;;  %v12403_v56 = vrot.slane %v18155_v61, 4  ;;  %v12667_v17 = vrot.slane %v18015_v35, 4  ;;  %v12668_v48 = vrot.slane %v18026_v10, 3 }
 0x300   :  { %v12398_v33 = vsel %vm11565_vm14, %v12397_v8, %v12396_v62  ;;  %v12670_v5 = vrot.slane %v18048_v47, 2  ;;  %v12156_v45 = vsel %vm11574_vm1, %v12155_v9, %v12154_v51  ;;  %v12672_v2 = vrot.slane %v18070_v11, 1  ;;  %v15610_v8 = vld [vmem:[%s18822_s3 + $0x1b0] sm:$0xff]  }
 0x301   :  { %14795 = vmatpush3.bf16.msra.mxu0 %v15603_v0  ;;  %15320 = vmatpush3.bf16.msra.mxu1 %v15606_v36  ;;  %v12400_v44 = vsel %vm11568_vm15, %v12399_v41, %v12398_v33  ;;  %v12675_v23 = vrot.slane %v18110_v14, 7  ;;  %v12669_v43 = vsel %vm11556_vm11, %v12668_v48, %v12667_v17  ;;  %v12677_v18 = vrot.slane %v18130_v4, 6  ;;  %v15613_v17 = vld [vmem:[%s18822_s3 + $0x150] sm:$0xff]   ;;  %v15614_v48 = vld [vmem:[%s18822_s3 + $0x1b8] sm:$0xff]  }
 0x302   :  { %14796 = vmatprep.subr.bf16.mxu0 %v15604_v53  ;;  %14813 = vmatprep.subr.bf16.mxu1 %v15608_v58  ;;  %v12402_v22 = vsel %vm11571_vm0, %v12401_v63, %v12400_v44  ;;  %v12957_v34 = vrot.slane %v18019_v49, 5  ;;  %v12671_v27 = vsel %vm11559_vm12, %v12670_v5, %v12669_v43  ;;  %v12958_v12 = vrot.slane %v18033_v52, 4  ;;  %v15612_v58 = vld [vmem:[%s18822_s3 + $0x1f8] sm:$0xff]   ;;  %v15616_v44 = vld [vmem:[%s18822_s3 + $0x200] sm:$0xff]  }
 0x303   :  { %v18322_v50 = vsel %vm11574_vm1, %v12403_v56, %v12402_v22  ;;  %v12960_v31 = vrot.slane %v18056_v3, 3  ;;  %v12673_v1 = vsel %vm11562_vm13, %v12672_v2, %v12671_v27  ;;  %v12679_v55 = vrot.slane %v18155_v61, 5 }
 0x304   :  { %v12962_v13 = vrot.slane %v18077_v60, 2  ;;  %v12964_v25 = vrot.slane %v18097_v37, 1  ;;  %v12674_v0 = vsel %vm11565_vm14, %v18090_v59, %v12673_v1  ;;  %v12959_v36 = vsel %vm11556_vm11, %v12958_v12, %v12957_v34  ;;  %v15617_v1 = vld [vmem:[%s18822_s3 + $0x158] sm:$0xff]  }
 0x305   :  { %14797 = vmatpush3.bf16.msra.mxu0 %v15605_v28  ;;  %v12159_v9 = vpack.c.b16 %v12156_v45, %v12156_v45  ;;  %v12676_v7 = vsel %vm11568_vm15, %v12675_v23, %v12674_v0  ;;  %v12961_v41 = vsel %vm11559_vm12, %v12960_v31, %v12959_v36  ;;  %v12967_v53 = vrot.slane %v18137_v39, 7  ;;  %v15615_v45 = vld [vmem:[%s18822_s3 + $0x198] sm:$0xff]   ;;  %v15620_v0 = vld [vmem:[%s18822_s3 + $0x280] sm:$0xff]  }
 0x306   :  { %14798 = vmatprep.subr.bf16.mxu0 %v15607_v16  ;;  %v12678_v24 = vsel %vm11571_vm0, %v12677_v18, %v12676_v7  ;;  %v12963_v63 = vsel %vm11562_vm13, %v12962_v13, %v12961_v41  ;;  %v12969_v51 = vrot.slane %v18163_v57, 6  ;;  %v12434_v62 = vpack.c.b16 %v18246_v40, %v18246_v40 }
 0x307   :  { %v18356_v56 = vsel %vm11574_vm1, %v12679_v55, %v12678_v24  ;;  %v12965_v33 = vsel %vm11565_vm14, %v12964_v25, %v12963_v63  ;;  %v13233_v40 = vrot.slane %v18019_v49, 6  ;;  %v13234_v28 = vrot.slane %v18033_v52, 5  ;;  %v15618_v55 = vld [vmem:[%s18822_s3 + $0x1c0] sm:$0xff]  }
 0x308   :  { %15322 = vmatmul.mubr.msk.bf16.vlgmr.msra.gmra.mrb[148].mxu1 %vm11717_vm2, %v12159_v9  ;;  %v12966_v5 = vsel %vm11568_vm15, %v18117_v42, %v12965_v33  ;;  %v13236_v23 = vrot.slane %v18056_v3, 4  ;;  %v13238_v16 = vrot.slane %v18077_v60, 3  ;;  %v13240_v18 = vrot.slane %v18097_v37, 2 }
 0x309   :  { %14799 = vmatpush3.bf16.msra.mxu0 %v15609_v30  ;;  %14814 = vmatpush3.bf16.msra.mxu1 %v15610_v8  ;;  %v12968_v2 = vsel %vm11571_vm0, %v12967_v53, %v12966_v5  ;;  %v13235_v43 = vsel %vm11556_vm11, %v13234_v28, %v13233_v40  ;;  %v12157_v34 = vpack.c.b16 %v18267_v19, %v18267_v19  ;;  %v13242_v12 = vrot.slane %v18117_v42, 1  ;;  %v15619_v8 = vld [vmem:[%s18822_s3 + $0x208] sm:$0xff]   ;;  %v15623_v28 = vld [vmem:[%s18822_s3 + $0x210] sm:$0xff]  }
 0x30a   :  { %12581 = vmatprep.mubr.bf16.mxu1 %v12434_v62  ;;  %14800 = vmatprep.subr.bf16.mxu0 %v15611_v15  ;;  %v18379_v22 = vsel %vm11574_vm1, %v12969_v51, %v12968_v2  ;;  %v13237_v27 = vsel %vm11559_vm12, %v13236_v23, %v13235_v43  ;;  %v13245_v31 = vrot.slane %v18163_v57, 7  ;;  %v12943_v19 = vrot.slane %v18015_v35, 5 }
 0x30b   :  { %14815 = vmatprep.subr.bf16.mxu1 %v15612_v58  ;;  %v13239_v13 = vsel %vm11562_vm13, %v13238_v16, %v13237_v27  ;;  %v12944_v25 = vrot.slane %v18026_v10, 4  ;;  %v12946_v30 = vrot.slane %v18048_v47, 3  ;;  %v12948_v9 = vrot.slane %v18070_v11, 2 }
 0x30c   :  { %v13241_v36 = vsel %vm11565_vm14, %v13240_v18, %v13239_v13  ;;  %v12950_v15 = vrot.slane %v18090_v59, 1  ;;  %v12953_v7 = vrot.slane %v18130_v4, 7  ;;  %v12955_v58 = vrot.slane %v18155_v61, 6  ;;  %v15627_v13 = vld [vmem:[%s18822_s3 + $0x218] sm:$0xff]  }
 0x30d   :  { %14801 = vmatpush3.bf16.msra.mxu0 %v15613_v17  ;;  %14816 = vmatpush3.bf16.msra.mxu1 %v15614_v48  ;;  %v13243_v41 = vsel %vm11568_vm15, %v13242_v12, %v13241_v36  ;;  %v12945_v53 = vsel %vm11556_vm11, %v12944_v25, %v12943_v19  ;;  %v13509_v24 = vrot.slane %v18019_v49, 7  ;;  %v13510_v62 = vrot.slane %v18033_v52, 6  ;;  %v15621_v17 = vld [vmem:[%s18822_s3 + $0x1c8] sm:$0xff]   ;;  %v15622_v48 = vld [vmem:[%s18822_s3 + $0x240] sm:$0xff]   ;;  %v15625_v12 = vld [vmem:[%s18822_s3 + $0x1d0] sm:$0xff]  }
 0x30e   :  { %14802 = vmatprep.subr.bf16.mxu0 %v15615_v45  ;;  %14817 = vmatprep.subr.bf16.mxu1 %v15616_v44  ;;  %v13244_v63 = vsel %vm11571_vm0, %v18137_v39, %v13243_v41  ;;  %v12947_v51 = vsel %vm11559_vm12, %v12946_v30, %v12945_v53  ;;  %v13512_v33 = vrot.slane %v18056_v3, 5  ;;  %v13514_v40 = vrot.slane %v18077_v60, 4  ;;  %v15624_v60 = vld [vmem:[%s18822_s3 + $0x288] sm:$0xff]   ;;  %v15628_v19 = vld [vmem:[%s18822_s3 + $0x290] sm:$0xff]   ;;  %v15629_v41 = vld [vmem:[%s18822_s3 + $0x1d8] sm:$0xff]  }
 0x30f   :  { %v18424_v49 = vsel %vm11574_vm1, %v13245_v31, %v13244_v63  ;;  %v12949_v5 = vsel %vm11562_vm13, %v12948_v9, %v12947_v51  ;;  %v13516_v52 = vrot.slane %v18097_v37, 3  ;;  %v12710_v3 = vpack.c.b16 %v18290_v54, %v18290_v54  ;;  %v15630_v53 = vld [vmem:[%s18822_s3 + $0x250] sm:$0xff]   ;;  %v15631_v51 = vld [vmem:[%s18822_s3 + $0x220] sm:$0xff]  }
 0x310   :  { %v12951_v45 = vsel %vm11565_vm14, %v12950_v15, %v12949_v5  ;;  %v13511_v44 = vsel %vm11556_vm11, %v13510_v62, %v13509_v24  ;;  %v13518_v2 = vrot.slane %v18117_v42, 2  ;;  %v13520_v54 = vrot.slane %v18137_v39, 1  ;;  %v15626_v39 = vld [vmem:[%s18822_s3 + $0x248] sm:$0xff]   ;;  %v15632_v62 = vld [vmem:[%s18822_s3 + $0x298] sm:$0xff]  }
 0x311   :  { %14803 = vmatpush3.bf16.msra.mxu0 %v15617_v1  ;;  %14818 = vmatpush3.bf16.msra.mxu1 %v15618_v55  ;;  %v12952_v37 = vsel %vm11568_vm15, %v18110_v14, %v12951_v45  ;;  %v13513_v23 = vsel %vm11559_vm12, %v13512_v33, %v13511_v44  ;;  %v13219_v16 = vrot.slane %v18015_v35, 6  ;;  %v13220_v42 = vrot.slane %v18026_v10, 5 }
 0x312   :  { %14819 = vmatprep.subr.bf16.mxu1 %v15619_v8  ;;  %14838 = vmatprep.subr.bf16.mxu0 %v15620_v0  ;;  %v12954_v43 = vsel %vm11571_vm0, %v12953_v7, %v12952_v37  ;;  %v13515_v18 = vsel %vm11562_vm13, %v13514_v40, %v13513_v23  ;;  %v13222_v27 = vrot.slane %v18048_v47, 4  ;;  %v13224_v1 = vrot.slane %v18070_v11, 3  ;;  %v15639_v23 = vld [vmem:[%s18822_s3 + $0x2a8] sm:$0xff]  }
 0x313   :  { %v13517_v31 = vsel %vm11565_vm14, %v13516_v52, %v13515_v18  ;;  %v13226_v55 = vrot.slane %v18090_v59, 2  ;;  %v13221_v30 = vsel %vm11556_vm11, %v13220_v42, %v13219_v16  ;;  %v13228_v8 = vrot.slane %v18110_v14, 1  ;;  %v15641_v16 = vld [vmem:[%s18822_s3 + $0x268] sm:$0xff]  }
 0x314   :  { %12306 = vmatmul.mubr.bf16.vlgmr.msra.gmra.mrb[20].mxu0 %v12157_v34  ;;  %v18456_v34 = vsel %vm11574_vm1, %v12955_v58, %v12954_v43  ;;  %v13519_v25 = vsel %vm11568_vm15, %v13518_v2, %v13517_v31  ;;  %v13223_v36 = vsel %vm11559_vm12, %v13222_v27, %v13221_v30  ;;  %v13231_v7 = vrot.slane %v18155_v61, 7  ;;  %v15637_v2 = vld [vmem:[%s18822_s3 + $0x1e8] sm:$0xff]   ;;  %v15642_v43 = vld [vmem:[%s18822_s3 + $0x2b0] sm:$0xff]   ;;  %v15643_v27 = vld [vmem:[%s18822_s3 + $0x238] sm:$0xff]  }
 0x315   :  { %14820 = vmatpush3.bf16.msra.mxu1 %v15621_v17  ;;  %14839 = vmatpush3.bf16.msra.mxu0 %v15622_v48  ;;  %v13521_v0 = vsel %vm11571_vm0, %v13520_v54, %v13519_v25  ;;  %v13225_v15 = vsel %vm11562_vm13, %v13224_v1, %v13223_v36  ;;  %v13495_v24 = vrot.slane %v18015_v35, 7  ;;  %v13498_v63 = vrot.slane %v18048_v47, 5  ;;  %v15640_v54 = vld [vmem:[%s18822_s3 + $0x230] sm:$0xff]   ;;  %v15646_v1 = vld [vmem:[%s18822_s3 + $0x278] sm:$0xff]  }
 0x316   :  { %12857 = vmatprep.mubr.bf16.mxu0 %v12710_v3  ;;  %14821 = vmatprep.subr.bf16.mxu1 %v15623_v28  ;;  %v18474_v9 = vsel %vm11574_vm1, %v18163_v57, %v13521_v0  ;;  %v13227_v58 = vsel %vm11565_vm14, %v13226_v55, %v13225_v15  ;;  %v13496_v57 = vrot.slane %v18026_v10, 6  ;;  %v13500_v17 = vrot.slane %v18070_v11, 4  ;;  %v15633_v11 = vld [vmem:[%s18822_s3 + $0x1e0] sm:$0xff]   ;;  %v15650_v30 = vld [vmem:[%s18822_s3 + $0x318] sm:$0xff]  }
 0x317   :  { %14840 = vmatprep.subr.bf16.mxu0 %v15624_v60  ;;  %v13229_v33 = vsel %vm11568_vm15, %v13228_v8, %v13227_v58  ;;  %v13502_v35 = vrot.slane %v18090_v59, 3  ;;  %v13504_v48 = vrot.slane %v18110_v14, 2  ;;  %v13506_v52 = vrot.slane %v18130_v4, 1  ;;  %v15634_v59 = vld [vmem:[%s18822_s3 + $0x258] sm:$0xff]   ;;  %v15635_v14 = vld [vmem:[%s18822_s3 + $0x228] sm:$0xff]   ;;  %v15638_v60 = vld [vmem:[%s18822_s3 + $0x260] sm:$0xff]  }
 0x318   :  { %v13230_v10 = vsel %vm11571_vm0, %v18130_v4, %v13229_v33  ;;  %v13497_v47 = vsel %vm11556_vm11, %v13496_v57, %v13495_v24  ;;  %v15636_v4 = vld [vmem:[%s18822_s3 + $0x2a0] sm:$0xff]   ;;  %v12429_v18 = vrot.slane %v17988_v26, 5  ;;  %v12431_v42 = vrot.slane %v17997_v20, 4  ;;  %v15651_v8 = vld [vmem:[%s18822_s3 + $0x2c8] sm:$0xff]   ;;  %v15652_v15 = vld [vmem:[%s18822_s3 + $0x2d8] sm:$0xff]  }
 0x319   :  { %14822 = vmatpush3.bf16.msra.mxu1 %v15625_v12  ;;  %14841 = vmatpush3.bf16.msra.mxu0 %v15626_v39  ;;  %v18502_v5 = vsel %vm11574_vm1, %v13231_v7, %v13230_v10  ;;  %v13499_v40 = vsel %vm11559_vm12, %v13498_v63, %v13497_v47  ;;  %v15645_v39 = vld [vmem:[%s18822_s3 + $0x2b8] sm:$0xff]   ;;  %v15647_v55 = vld [vmem:[%s18822_s3 + $0x2c0] sm:$0xff]   ;;  %v12709_v25 = vpack.c.b16 %v18356_v56, %v18356_v56  ;;  %v12705_v0 = vrot.slane %v17988_v26, 6  ;;  %v15655_v58 = vld [vmem:[%s18822_s3 + $0x350] sm:$0xff]  }
 0x31a   :  { %14823 = vmatprep.subr.bf16.mxu1 %v15627_v13  ;;  %14842 = vmatprep.subr.bf16.mxu0 %v15628_v19  ;;  %v13501_v3 = vsel %vm11562_vm13, %v13500_v17, %v13499_v40  ;;  %v12430_v12 = vsel %vm11571_vm0, %v12429_v18, %v17979_v38  ;;  %v15648_v13 = vld [vmem:[%s18822_s3 + $0x310] sm:$0xff]   ;;  %v12986_v36 = vpack.c.b16 %v18379_v22, %v18379_v22  ;;  %v12707_v56 = vrot.slane %v17997_v20, 5  ;;  %v15653_v22 = vld [vmem:[%s18822_s3 + $0x320] sm:$0xff]   ;;  %v15657_v57 = vld [vmem:[%s18822_s3 + $0x2e8] sm:$0xff]  }
 0x31b   :  { %v13503_v28 = vsel %vm11565_vm14, %v13502_v35, %v13501_v3  ;;  %v12432_v31 = vsel %vm11574_vm1, %v12431_v42, %v12430_v12  ;;  %v15649_v19 = vld [vmem:[%s18822_s3 + $0x2d0] sm:$0xff]   ;;  %v12706_v7 = vsel %vm11571_vm0, %v12705_v0, %v17982_v46  ;;  %v15656_v46 = vld [vmem:[%s18822_s3 + $0x328] sm:$0xff]   ;;  %v15659_v63 = vld [vmem:[%s18822_s3 + $0x358] sm:$0xff]   ;;  %v12981_v33 = vrot.slane %v17988_v26, 7 }
 0x31c   :  { %v13505_v45 = vsel %vm11568_vm15, %v13504_v48, %v13503_v28  ;;  %v12435_v38 = vpack.c.b16 %v12432_v31, %v12432_v31  ;;  %v12983_v17 = vrot.slane %v17997_v20, 6  ;;  %v15660_v35 = vld [vmem:[%s18822_s3 + $0x2f0] sm:$0xff]   ;;  %v15662_v10 = vld [vmem:[%s18822_s3 + $0x338] sm:$0xff]   ;;  %v15663_v40 = vld [vmem:[%s18822_s3 + $0x360] sm:$0xff]   ;;  %v13262_v3 = vpack.c.b16 %v18424_v49, %v18424_v49 }
 0x31d   :  { %14824 = vmatpush3.bf16.msra.mxu1 %v15629_v41  ;;  %14843 = vmatpush3.bf16.msra.mxu0 %v15630_v53  ;;  %v13507_v44 = vsel %vm11571_vm0, %v13506_v52, %v13505_v45  ;;  %v12708_v41 = vsel %vm11574_vm1, %v12707_v56, %v12706_v7  ;;  %v15654_v53 = vld [vmem:[%s18822_s3 + $0x2e0] sm:$0xff]   ;;  %v12982_v47 = vsel %vm11571_vm0, %v12981_v33, %v17970_v32  ;;  %v15664_v52 = vld [vmem:[%s18822_s3 + $0x2f8] sm:$0xff]   ;;  %v15669_v28 = vld [vmem:[%s18822_s3 + $0x3b0] sm:$0xff]  }
 0x31e   :  { %14825 = vmatprep.subr.bf16.mxu1 %v15631_v51  ;;  %14844 = vmatprep.subr.bf16.mxu0 %v15632_v62  ;;  %v18530_v37 = vsel %vm11574_vm1, %v18155_v61, %v13507_v44  ;;  %v12433_v61 = vpack.c.b16 %v18322_v50, %v18322_v50  ;;  %v15644_v50 = vld [vmem:[%s18822_s3 + $0x270] sm:$0xff]   ;;  %v12711_v24 = vpack.c.b16 %v12708_v41, %v12708_v41  ;;  %v15661_v62 = vld [vmem:[%s18822_s3 + $0x3a0] sm:$0xff]   ;;  %v15670_v49 = vld [vmem:[%s18822_s3 + $0x348] sm:$0xff]  }
 0x31f   :  { %v15658_v51 = vld [vmem:[%s18822_s3 + $0x330] sm:$0xff]   ;;  %v12984_v48 = vsel %vm11574_vm1, %v12983_v17, %v12982_v47  ;;  %v15666_v32 = vld [vmem:[%s18822_s3 + $0x340] sm:$0xff]   ;;  %v15672_v44 = vld [vmem:[%s18822_s3 + $0x308] sm:$0xff]   ;;  %v13538_v18 = vpack.c.b16 %v18474_v9, %v18474_v9 }
 0x320   :  { %v15671_v45 = vld [vmem:[%s18822_s3 + $0x370] sm:$0xff]   ;;  %v15678_v42 = vld [vmem:[%s18822_s3 + $0x380] sm:$0xff]   ;;  %v15687_v31 = vld [vmem:[%s18822_s3 + $0x448] sm:$0xff]  }
 0x321   :  { %14826 = vmatpush3.bf16.msra.mxu1 %v15633_v11  ;;  %14845 = vmatpush3.bf16.msra.mxu0 %v15634_v59  ;;  %v12987_v11 = vpack.c.b16 %v12984_v48, %v12984_v48  ;;  %v15665_v59 = vld [vmem:[%s18822_s3 + $0x3a8] sm:$0xff]   ;;  %v15683_v9 = vld [vmem:[%s18822_s3 + $0x440] sm:$0xff]   ;;  %v15695_v0 = vld [vmem:[%s18822_s3 + $0x418] sm:$0xff]  }
 0x322   :  { %14827 = vmatprep.subr.bf16.mxu1 %v15635_v14  ;;  %14846 = vmatprep.subr.bf16.mxu0 %v15636_v4  ;;  %v15667_v14 = vld [vmem:[%s18822_s3 + $0x368] sm:$0xff]   ;;  %v15668_v4 = vld [vmem:[%s18822_s3 + $0x300] sm:$0xff]  }
 0x323   :  { %v15684_v12 = vld [vmem:[%s18822_s3 + $0x400] sm:$0xff]   ;;  %v15696_v7 = vld [vmem:[%s18822_s3 + $0x3e8] sm:$0xff]  }
 0x324   :  { %v15697_v56 = vld [vmem:[%s18822_s3 + $0x460] sm:$0xff]   ;;  %v15699_v41 = vld [vmem:[%s18822_s3 + $0x468] sm:$0xff]  }
 0x325   :  { %14828 = vmatpush3.bf16.msra.mxu1 %v15637_v2  ;;  %14847 = vmatpush3.bf16.msra.mxu0 %v15638_v60  ;;  %v15673_v2 = vld [vmem:[%s18822_s3 + $0x3b8] sm:$0xff]   ;;  %v15675_v60 = vld [vmem:[%s18822_s3 + $0x430] sm:$0xff]   ;;  %v14185_v17 = vld [vmem:[%s18823_s4] ss:$0 sm:$0xff] }
 0x326   :  { %15325 = vmatprep.subr.bf16.mxu1 %v15751_v6  ;;  %14848 = vmatprep.subr.bf16.mxu0 %v15639_v23  ;;  %v15674_v23 = vld [vmem:[%s18822_s3 + $0x378] sm:$0xff]  }
 0x328   :  { %12582 = vmatmul.mubr.bf16.vlgmr.msra.gmra.mrb[156].mxu1 %v12433_v61  ;;  %v15677_v61 = vld [vmem:[%s18822_s3 + $0x3c0] sm:$0xff]  }
 0x329   :  { %15326 = vmatpush3.bf16.msra.mxu1 %v15640_v54  ;;  %14849 = vmatpush3.bf16.msra.mxu0 %v15641_v16  ;;  %v15676_v54 = vld [vmem:[%s18822_s3 + $0x3f0] sm:$0xff]   ;;  %v12985_v16 = vpack.c.b16 %v18456_v34, %v18456_v34  ;;  %v15680_v34 = vld [vmem:[%s18822_s3 + $0x3f8] sm:$0xff]  }
 0x32a   :  { %15327 = vmatprep.subr.bf16.mxu1 %v15751_v6  ;;  %14850 = vmatprep.subr.bf16.mxu0 %v15642_v43  ;;  %v15679_v43 = vld [vmem:[%s18822_s3 + $0x438] sm:$0xff]  }
 0x32b   :  { %15329 = vmatprep.mubr.msk.bf16.mxu1 %vm15755_vm3, %v15751_v6 }
 0x32d   :  { %15328 = vmatpush3.bf16.msra.mxu1 %v15643_v27  ;;  %14851 = vmatpush3.bf16.msra.mxu0 %v15644_v50  ;;  %v15681_v27 = vld [vmem:[%s18822_s3 + $0x3c8] sm:$0xff]  }
 0x32e   :  { %14852 = vmatprep.subr.bf16.mxu0 %v15645_v39  ;;  %15333 = vmatprep.subr.bf16.mxu1 %v15751_v6  ;;  %v15682_v50 = vld [vmem:[%s18822_s3 + $0x388] sm:$0xff]   ;;  %v15685_v39 = vld [vmem:[%s18822_s3 + $0x3d0] sm:$0xff]  }
 0x330   :  { %15330 = vmatmul.mubr.msk.bf16.vlgmr.msra.gmra.mrb[148].mxu1 %vm11717_vm2, %v12435_v38  ;;  %v15689_v38 = vld [vmem:[%s18822_s3 + $0x3d8] sm:$0xff]  }
 0x331   :  { %14853 = vmatpush3.bf16.msra.mxu0 %v15646_v1  ;;  %15334 = vmatpush3.bf16.msra.mxu1 %v15647_v55  ;;  %v15686_v1 = vld [vmem:[%s18822_s3 + $0x390] sm:$0xff]   ;;  %v15688_v55 = vld [vmem:[%s18822_s3 + $0x408] sm:$0xff]  }
 0x332   :  { %14863 = vmatprep.subr.bf16.mxu0 %v15648_v13  ;;  %15335 = vmatprep.subr.bf16.mxu1 %v15751_v6  ;;  %v15691_v13 = vld [vmem:[%s18822_s3 + $0x450] sm:$0xff]  }
 0x333   :  { %15337 = vmatprep.mubr.msk.bf16.mxu1 %vm15755_vm3, %v15751_v6 }
 0x334   :  { %12858 = vmatmul.mubr.bf16.vlgmr.msra.gmra.mrb[24].mxu0 %v12709_v25  ;;  %v15692_v25 = vld [vmem:[%s18822_s3 + $0x410] sm:$0xff]  }
 0x335   :  { %14864 = vmatpush3.bf16.msra.mxu0 %v15649_v19  ;;  %13133 = vmatprep.mubr.bf16.mxu0 %v12986_v36  ;;  %v15690_v19 = vld [vmem:[%s18822_s3 + $0x398] sm:$0xff]   ;;  %v13261_v36 = vpack.c.b16 %v18502_v5, %v18502_v5  ;;  %v15698_v5 = vld [vmem:[%s18822_s3 + $0x420] sm:$0xff]  }
 0x336   :  { %14865 = vmatprep.subr.bf16.mxu0 %v15650_v30  ;;  %15336 = vmatpush3.bf16.msra.mxu1 %v15651_v8  ;;  %v15694_v30 = vld [vmem:[%s18822_s3 + $0x458] sm:$0xff]   ;;  %v15693_v8 = vld [vmem:[%s18822_s3 + $0x3e0] sm:$0xff]  }
 0x337   :  { %15341 = vmatprep.subr.bf16.mxu1 %v15751_v6 }
 0x339   :  { %14866 = vmatpush3.bf16.msra.mxu0 %v15652_v15  ;;  %v13259_v15 = vrot.slane %v17997_v20, 7 }
 0x33a   :  { %14867 = vmatprep.subr.bf16.mxu0 %v15653_v22  ;;  %v13258_v22 = vsel %vm11571_vm0, %v17988_v26, %v17985_v29 }
 0x33c   :  { %15338 = vmatmul.mubr.msk.bf16.vlgmr.msra.gmra.mrb[148].mxu1 %vm11717_vm2, %v12711_v24  ;;  %v15701_v24 = vld [vmem:[%s18822_s3 + $0x470] sm:$0xff]  }
 0x33d   :  { %14868 = vmatpush3.bf16.msra.mxu0 %v15654_v53  ;;  %15342 = vmatpush3.bf16.msra.mxu1 %v15655_v58  ;;  %v13260_v53 = vsel %vm11574_vm1, %v13259_v15, %v13258_v22  ;;  %v15700_v58 = vld [vmem:[%s18822_s3 + $0x428] sm:$0xff]  }
 0x33e   :  { %14869 = vmatprep.subr.bf16.mxu0 %v15656_v46  ;;  %15343 = vmatprep.subr.bf16.mxu1 %v15751_v6  ;;  %v13263_v29 = vpack.c.b16 %v13260_v53, %v13260_v53  ;;  %v13534_v46 = vrot.slane %v17988_v26, 1 }
 0x33f   :  { %15345 = vmatprep.mubr.msk.bf16.mxu1 %vm15755_vm3, %v15751_v6 }
 0x340   :  { %v13535_v26 = vsel %vm11571_vm0, %v13534_v46, %v17992_v21  ;;  %v14590_v46 = vld [vmem:[%s18825_s6] ss:$0 sm:$0xff] }
 0x341   :  { %14870 = vmatpush3.bf16.msra.mxu0 %v15657_v57  ;;  %15344 = vmatpush3.bf16.msra.mxu1 %v15659_v63  ;;  %v15702_v57 = vld [vmem:[%s18822_s3 + $0x478] sm:$0xff]   ;;  %v13537_v63 = vpack.c.b16 %v18530_v37, %v18530_v37 }
 0x342   :  { %14871 = vmatprep.subr.bf16.mxu0 %v15658_v51  ;;  %14888 = vmatprep.subr.bf16.mxu1 %v15661_v62  ;;  %v13536_v51 = vsel %vm11574_vm1, %v17997_v20, %v13535_v26  ;;  %v15703_v20 = vld [vmem:[%s18824_s5] sm:$0xff]  }
 0x343   :  { %v13539_v62 = vpack.c.b16 %v13536_v51, %v13536_v51 }
 0x345   :  { %14872 = vmatpush3.bf16.msra.mxu0 %v15660_v35 }
 0x346   :  { %14873 = vmatprep.subr.bf16.mxu0 %v15662_v10 }
 0x348   :  { %15346 = vmatmul.mubr.msk.bf16.vlgmr.msra.gmra.mrb[148].mxu1 %vm11717_vm2, %v12987_v11 }
 0x349   :  { %14889 = vmatpush3.bf16.msra.mxu1 %v15663_v40  ;;  %14874 = vmatpush3.bf16.msra.mxu0 %v15664_v52 }
 0x34a   :  { %13409 = vmatprep.mubr.bf16.mxu1 %v13262_v3  ;;  %14890 = vmatprep.subr.bf16.mxu1 %v15665_v59  ;;  %v15704_v3 = vld [vmem:[%s18824_s5 + $0x8] sm:$0xff]  }
 0x34b   :  { %14875 = vmatprep.subr.bf16.mxu0 %v15666_v32 }
 0x34d   :  { %14891 = vmatpush3.bf16.msra.mxu1 %v15667_v14  ;;  %14876 = vmatpush3.bf16.msra.mxu0 %v15668_v4 }
 0x34e   :  { %14892 = vmatprep.subr.bf16.mxu1 %v15669_v28  ;;  %14877 = vmatprep.subr.bf16.mxu0 %v15670_v49 }
 0x351   :  { %14893 = vmatpush3.bf16.msra.mxu1 %v15671_v45  ;;  %14878 = vmatpush3.bf16.msra.mxu0 %v15672_v44 }
 0x352   :  { %14894 = vmatprep.subr.bf16.mxu1 %v15673_v2  ;;  %14913 = vmatprep.subr.bf16.mxu0 %v15675_v60 }
 0x354   :  { %13134 = vmatmul.mubr.bf16.vlgmr.msra.gmra.mrb[28].mxu0 %v12985_v16 }
 0x355   :  { %14895 = vmatpush3.bf16.msra.mxu1 %v15674_v23  ;;  %14914 = vmatpush3.bf16.msra.mxu0 %v15676_v54 }
 0x356   :  { %13685 = vmatprep.mubr.bf16.mxu0 %v13538_v18  ;;  %14896 = vmatprep.subr.bf16.mxu1 %v15677_v61 }
 0x357   :  { %14915 = vmatprep.subr.bf16.mxu0 %v15679_v43 }
 0x359   :  { %14897 = vmatpush3.bf16.msra.mxu1 %v15678_v42  ;;  %14916 = vmatpush3.bf16.msra.mxu0 %v15680_v34 }
 0x35a   :  { %14898 = vmatprep.subr.bf16.mxu1 %v15681_v27  ;;  %14917 = vmatprep.subr.bf16.mxu0 %v15683_v9 }
 0x35d   :  { %14899 = vmatpush3.bf16.msra.mxu1 %v15682_v50  ;;  %14918 = vmatpush3.bf16.msra.mxu0 %v15684_v12 }
 0x35e   :  { %14900 = vmatprep.subr.bf16.mxu1 %v15685_v39  ;;  %14919 = vmatprep.subr.bf16.mxu0 %v15687_v31 }
 0x361   :  { %14901 = vmatpush3.bf16.msra.mxu1 %v15686_v1  ;;  %14920 = vmatpush3.bf16.msra.mxu0 %v15688_v55 }
 0x362   :  { %14902 = vmatprep.subr.bf16.mxu1 %v15689_v38  ;;  %14921 = vmatprep.subr.bf16.mxu0 %v15691_v13 }
 0x365   :  { %14903 = vmatpush3.bf16.msra.mxu1 %v15690_v19  ;;  %14922 = vmatpush3.bf16.msra.mxu0 %v15692_v25 }
 0x366   :  { %15349 = vmatprep.subr.bf16.mxu1 %v15751_v6  ;;  %14923 = vmatprep.subr.bf16.mxu0 %v15694_v30 }
 0x368   :  { %13410 = vmatmul.mubr.bf16.vlgmr.msra.gmra.mrb[160].mxu1 %v13261_v36 }
 0x369   :  { %15350 = vmatpush3.bf16.msra.mxu1 %v15693_v8  ;;  %14924 = vmatpush3.bf16.msra.mxu0 %v15695_v0 }
 0x36a   :  { %15351 = vmatprep.subr.bf16.mxu1 %v15751_v6  ;;  %14925 = vmatprep.subr.bf16.mxu0 %v15697_v56 }
 0x36b   :  { %15353 = vmatprep.mubr.msk.bf16.mxu1 %vm15755_vm3, %v15751_v6 }
 0x36d   :  { %15352 = vmatpush3.bf16.msra.mxu1 %v15696_v7  ;;  %14926 = vmatpush3.bf16.msra.mxu0 %v15698_v5 }
 0x36e   :  { %14927 = vmatprep.subr.bf16.mxu0 %v15699_v41  ;;  %15357 = vmatprep.subr.bf16.mxu1 %v15751_v6 }
 0x370   :  { %15354 = vmatmul.mubr.msk.bf16.vlgmr.msra.gmra.mrb[148].mxu1 %vm11717_vm2, %v13263_v29 }
 0x371   :  { %14928 = vmatpush3.bf16.msra.mxu0 %v15700_v58  ;;  %15358 = vmatpush3.bf16.msra.mxu1 %v15701_v24 }
 0x372   :  { %15359 = vmatprep.subr.bf16.mxu1 %v15751_v6  ;;  %15361 = vmatprep.mubr.msk.bf16.mxu1 %vm15755_vm3, %v15751_v6 }
 0x373   :  { %15365 = vmatprep.subr.bf16.mxu0 %v15751_v6 }
 0x374   :  { %13686 = vmatmul.mubr.bf16.vlgmr.msra.gmra.mrb[32].mxu0 %v13537_v63 }
 0x375   :  { %15360 = vmatpush3.bf16.msra.mxu1 %v15702_v57  ;;  %15369 = vmatprep.mubr.msk.bf16.mxu0 %vm15755_vm3, %v15751_v6 }
 0x376   :  { %15366 = vmatpush3.bf16.msra.mxu0 %v15703_v20 }
 0x377   :  { %15367 = vmatprep.subr.bf16.mxu0 %v15751_v6 }
 0x37a   :  { %15368 = vmatpush3.bf16.msra.mxu0 %v15704_v3 }
 0x37c   :  { %15362 = vmatmul.mubr.msk.bf16.vlgmr.msra.gmra.mrb[148].mxu1 %vm11717_vm2, %v13539_v62 }
 0x3c7   :  { %v14754_v37 = vpop.f32.mrb[16].mxu0  ;;  %v14779_v33 = vpop.f32.mrb[152].mxu1 }
 0x3c8   :  { %v14755_v35 = vpop.f32.mrb[17].mxu0  ;;  %v14780_v10 = vpop.f32.mrb[153].mxu1 }
 0x3c9   :  { %v14756_v47 = vadd.f32 %v14755_v35, %v14754_v37  ;;  %v14781_v21 = vadd.f32 %v14780_v10, %v14779_v33  ;;  %v14757_v48 = vpop.f32.mrb[18].mxu0  ;;  %v14782_v40 = vpop.f32.mrb[154].mxu1 }
 0x3ca   :  { %v14758_v52 = vpop.f32.mrb[19].mxu0  ;;  %v14783_v11 = vpop.f32.mrb[155].mxu1 }
 0x3cb   :  { %v15375_v59 = vadd.f32 %v14756_v47, %v14185_v17 }
 0x3cd   :  { %v15376_v32 = vadd.f32 %v15375_v59, %v14781_v21 }
 0x3e7   :  { %v14804_v14 = vpop.f32.mrb[20].mxu0 }
 0x3e8   :  { %v14805_v4 = vpop.f32.mrb[21].mxu0 }
 0x3e9   :  { %v14806_v28 = vadd.f32 %v14805_v4, %v14804_v14  ;;  %v14807_v49 = vpop.f32.mrb[22].mxu0 }
 0x3ea   :  { %v14808_v45 = vpop.f32.mrb[23].mxu0 }
 0x3eb   :  { %v15377_v44 = vadd.f32 %v15376_v32, %v14806_v28 }
 0x3fb   :  { %v14829_v2 = vpop.f32.mrb[156].mxu1 }
 0x3fc   :  { %v14830_v60 = vpop.f32.mrb[157].mxu1 }
 0x3fd   :  { %v14831_v23 = vadd.f32 %v14830_v60, %v14829_v2  ;;  %v14832_v54 = vpop.f32.mrb[158].mxu1 }
 0x3fe   :  { %v14833_v16 = vpop.f32.mrb[159].mxu1 }
 0x3ff   :  { %v15378_v61 = vadd.f32 %v15377_v44, %v14831_v23 }
 0x407   :  { %v14854_v43 = vpop.f32.mrb[24].mxu0 }
 0x408   :  { %v14855_v18 = vpop.f32.mrb[25].mxu0 }
 0x409   :  { %v14856_v42 = vadd.f32 %v14855_v18, %v14854_v43  ;;  %v14857_v34 = vpop.f32.mrb[26].mxu0 }
 0x40a   :  { %v14858_v27 = vpop.f32.mrb[27].mxu0 }
 0x40b   :  { %v15379_v9 = vadd.f32 %v15378_v61, %v14856_v42 }
 0x427   :  { %v14879_v6 = vpop.f32.mrb[28].mxu0 }
 0x428   :  { %v14880_v50 = vpop.f32.mrb[29].mxu0 }
 0x429   :  { %v14881_v12 = vadd.f32 %v14880_v50, %v14879_v6  ;;  %v14882_v39 = vpop.f32.mrb[30].mxu0 }
 0x42a   :  { %v14883_v31 = vpop.f32.mrb[31].mxu0 }
 0x42b   :  { %v15380_v1 = vadd.f32 %v15379_v9, %v14881_v12 }
 0x43b   :  { %v14904_v55 = vpop.f32.mrb[160].mxu1 }
 0x43c   :  { %v14905_v38 = vpop.f32.mrb[161].mxu1 }
 0x43d   :  { %v14906_v13 = vadd.f32 %v14905_v38, %v14904_v55  ;;  %v14907_v19 = vpop.f32.mrb[162].mxu1 }
 0x43e   :  { %v14908_v25 = vpop.f32.mrb[163].mxu1 }
 0x43f   :  { %v15381_v30 = vadd.f32 %v15380_v1, %v14906_v13 }
 0x447   :  { %v14929_v8 = vpop.f32.mrb[32].mxu0 }
 0x448   :  { %v14930_v0 = vpop.f32.mrb[33].mxu0 }
 0x449   :  { %v14931_v36 = vadd.f32 %v14930_v0, %v14929_v8  ;;  %v14932_v56 = vpop.f32.mrb[34].mxu0 }
 0x44a   :  { %v14933_v15 = vpop.f32.mrb[35].mxu0 }
 0x44b   :  { %v15382_v7 = vadd.f32 %v15381_v30, %v14931_v36 }
 0x44f   :  { %v13727_v5 = vpop.f32.mrb[148].mxu1 }
 0x450   :  { %v15383_v22 = vadd.f32 %v15382_v7, %v13727_v5  ;;  %v15363_v41 = vpop.f32.mrb[149].mxu1 }
 0x451   :  { %v13730_v53 = vpop.f32.mrb[150].mxu1 }
 0x452   :  { %v13734_v58 = vmax.f32 %v15383_v22, 0.0  ;;  %v15364_v24 = vpop.f32.mrb[151].mxu1 }
 0x454   :  { %v13735_v29 = vpack.c.bf16 %v13734_v58, %v13734_v58 }
 0x456   :  { %15370 = vmatmul.mubr.msk.bf16.vlgmr.msra.gmra.mrb[36].mxu0 %vm11717_vm2, %v13735_v29 }
 0x529   :  { %v13796_v57 = vpop.f32.mrb[36].mxu0 }
 0x52a   :  { %v13797_v63 = vadd.f32 %v14590_v46, %v13796_v57  ;;  %v15371_v26 = vpop.f32.mrb[37].mxu0 }
 0x52b   :  { %v13799_v51 = vpop.f32.mrb[38].mxu0 }
 0x52c   :  { %13802 = vst [vmem:[#allocation2] sm:$0xff] %v13797_v63  ;;  %v15372_v62 = vpop.f32.mrb[39].mxu0 }
 0x52d   :  { %15737 = shalt.err (!%p15734_p4)
}
 0x52e   :  { %s15738_s6 = scalar_lea.hbm %s18826_s7, 128 }
 0x52f   :  { %p15739_p5 = scmp.ne.s32.totalorder %s18826_s7, %s15738_s6  ;;  %p15742_p6 = scmp.lt.u32.totalorder %s15738_s6, %s18826_s7 }
 0x531   :  { %p15744_p7 = pnand %p15742_p6, %p15739_p5 }
 0x533   :  { %15747 = shalt.err (!%p15744_p7)
}
 0x534   :  { %13812 = dma.vmem_to_hbm [thread:$0]  %s13810_s17, 128, %s18826_s7, [#allocation3]  }
 0x535   :  { %15748 = dma.done.wait [#allocation3], 128  }
 0x536   :  { %15749 = vsyncadd [#allocation3], 4294967168 }
 0x537   :  { %13816 = vsyncpa [#allocation3], 1 }

</bundles_post_ra>
